<compile_context>
chip_gen: v7x
topology: tpu7x:2x2x1
jax: 0.10.0
libtpu: 0.0.40
codegen_flags: <defaults>
</compile_context>

<pallas_src>
import functools

import numpy as np
import jax
import jax.numpy as jnp
from jax import lax
from jax.experimental import pallas as pl
from jax.experimental.pallas import tpu as pltpu

LANE = 128   # padded channel width / MXU lane width
KP1 = 32     # one conv1 5x5 patch (25 taps) padded to 32 lanes
NTAP = 4     # conv2 has 2x2 = 4 taps; NTAP * KP1 == LANE


# ----------------------------------------------------------------------------
# Fused kernel: fc + conv1 + conv2 + conv3 for TB samples per grid step.
# ----------------------------------------------------------------------------
def _fused_kernel(x_ref, wfc_ref, bfc_ref, w1_ref, b1_ref, w2_ref, b2_ref,
                  w3_ref, b3_ref, o_ref, patches_ref, *, rows2, tb):
    base = pl.program_id(0) * tb

    # Hoist the fc constants out of the per-sample loop (JAX does not CSE them).
    wfc0 = wfc_ref[0]                       # (rows2, LANE) f32
    wfc1 = wfc_ref[1]
    bfc = bfc_ref[...]
    aligned = (rows2 % 8) == 0

    # fc (Linear(2, side*side) + ReLU) on the VPU, emitted directly in the
    # lane-dense conv1 patch layout: per sample a (rows2, 128) slab whose lane
    # dim packs the 4 conv1 taps feeding one conv2 output position.
    def build(s, carry):
        x0 = x_ref[0, base + s]             # SMEM scalar reads
        x1 = x_ref[1, base + s]
        patch = jnp.maximum(x0 * wfc0 + x1 * wfc1 + bfc, 0.0)
        start = s * rows2
        if aligned:
            start = pl.multiple_of(start, 8)
        patches_ref[pl.ds(start, rows2), :] = patch
        return carry

    lax.fori_loop(0, tb, build, 0, unroll=True)

    mxu = w1_ref.dtype
    patches = patches_ref[...].astype(mxu)              # (tb*rows2, 128)

    # conv1 (k=5, s=5) + ReLU: one GEMM against a block-diagonal (128, 512) W.
    a1 = jnp.dot(patches, w1_ref[...], preferred_element_type=jnp.float32)
    a1 = jnp.maximum(a1 + b1_ref[...], 0.0)              # (M, 512)

    # conv2 (k=2, s=2) + ReLU: single (M, 512) @ (512, 128) GEMM.
    a2 = jnp.dot(a1.astype(mxu), w2_ref[...], preferred_element_type=jnp.float32)
    a2 = jnp.maximum(a2 + b2_ref[...], 0.0)              # (M, 128)

    # conv3 (1x1), no ReLU.
    y = jnp.dot(a2.astype(mxu), w3_ref[...], preferred_element_type=jnp.float32)
    o_ref[...] = y + b3_ref[...]                         # (M, 128)


# ----------------------------------------------------------------------------
# Host-side, one-time weight packing (PyTorch layouts -> kernel layouts).
# ----------------------------------------------------------------------------
def pack_params(params, *, num_z_grids, num_xy_grids, mxu_dtype=jnp.float32):
    nz, nxy = num_z_grids, num_xy_grids
    side = nxy * 10
    oh2 = nxy
    rows2 = oh2 * oh2
    oc = nz * 10
    assert NTAP * KP1 == LANE and oc <= LANE and nz <= LANE

    # Patch-slab addressing: row p2 = conv2 output position (i2, j2) row-major;
    # lane c = t*KP1 + q, t = dh*2 + dw (conv1 output pos (2*i2+dh, 2*j2+dw)),
    # q = kh*5 + kw (conv1 5x5 tap).  Stride-5/kernel-5 => non-overlapping taps.
    p2 = np.arange(rows2)
    i2, j2 = p2 // oh2, p2 % oh2
    t = np.arange(NTAP)
    dh, dw = t // 2, t % 2
    q = np.arange(25)
    kh, kw = q // 5, q % 5
    i1 = 2 * i2[:, None] + dh[None, :]                         # (rows2, 4)
    j1 = 2 * j2[:, None] + dw[None, :]
    flat = ((5 * i1[:, :, None] + kh[None, None, :]) * side
            + (5 * j1[:, :, None] + kw[None, None, :]))        # (rows2, 4, 25)

    fc_w = np.asarray(params["fc_w"], np.float32)              # (2, side*side)
    fc_b = np.asarray(params["fc_b"], np.float32).reshape(-1)  # (side*side,)
    w_fc = np.zeros((2, rows2, LANE), np.float32)
    b_fc = np.zeros((rows2, LANE), np.float32)
    for tt in range(NTAP):
        w_fc[:, :, tt * KP1:tt * KP1 + 25] = fc_w[:, flat[:, tt, :]]
        b_fc[:, tt * KP1:tt * KP1 + 25] = fc_b[flat[:, tt, :]]

    # conv1: block-diagonal (128, 512) so one GEMM covers all 4 taps.
    c1_w = np.asarray(params["c1_w"], np.float32)              # (oc, 1, 5, 5)
    c1_b = np.asarray(params["c1_b"], np.float32)
    c1_mat = c1_w[:, 0].reshape(oc, 25).T                      # (25, oc)
    w1 = np.zeros((LANE, NTAP * LANE), np.float32)
    b1 = np.zeros((1, NTAP * LANE), np.float32)
    for tt in range(NTAP):
        w1[tt * KP1:tt * KP1 + 25, tt * LANE:tt * LANE + oc] = c1_mat
        b1[0, tt * LANE:tt * LANE + oc] = c1_b

    # conv2: (512, 128), rows ordered (tap, in-channel).
    c2_w = np.asarray(params["c2_w"], np.float32)              # (oc, oc, 2, 2)
    w2 = np.zeros((NTAP * LANE, LANE), np.float32)
    for tt in range(NTAP):
        w2[tt * LANE:tt * LANE + oc, :oc] = c2_w[:, :, tt // 2, tt % 2].T
    b2 = np.zeros((1, LANE), np.float32)
    b2[0, :oc] = np.asarray(params["c2_b"], np.float32)

    # conv3 (1x1): plain (128, 128).
    c3_w = np.asarray(params["c3_w"], np.float32)              # (nz, oc, 1, 1)
    w3 = np.zeros((LANE, LANE), np.float32)
    w3[:oc, :nz] = c3_w[:, :, 0, 0].T
    b3 = np.zeros((1, LANE), np.float32)
    b3[0, :nz] = np.asarray(params["c3_b"], np.float32)

    return {
        "w_fc": jnp.asarray(w_fc), "b_fc": jnp.asarray(b_fc),
        "w1": jnp.asarray(w1, mxu_dtype), "b1": jnp.asarray(b1),
        "w2": jnp.asarray(w2, mxu_dtype), "b2": jnp.asarray(b2),
        "w3": jnp.asarray(w3, mxu_dtype), "b3": jnp.asarray(b3),
    }


# ----------------------------------------------------------------------------
# Forward: one pallas_call; tiny slice/reshape afterwards for NHWC.
# ----------------------------------------------------------------------------
def conv_cnn_forward(x, packed, *, num_z_grids, num_xy_grids, batch_tile=16):
    nz, nxy = num_z_grids, num_xy_grids
    rows2 = nxy * nxy
    B = x.shape[0]
    tb = max(1, int(batch_tile))
    Bp = ((B + tb - 1) // tb) * tb          # pad batch up to a tile multiple
    n_steps = Bp // tb

    # x stored transposed (2, Bp) in SMEM: pads to a few KB instead of the
    # [ceil(B/8)*8, 128]-word blowup a (B, 2) SMEM array would cost.
    xt = jnp.zeros((2, Bp), jnp.float32).at[:, :B].set(x.astype(jnp.float32).T)

    out = pl.pallas_call(
        functools.partial(_fused_kernel, rows2=rows2, tb=tb),
        out_shape=jax.ShapeDtypeStruct((Bp * rows2, LANE), jnp.float32),
        grid=(n_steps,),
        in_specs=[
            pl.BlockSpec(memory_space=pltpu.MemorySpace.SMEM),       # x (2, Bp)
            pl.BlockSpec((2, rows2, LANE), lambda g: (0, 0, 0)),     # fc W (patch layout)
            pl.BlockSpec((rows2, LANE), lambda g: (0, 0)),           # fc b (patch layout)
            pl.BlockSpec((LANE, NTAP * LANE), lambda g: (0, 0)),     # conv1 W (block diag)
            pl.BlockSpec((1, NTAP * LANE), lambda g: (0, 0)),        # conv1 b (x4 taps)
            pl.BlockSpec((NTAP * LANE, LANE), lambda g: (0, 0)),     # conv2 W
            pl.BlockSpec((1, LANE), lambda g: (0, 0)),               # conv2 b
            pl.BlockSpec((LANE, LANE), lambda g: (0, 0)),            # conv3 W
            pl.BlockSpec((1, LANE), lambda g: (0, 0)),               # conv3 b
        ],
        out_specs=pl.BlockSpec((tb * rows2, LANE), lambda g: (g, 0)),
        scratch_shapes=[pltpu.VMEM((tb * rows2, LANE), jnp.float32)],
        compiler_params=pltpu.CompilerParams(
            dimension_semantics=("parallel",)),
    )(xt, packed["w_fc"], packed["b_fc"], packed["w1"], packed["b1"],
      packed["w2"], packed["b2"], packed["w3"], packed["b3"])

    # Rows are (sample, i2, j2) row-major, lanes are channels -> NHWC slice.
    # TODO(synk): at very large batch, fold the :nz lane slice into the
    # downstream consumer to cut the 128-lane HBM writeback amplification.
    out = out.reshape(Bp, rows2, LANE)[:B, :, :nz]
    return out.reshape(B, nxy, nxy, nz)


# ----------------------------------------------------------------------------
# Pure-JAX reference (lax.conv) for correctness, PyTorch-layout params.
# ----------------------------------------------------------------------------
def conv_cnn_reference(x, params, *, num_z_grids, num_xy_grids):
    h = jnp.maximum(x @ params["fc_w"] + params["fc_b"], 0.0)
    B = x.shape[0]
    side = num_xy_grids * 10
    img = h.reshape(B, 1, side, side)

    def conv(z, w, b, s):
        y = jax.lax.conv_general_dilated(
            z, w, window_strides=(s, s), padding="VALID",
            dimension_numbers=("NCHW", "OIHW", "NCHW"))
        return y + b.reshape(1, -1, 1, 1)

    img = jnp.maximum(conv(img, params["c1_w"], params["c1_b"], 5), 0.0)
    img = jnp.maximum(conv(img, params["c2_w"], params["c2_b"], 2), 0.0)
    img = conv(img, params["c3_w"], params["c3_b"], 1)
    return jnp.transpose(img, (0, 2, 3, 1))


def init_params(key, *, num_z_grids, num_xy_grids):
    oc = num_z_grids * 10
    fc_out = num_xy_grids * num_xy_grids * 100
    ks = jax.random.split(key, 8)
    s = 0.2
    return {
        "fc_w": s * jax.random.normal(ks[0], (2, fc_out), jnp.float32),
        "fc_b": s * jax.random.normal(ks[1], (1, fc_out), jnp.float32),
        "c1_w": s * jax.random.normal(ks[2], (oc, 1, 5, 5), jnp.float32),
        "c1_b": s * jax.random.normal(ks[3], (oc,), jnp.float32),
        "c2_w": s * jax.random.normal(ks[4], (oc, oc, 2, 2), jnp.float32),
        "c2_b": s * jax.random.normal(ks[5], (oc,), jnp.float32),
        "c3_w": s * jax.random.normal(ks[6], (num_z_grids, oc, 1, 1), jnp.float32),
        "c3_b": s * jax.random.normal(ks[7], (num_z_grids,), jnp.float32),
    }


if __name__ == "__main__":
    # Config: num_z_grids=4, num_xy_grids=4 -> fc out = 1600, image 40x40,
    # conv1 -> 8x8x40, conv2 -> 4x4x40, conv3 -> 4x4x4; output (B, 4, 4, 4) NHWC.
    # BATCH_TILE=16 -> M = 16*16 = 256 GEMM rows per grid step; BATCH=32 gives
    # a 2-step grid (keeps both v7x TensorCores busy).
    NUM_Z, NUM_XY, BATCH, BATCH_TILE = 4, 4, 32, 16

    key = jax.random.PRNGKey(0)
    kp, kx = jax.random.split(key)
    params = init_params(kp, num_z_grids=NUM_Z, num_xy_grids=NUM_XY)
    packed = pack_params(params, num_z_grids=NUM_Z, num_xy_grids=NUM_XY)
    x = jax.random.normal(kx, (BATCH, 2), jnp.float32)

    fwd = jax.jit(functools.partial(
        conv_cnn_forward, num_z_grids=NUM_Z, num_xy_grids=NUM_XY,
        batch_tile=BATCH_TILE))
    out = jax.block_until_ready(fwd(x, packed))
    assert out.shape == (BATCH, NUM_XY, NUM_XY, NUM_Z), out.shape

    ref = jax.block_until_ready(
        conv_cnn_reference(x, params, num_z_grids=NUM_Z, num_xy_grids=NUM_XY))
    max_err = float(jnp.max(jnp.abs(out - ref)))
    assert jnp.allclose(out, ref, rtol=1e-3, atol=1e-3), max_err

    print("KERNEL_OK")
</pallas_src>

<mosaic_0001>
module attributes {stable_mosaic.version = 11 : i64} {
  func.func @_fused_kernel(%arg0: i32, %arg1: memref<2x32xf32, #tpu.memory_space<smem>>, %arg2: memref<2x16x128xf32, #tpu.memory_space<vmem>>, %arg3: memref<16x128xf32, #tpu.memory_space<vmem>>, %arg4: memref<128x512xf32, #tpu.memory_space<vmem>>, %arg5: memref<1x512xf32, #tpu.memory_space<vmem>>, %arg6: memref<512x128xf32, #tpu.memory_space<vmem>>, %arg7: memref<1x128xf32, #tpu.memory_space<vmem>>, %arg8: memref<128x128xf32, #tpu.memory_space<vmem>>, %arg9: memref<1x128xf32, #tpu.memory_space<vmem>>, %arg10: memref<256x128xf32, #tpu.memory_space<vmem>>, %arg11: memref<256x128xf32, #tpu.memory_space<vmem>>) attributes {dimension_semantics = [#tpu.dimension_semantics<parallel>], iteration_bounds = array<i64: 2>, scalar_prefetch = 0 : i64, scratch_operands = 1 : i64, tpu.core_type = #tpu.core_type<tc>, window_params = [{transform_indices = @transform_0, window_bounds = array<i64: 2, 32>}, {pipeline_mode = #tpu.pipeline_mode<synchronous>, transform_indices = @transform_1, window_bounds = array<i64: 2, 16, 128>}, {pipeline_mode = #tpu.pipeline_mode<synchronous>, transform_indices = @transform_2, window_bounds = array<i64: 16, 128>}, {pipeline_mode = #tpu.pipeline_mode<synchronous>, transform_indices = @transform_3, window_bounds = array<i64: 128, 512>}, {pipeline_mode = #tpu.pipeline_mode<synchronous>, transform_indices = @transform_4, window_bounds = array<i64: 1, 512>}, {pipeline_mode = #tpu.pipeline_mode<synchronous>, transform_indices = @transform_5, window_bounds = array<i64: 512, 128>}, {pipeline_mode = #tpu.pipeline_mode<synchronous>, transform_indices = @transform_6, window_bounds = array<i64: 1, 128>}, {pipeline_mode = #tpu.pipeline_mode<synchronous>, transform_indices = @transform_7, window_bounds = array<i64: 128, 128>}, {pipeline_mode = #tpu.pipeline_mode<synchronous>, transform_indices = @transform_8, window_bounds = array<i64: 1, 128>}, {transform_indices = @transform_9, window_bounds = array<i64: 256, 128>}]} {
    %c16_i32 = arith.constant 16 : i32
    %0 = arith.muli %arg0, %c16_i32 : i32
    %c0 = arith.constant 0 : index
    %c0_0 = arith.constant 0 : index
    %c0_1 = arith.constant 0 : index
    %1 = vector.load %arg2[%c0, %c0_0, %c0_1] : memref<2x16x128xf32, #tpu.memory_space<vmem>>, vector<1x16x128xf32>
    %2 = vector.shape_cast %1 : vector<1x16x128xf32> to vector<16x128xf32>
    %c1 = arith.constant 1 : index
    %c0_2 = arith.constant 0 : index
    %c0_3 = arith.constant 0 : index
    %3 = vector.load %arg2[%c1, %c0_2, %c0_3] : memref<2x16x128xf32, #tpu.memory_space<vmem>>, vector<1x16x128xf32>
    %4 = vector.shape_cast %3 : vector<1x16x128xf32> to vector<16x128xf32>
    %c0_4 = arith.constant 0 : index
    %c0_5 = arith.constant 0 : index
    %5 = vector.load %arg3[%c0_4, %c0_5] : memref<16x128xf32, #tpu.memory_space<vmem>>, vector<16x128xf32>
    %c0_i32 = arith.constant 0 : i32
    %6 = arith.addi %0, %c0_i32 : i32
    %c0_6 = arith.constant 0 : index
    %7 = arith.index_cast %6 : i32 to index
    %8 = memref.load %arg1[%c0_6, %7] : memref<2x32xf32, #tpu.memory_space<smem>>
    %9 = arith.addi %0, %c0_i32 : i32
    %c1_7 = arith.constant 1 : index
    %10 = arith.index_cast %9 : i32 to index
    %11 = memref.load %arg1[%c1_7, %10] : memref<2x32xf32, #tpu.memory_space<smem>>
    %12 = vector.broadcast %8 : f32 to vector<16x128xf32>
    %13 = arith.mulf %12, %2 : vector<16x128xf32>
    %14 = vector.broadcast %11 : f32 to vector<16x128xf32>
    %15 = arith.mulf %14, %4 : vector<16x128xf32>
    %16 = arith.addf %13, %15 : vector<16x128xf32>
    %17 = arith.addf %16, %5 : vector<16x128xf32>
    %cst = arith.constant 0.000000e+00 : f32
    %18 = vector.broadcast %cst : f32 to vector<16x128xf32>
    %19 = arith.maximumf %17, %18 : vector<16x128xf32>
    %c16_i32_8 = arith.constant 16 : i32
    %20 = arith.muli %c0_i32, %c16_i32_8 : i32
    %21 = tpu.assume_multiple %20, 8 : i32
    %22 = arith.index_cast %21 : i32 to index
    %c0_9 = arith.constant 0 : index
    %23 = vector.load %arg11[%22, %c0_9] : memref<256x128xf32, #tpu.memory_space<vmem>>, vector<16x128xf32>
    tpu.vector_store %arg11[%22, %c0_9], %19 {strides = array<i32>} : memref<256x128xf32, #tpu.memory_space<vmem>>, vector<16x128xf32>,
    %c1_i32 = arith.constant 1 : i32
    %24 = arith.addi %0, %c1_i32 : i32
    %c0_10 = arith.constant 0 : index
    %25 = arith.index_cast %24 : i32 to index
    %26 = memref.load %arg1[%c0_10, %25] : memref<2x32xf32, #tpu.memory_space<smem>>
    %27 = arith.addi %0, %c1_i32 : i32
    %c1_11 = arith.constant 1 : index
    %28 = arith.index_cast %27 : i32 to index
    %29 = memref.load %arg1[%c1_11, %28] : memref<2x32xf32, #tpu.memory_space<smem>>
    %30 = vector.broadcast %26 : f32 to vector<16x128xf32>
    %31 = arith.mulf %30, %2 : vector<16x128xf32>
    %32 = vector.broadcast %29 : f32 to vector<16x128xf32>
    %33 = arith.mulf %32, %4 : vector<16x128xf32>
    %34 = arith.addf %31, %33 : vector<16x128xf32>
    %35 = arith.addf %34, %5 : vector<16x128xf32>
    %cst_12 = arith.constant 0.000000e+00 : f32
    %36 = vector.broadcast %cst_12 : f32 to vector<16x128xf32>
    %37 = arith.maximumf %35, %36 : vector<16x128xf32>
    %c16_i32_13 = arith.constant 16 : i32
    %38 = arith.muli %c1_i32, %c16_i32_13 : i32
    %39 = tpu.assume_multiple %38, 8 : i32
    %40 = arith.index_cast %39 : i32 to index
    %c0_14 = arith.constant 0 : index
    %41 = vector.load %arg11[%40, %c0_14] : memref<256x128xf32, #tpu.memory_space<vmem>>, vector<16x128xf32>
    tpu.vector_store %arg11[%40, %c0_14], %37 {strides = array<i32>} : memref<256x128xf32, #tpu.memory_space<vmem>>, vector<16x128xf32>,
    %c2_i32 = arith.constant 2 : i32
    %42 = arith.addi %0, %c2_i32 : i32
    %c0_15 = arith.constant 0 : index
    %43 = arith.index_cast %42 : i32 to index
    %44 = memref.load %arg1[%c0_15, %43] : memref<2x32xf32, #tpu.memory_space<smem>>
    %45 = arith.addi %0, %c2_i32 : i32
    %c1_16 = arith.constant 1 : index
    %46 = arith.index_cast %45 : i32 to index
    %47 = memref.load %arg1[%c1_16, %46] : memref<2x32xf32, #tpu.memory_space<smem>>
    %48 = vector.broadcast %44 : f32 to vector<16x128xf32>
    %49 = arith.mulf %48, %2 : vector<16x128xf32>
    %50 = vector.broadcast %47 : f32 to vector<16x128xf32>
    %51 = arith.mulf %50, %4 : vector<16x128xf32>
    %52 = arith.addf %49, %51 : vector<16x128xf32>
    %53 = arith.addf %52, %5 : vector<16x128xf32>
    %cst_17 = arith.constant 0.000000e+00 : f32
    %54 = vector.broadcast %cst_17 : f32 to vector<16x128xf32>
    %55 = arith.maximumf %53, %54 : vector<16x128xf32>
    %c16_i32_18 = arith.constant 16 : i32
    %56 = arith.muli %c2_i32, %c16_i32_18 : i32
    %57 = tpu.assume_multiple %56, 8 : i32
    %58 = arith.index_cast %57 : i32 to index
    %c0_19 = arith.constant 0 : index
    %59 = vector.load %arg11[%58, %c0_19] : memref<256x128xf32, #tpu.memory_space<vmem>>, vector<16x128xf32>
    tpu.vector_store %arg11[%58, %c0_19], %55 {strides = array<i32>} : memref<256x128xf32, #tpu.memory_space<vmem>>, vector<16x128xf32>,
    %c3_i32 = arith.constant 3 : i32
    %60 = arith.addi %0, %c3_i32 : i32
    %c0_20 = arith.constant 0 : index
    %61 = arith.index_cast %60 : i32 to index
    %62 = memref.load %arg1[%c0_20, %61] : memref<2x32xf32, #tpu.memory_space<smem>>
    %63 = arith.addi %0, %c3_i32 : i32
    %c1_21 = arith.constant 1 : index
    %64 = arith.index_cast %63 : i32 to index
    %65 = memref.load %arg1[%c1_21, %64] : memref<2x32xf32, #tpu.memory_space<smem>>
    %66 = vector.broadcast %62 : f32 to vector<16x128xf32>
    %67 = arith.mulf %66, %2 : vector<16x128xf32>
    %68 = vector.broadcast %65 : f32 to vector<16x128xf32>
    %69 = arith.mulf %68, %4 : vector<16x128xf32>
    %70 = arith.addf %67, %69 : vector<16x128xf32>
    %71 = arith.addf %70, %5 : vector<16x128xf32>
    %cst_22 = arith.constant 0.000000e+00 : f32
    %72 = vector.broadcast %cst_22 : f32 to vector<16x128xf32>
    %73 = arith.maximumf %71, %72 : vector<16x128xf32>
    %c16_i32_23 = arith.constant 16 : i32
    %74 = arith.muli %c3_i32, %c16_i32_23 : i32
    %75 = tpu.assume_multiple %74, 8 : i32
    %76 = arith.index_cast %75 : i32 to index
    %c0_24 = arith.constant 0 : index
    %77 = vector.load %arg11[%76, %c0_24] : memref<256x128xf32, #tpu.memory_space<vmem>>, vector<16x128xf32>
    tpu.vector_store %arg11[%76, %c0_24], %73 {strides = array<i32>} : memref<256x128xf32, #tpu.memory_space<vmem>>, vector<16x128xf32>,
    %c4_i32 = arith.constant 4 : i32
    %78 = arith.addi %0, %c4_i32 : i32
    %c0_25 = arith.constant 0 : index
    %79 = arith.index_cast %78 : i32 to index
    %80 = memref.load %arg1[%c0_25, %79] : memref<2x32xf32, #tpu.memory_space<smem>>
    %81 = arith.addi %0, %c4_i32 : i32
    %c1_26 = arith.constant 1 : index
    %82 = arith.index_cast %81 : i32 to index
    %83 = memref.load %arg1[%c1_26, %82] : memref<2x32xf32, #tpu.memory_space<smem>>
    %84 = vector.broadcast %80 : f32 to vector<16x128xf32>
    %85 = arith.mulf %84, %2 : vector<16x128xf32>
    %86 = vector.broadcast %83 : f32 to vector<16x128xf32>
    %87 = arith.mulf %86, %4 : vector<16x128xf32>
    %88 = arith.addf %85, %87 : vector<16x128xf32>
    %89 = arith.addf %88, %5 : vector<16x128xf32>
    %cst_27 = arith.constant 0.000000e+00 : f32
    %90 = vector.broadcast %cst_27 : f32 to vector<16x128xf32>
    %91 = arith.maximumf %89, %90 : vector<16x128xf32>
    %c16_i32_28 = arith.constant 16 : i32
    %92 = arith.muli %c4_i32, %c16_i32_28 : i32
    %93 = tpu.assume_multiple %92, 8 : i32
    %94 = arith.index_cast %93 : i32 to index
    %c0_29 = arith.constant 0 : index
    %95 = vector.load %arg11[%94, %c0_29] : memref<256x128xf32, #tpu.memory_space<vmem>>, vector<16x128xf32>
    tpu.vector_store %arg11[%94, %c0_29], %91 {strides = array<i32>} : memref<256x128xf32, #tpu.memory_space<vmem>>, vector<16x128xf32>,
    %c5_i32 = arith.constant 5 : i32
    %96 = arith.addi %0, %c5_i32 : i32
    %c0_30 = arith.constant 0 : index
    %97 = arith.index_cast %96 : i32 to index
    %98 = memref.load %arg1[%c0_30, %97] : memref<2x32xf32, #tpu.memory_space<smem>>
    %99 = arith.addi %0, %c5_i32 : i32
    %c1_31 = arith.constant 1 : index
    %100 = arith.index_cast %99 : i32 to index
    %101 = memref.load %arg1[%c1_31, %100] : memref<2x32xf32, #tpu.memory_space<smem>>
    %102 = vector.broadcast %98 : f32 to vector<16x128xf32>
    %103 = arith.mulf %102, %2 : vector<16x128xf32>
    %104 = vector.broadcast %101 : f32 to vector<16x128xf32>
    %105 = arith.mulf %104, %4 : vector<16x128xf32>
    %106 = arith.addf %103, %105 : vector<16x128xf32>
    %107 = arith.addf %106, %5 : vector<16x128xf32>
    %cst_32 = arith.constant 0.000000e+00 : f32
    %108 = vector.broadcast %cst_32 : f32 to vector<16x128xf32>
    %109 = arith.maximumf %107, %108 : vector<16x128xf32>
    %c16_i32_33 = arith.constant 16 : i32
    %110 = arith.muli %c5_i32, %c16_i32_33 : i32
    %111 = tpu.assume_multiple %110, 8 : i32
    %112 = arith.index_cast %111 : i32 to index
    %c0_34 = arith.constant 0 : index
    %113 = vector.load %arg11[%112, %c0_34] : memref<256x128xf32, #tpu.memory_space<vmem>>, vector<16x128xf32>
    tpu.vector_store %arg11[%112, %c0_34], %109 {strides = array<i32>} : memref<256x128xf32, #tpu.memory_space<vmem>>, vector<16x128xf32>,
    %c6_i32 = arith.constant 6 : i32
    %114 = arith.addi %0, %c6_i32 : i32
    %c0_35 = arith.constant 0 : index
    %115 = arith.index_cast %114 : i32 to index
    %116 = memref.load %arg1[%c0_35, %115] : memref<2x32xf32, #tpu.memory_space<smem>>
    %117 = arith.addi %0, %c6_i32 : i32
    %c1_36 = arith.constant 1 : index
    %118 = arith.index_cast %117 : i32 to index
    %119 = memref.load %arg1[%c1_36, %118] : memref<2x32xf32, #tpu.memory_space<smem>>
    %120 = vector.broadcast %116 : f32 to vector<16x128xf32>
    %121 = arith.mulf %120, %2 : vector<16x128xf32>
    %122 = vector.broadcast %119 : f32 to vector<16x128xf32>
    %123 = arith.mulf %122, %4 : vector<16x128xf32>
    %124 = arith.addf %121, %123 : vector<16x128xf32>
    %125 = arith.addf %124, %5 : vector<16x128xf32>
    %cst_37 = arith.constant 0.000000e+00 : f32
    %126 = vector.broadcast %cst_37 : f32 to vector<16x128xf32>
    %127 = arith.maximumf %125, %126 : vector<16x128xf32>
    %c16_i32_38 = arith.constant 16 : i32
    %128 = arith.muli %c6_i32, %c16_i32_38 : i32
    %129 = tpu.assume_multiple %128, 8 : i32
    %130 = arith.index_cast %129 : i32 to index
    %c0_39 = arith.constant 0 : index
    %131 = vector.load %arg11[%130, %c0_39] : memref<256x128xf32, #tpu.memory_space<vmem>>, vector<16x128xf32>
    tpu.vector_store %arg11[%130, %c0_39], %127 {strides = array<i32>} : memref<256x128xf32, #tpu.memory_space<vmem>>, vector<16x128xf32>,
    %c7_i32 = arith.constant 7 : i32
    %132 = arith.addi %0, %c7_i32 : i32
    %c0_40 = arith.constant 0 : index
    %133 = arith.index_cast %132 : i32 to index
    %134 = memref.load %arg1[%c0_40, %133] : memref<2x32xf32, #tpu.memory_space<smem>>
    %135 = arith.addi %0, %c7_i32 : i32
    %c1_41 = arith.constant 1 : index
    %136 = arith.index_cast %135 : i32 to index
    %137 = memref.load %arg1[%c1_41, %136] : memref<2x32xf32, #tpu.memory_space<smem>>
    %138 = vector.broadcast %134 : f32 to vector<16x128xf32>
    %139 = arith.mulf %138, %2 : vector<16x128xf32>
    %140 = vector.broadcast %137 : f32 to vector<16x128xf32>
    %141 = arith.mulf %140, %4 : vector<16x128xf32>
    %142 = arith.addf %139, %141 : vector<16x128xf32>
    %143 = arith.addf %142, %5 : vector<16x128xf32>
    %cst_42 = arith.constant 0.000000e+00 : f32
    %144 = vector.broadcast %cst_42 : f32 to vector<16x128xf32>
    %145 = arith.maximumf %143, %144 : vector<16x128xf32>
    %c16_i32_43 = arith.constant 16 : i32
    %146 = arith.muli %c7_i32, %c16_i32_43 : i32
    %147 = tpu.assume_multiple %146, 8 : i32
    %148 = arith.index_cast %147 : i32 to index
    %c0_44 = arith.constant 0 : index
    %149 = vector.load %arg11[%148, %c0_44] : memref<256x128xf32, #tpu.memory_space<vmem>>, vector<16x128xf32>
    tpu.vector_store %arg11[%148, %c0_44], %145 {strides = array<i32>} : memref<256x128xf32, #tpu.memory_space<vmem>>, vector<16x128xf32>,
    %c8_i32 = arith.constant 8 : i32
    %150 = arith.addi %0, %c8_i32 : i32
    %c0_45 = arith.constant 0 : index
    %151 = arith.index_cast %150 : i32 to index
    %152 = memref.load %arg1[%c0_45, %151] : memref<2x32xf32, #tpu.memory_space<smem>>
    %153 = arith.addi %0, %c8_i32 : i32
    %c1_46 = arith.constant 1 : index
    %154 = arith.index_cast %153 : i32 to index
    %155 = memref.load %arg1[%c1_46, %154] : memref<2x32xf32, #tpu.memory_space<smem>>
    %156 = vector.broadcast %152 : f32 to vector<16x128xf32>
    %157 = arith.mulf %156, %2 : vector<16x128xf32>
    %158 = vector.broadcast %155 : f32 to vector<16x128xf32>
    %159 = arith.mulf %158, %4 : vector<16x128xf32>
    %160 = arith.addf %157, %159 : vector<16x128xf32>
    %161 = arith.addf %160, %5 : vector<16x128xf32>
    %cst_47 = arith.constant 0.000000e+00 : f32
    %162 = vector.broadcast %cst_47 : f32 to vector<16x128xf32>
    %163 = arith.maximumf %161, %162 : vector<16x128xf32>
    %c16_i32_48 = arith.constant 16 : i32
    %164 = arith.muli %c8_i32, %c16_i32_48 : i32
    %165 = tpu.assume_multiple %164, 8 : i32
    %166 = arith.index_cast %165 : i32 to index
    %c0_49 = arith.constant 0 : index
    %167 = vector.load %arg11[%166, %c0_49] : memref<256x128xf32, #tpu.memory_space<vmem>>, vector<16x128xf32>
    tpu.vector_store %arg11[%166, %c0_49], %163 {strides = array<i32>} : memref<256x128xf32, #tpu.memory_space<vmem>>, vector<16x128xf32>,
    %c9_i32 = arith.constant 9 : i32
    %168 = arith.addi %0, %c9_i32 : i32
    %c0_50 = arith.constant 0 : index
    %169 = arith.index_cast %168 : i32 to index
    %170 = memref.load %arg1[%c0_50, %169] : memref<2x32xf32, #tpu.memory_space<smem>>
    %171 = arith.addi %0, %c9_i32 : i32
    %c1_51 = arith.constant 1 : index
    %172 = arith.index_cast %171 : i32 to index
    %173 = memref.load %arg1[%c1_51, %172] : memref<2x32xf32, #tpu.memory_space<smem>>
    %174 = vector.broadcast %170 : f32 to vector<16x128xf32>
    %175 = arith.mulf %174, %2 : vector<16x128xf32>
    %176 = vector.broadcast %173 : f32 to vector<16x128xf32>
    %177 = arith.mulf %176, %4 : vector<16x128xf32>
    %178 = arith.addf %175, %177 : vector<16x128xf32>
    %179 = arith.addf %178, %5 : vector<16x128xf32>
    %cst_52 = arith.constant 0.000000e+00 : f32
    %180 = vector.broadcast %cst_52 : f32 to vector<16x128xf32>
    %181 = arith.maximumf %179, %180 : vector<16x128xf32>
    %c16_i32_53 = arith.constant 16 : i32
    %182 = arith.muli %c9_i32, %c16_i32_53 : i32
    %183 = tpu.assume_multiple %182, 8 : i32
    %184 = arith.index_cast %183 : i32 to index
    %c0_54 = arith.constant 0 : index
    %185 = vector.load %arg11[%184, %c0_54] : memref<256x128xf32, #tpu.memory_space<vmem>>, vector<16x128xf32>
    tpu.vector_store %arg11[%184, %c0_54], %181 {strides = array<i32>} : memref<256x128xf32, #tpu.memory_space<vmem>>, vector<16x128xf32>,
    %c10_i32 = arith.constant 10 : i32
    %186 = arith.addi %0, %c10_i32 : i32
    %c0_55 = arith.constant 0 : index
    %187 = arith.index_cast %186 : i32 to index
    %188 = memref.load %arg1[%c0_55, %187] : memref<2x32xf32, #tpu.memory_space<smem>>
    %189 = arith.addi %0, %c10_i32 : i32
    %c1_56 = arith.constant 1 : index
    %190 = arith.index_cast %189 : i32 to index
    %191 = memref.load %arg1[%c1_56, %190] : memref<2x32xf32, #tpu.memory_space<smem>>
    %192 = vector.broadcast %188 : f32 to vector<16x128xf32>
    %193 = arith.mulf %192, %2 : vector<16x128xf32>
    %194 = vector.broadcast %191 : f32 to vector<16x128xf32>
    %195 = arith.mulf %194, %4 : vector<16x128xf32>
    %196 = arith.addf %193, %195 : vector<16x128xf32>
    %197 = arith.addf %196, %5 : vector<16x128xf32>
    %cst_57 = arith.constant 0.000000e+00 : f32
    %198 = vector.broadcast %cst_57 : f32 to vector<16x128xf32>
    %199 = arith.maximumf %197, %198 : vector<16x128xf32>
    %c16_i32_58 = arith.constant 16 : i32
    %200 = arith.muli %c10_i32, %c16_i32_58 : i32
    %201 = tpu.assume_multiple %200, 8 : i32
    %202 = arith.index_cast %201 : i32 to index
    %c0_59 = arith.constant 0 : index
    %203 = vector.load %arg11[%202, %c0_59] : memref<256x128xf32, #tpu.memory_space<vmem>>, vector<16x128xf32>
    tpu.vector_store %arg11[%202, %c0_59], %199 {strides = array<i32>} : memref<256x128xf32, #tpu.memory_space<vmem>>, vector<16x128xf32>,
    %c11_i32 = arith.constant 11 : i32
    %204 = arith.addi %0, %c11_i32 : i32
    %c0_60 = arith.constant 0 : index
    %205 = arith.index_cast %204 : i32 to index
    %206 = memref.load %arg1[%c0_60, %205] : memref<2x32xf32, #tpu.memory_space<smem>>
    %207 = arith.addi %0, %c11_i32 : i32
    %c1_61 = arith.constant 1 : index
    %208 = arith.index_cast %207 : i32 to index
    %209 = memref.load %arg1[%c1_61, %208] : memref<2x32xf32, #tpu.memory_space<smem>>
    %210 = vector.broadcast %206 : f32 to vector<16x128xf32>
    %211 = arith.mulf %210, %2 : vector<16x128xf32>
    %212 = vector.broadcast %209 : f32 to vector<16x128xf32>
    %213 = arith.mulf %212, %4 : vector<16x128xf32>
    %214 = arith.addf %211, %213 : vector<16x128xf32>
    %215 = arith.addf %214, %5 : vector<16x128xf32>
    %cst_62 = arith.constant 0.000000e+00 : f32
    %216 = vector.broadcast %cst_62 : f32 to vector<16x128xf32>
    %217 = arith.maximumf %215, %216 : vector<16x128xf32>
    %c16_i32_63 = arith.constant 16 : i32
    %218 = arith.muli %c11_i32, %c16_i32_63 : i32
    %219 = tpu.assume_multiple %218, 8 : i32
    %220 = arith.index_cast %219 : i32 to index
    %c0_64 = arith.constant 0 : index
    %221 = vector.load %arg11[%220, %c0_64] : memref<256x128xf32, #tpu.memory_space<vmem>>, vector<16x128xf32>
    tpu.vector_store %arg11[%220, %c0_64], %217 {strides = array<i32>} : memref<256x128xf32, #tpu.memory_space<vmem>>, vector<16x128xf32>,
    %c12_i32 = arith.constant 12 : i32
    %222 = arith.addi %0, %c12_i32 : i32
    %c0_65 = arith.constant 0 : index
    %223 = arith.index_cast %222 : i32 to index
    %224 = memref.load %arg1[%c0_65, %223] : memref<2x32xf32, #tpu.memory_space<smem>>
    %225 = arith.addi %0, %c12_i32 : i32
    %c1_66 = arith.constant 1 : index
    %226 = arith.index_cast %225 : i32 to index
    %227 = memref.load %arg1[%c1_66, %226] : memref<2x32xf32, #tpu.memory_space<smem>>
    %228 = vector.broadcast %224 : f32 to vector<16x128xf32>
    %229 = arith.mulf %228, %2 : vector<16x128xf32>
    %230 = vector.broadcast %227 : f32 to vector<16x128xf32>
    %231 = arith.mulf %230, %4 : vector<16x128xf32>
    %232 = arith.addf %229, %231 : vector<16x128xf32>
    %233 = arith.addf %232, %5 : vector<16x128xf32>
    %cst_67 = arith.constant 0.000000e+00 : f32
    %234 = vector.broadcast %cst_67 : f32 to vector<16x128xf32>
    %235 = arith.maximumf %233, %234 : vector<16x128xf32>
    %c16_i32_68 = arith.constant 16 : i32
    %236 = arith.muli %c12_i32, %c16_i32_68 : i32
    %237 = tpu.assume_multiple %236, 8 : i32
    %238 = arith.index_cast %237 : i32 to index
    %c0_69 = arith.constant 0 : index
    %239 = vector.load %arg11[%238, %c0_69] : memref<256x128xf32, #tpu.memory_space<vmem>>, vector<16x128xf32>
    tpu.vector_store %arg11[%238, %c0_69], %235 {strides = array<i32>} : memref<256x128xf32, #tpu.memory_space<vmem>>, vector<16x128xf32>,
    %c13_i32 = arith.constant 13 : i32
    %240 = arith.addi %0, %c13_i32 : i32
    %c0_70 = arith.constant 0 : index
    %241 = arith.index_cast %240 : i32 to index
    %242 = memref.load %arg1[%c0_70, %241] : memref<2x32xf32, #tpu.memory_space<smem>>
    %243 = arith.addi %0, %c13_i32 : i32
    %c1_71 = arith.constant 1 : index
    %244 = arith.index_cast %243 : i32 to index
    %245 = memref.load %arg1[%c1_71, %244] : memref<2x32xf32, #tpu.memory_space<smem>>
    %246 = vector.broadcast %242 : f32 to vector<16x128xf32>
    %247 = arith.mulf %246, %2 : vector<16x128xf32>
    %248 = vector.broadcast %245 : f32 to vector<16x128xf32>
    %249 = arith.mulf %248, %4 : vector<16x128xf32>
    %250 = arith.addf %247, %249 : vector<16x128xf32>
    %251 = arith.addf %250, %5 : vector<16x128xf32>
    %cst_72 = arith.constant 0.000000e+00 : f32
    %252 = vector.broadcast %cst_72 : f32 to vector<16x128xf32>
    %253 = arith.maximumf %251, %252 : vector<16x128xf32>
    %c16_i32_73 = arith.constant 16 : i32
    %254 = arith.muli %c13_i32, %c16_i32_73 : i32
    %255 = tpu.assume_multiple %254, 8 : i32
    %256 = arith.index_cast %255 : i32 to index
    %c0_74 = arith.constant 0 : index
    %257 = vector.load %arg11[%256, %c0_74] : memref<256x128xf32, #tpu.memory_space<vmem>>, vector<16x128xf32>
    tpu.vector_store %arg11[%256, %c0_74], %253 {strides = array<i32>} : memref<256x128xf32, #tpu.memory_space<vmem>>, vector<16x128xf32>,
    %c14_i32 = arith.constant 14 : i32
    %258 = arith.addi %0, %c14_i32 : i32
    %c0_75 = arith.constant 0 : index
    %259 = arith.index_cast %258 : i32 to index
    %260 = memref.load %arg1[%c0_75, %259] : memref<2x32xf32, #tpu.memory_space<smem>>
    %261 = arith.addi %0, %c14_i32 : i32
    %c1_76 = arith.constant 1 : index
    %262 = arith.index_cast %261 : i32 to index
    %263 = memref.load %arg1[%c1_76, %262] : memref<2x32xf32, #tpu.memory_space<smem>>
    %264 = vector.broadcast %260 : f32 to vector<16x128xf32>
    %265 = arith.mulf %264, %2 : vector<16x128xf32>
    %266 = vector.broadcast %263 : f32 to vector<16x128xf32>
    %267 = arith.mulf %266, %4 : vector<16x128xf32>
    %268 = arith.addf %265, %267 : vector<16x128xf32>
    %269 = arith.addf %268, %5 : vector<16x128xf32>
    %cst_77 = arith.constant 0.000000e+00 : f32
    %270 = vector.broadcast %cst_77 : f32 to vector<16x128xf32>
    %271 = arith.maximumf %269, %270 : vector<16x128xf32>
    %c16_i32_78 = arith.constant 16 : i32
    %272 = arith.muli %c14_i32, %c16_i32_78 : i32
    %273 = tpu.assume_multiple %272, 8 : i32
    %274 = arith.index_cast %273 : i32 to index
    %c0_79 = arith.constant 0 : index
    %275 = vector.load %arg11[%274, %c0_79] : memref<256x128xf32, #tpu.memory_space<vmem>>, vector<16x128xf32>
    tpu.vector_store %arg11[%274, %c0_79], %271 {strides = array<i32>} : memref<256x128xf32, #tpu.memory_space<vmem>>, vector<16x128xf32>,
    %c15_i32 = arith.constant 15 : i32
    %276 = arith.addi %0, %c15_i32 : i32
    %c0_80 = arith.constant 0 : index
    %277 = arith.index_cast %276 : i32 to index
    %278 = memref.load %arg1[%c0_80, %277] : memref<2x32xf32, #tpu.memory_space<smem>>
    %279 = arith.addi %0, %c15_i32 : i32
    %c1_81 = arith.constant 1 : index
    %280 = arith.index_cast %279 : i32 to index
    %281 = memref.load %arg1[%c1_81, %280] : memref<2x32xf32, #tpu.memory_space<smem>>
    %282 = vector.broadcast %278 : f32 to vector<16x128xf32>
    %283 = arith.mulf %282, %2 : vector<16x128xf32>
    %284 = vector.broadcast %281 : f32 to vector<16x128xf32>
    %285 = arith.mulf %284, %4 : vector<16x128xf32>
    %286 = arith.addf %283, %285 : vector<16x128xf32>
    %287 = arith.addf %286, %5 : vector<16x128xf32>
    %cst_82 = arith.constant 0.000000e+00 : f32
    %288 = vector.broadcast %cst_82 : f32 to vector<16x128xf32>
    %289 = arith.maximumf %287, %288 : vector<16x128xf32>
    %c16_i32_83 = arith.constant 16 : i32
    %290 = arith.muli %c15_i32, %c16_i32_83 : i32
    %291 = tpu.assume_multiple %290, 8 : i32
    %292 = arith.index_cast %291 : i32 to index
    %c0_84 = arith.constant 0 : index
    %293 = vector.load %arg11[%292, %c0_84] : memref<256x128xf32, #tpu.memory_space<vmem>>, vector<16x128xf32>
    tpu.vector_store %arg11[%292, %c0_84], %289 {strides = array<i32>} : memref<256x128xf32, #tpu.memory_space<vmem>>, vector<16x128xf32>,
    %c16_i32_85 = arith.constant 16 : i32
    %c0_86 = arith.constant 0 : index
    %c0_87 = arith.constant 0 : index
    %294 = vector.load %arg11[%c0_86, %c0_87] : memref<256x128xf32, #tpu.memory_space<vmem>>, vector<256x128xf32>
    %c0_88 = arith.constant 0 : index
    %c0_89 = arith.constant 0 : index
    %295 = vector.load %arg4[%c0_88, %c0_89] : memref<128x512xf32, #tpu.memory_space<vmem>>, vector<128x512xf32>
    %cst_90 = arith.constant dense<0.000000e+00> : vector<256x512xf32>
    %296 = tpu.matmul %294, %295, %cst_90 {dimension_numbers = #tpu.dot_dimension_numbers<[1], [0], [0], [1], [0, 0, 1, 1], [], []>} : vector<256x128xf32>, vector<128x512xf32>, vector<256x512xf32> -> vector<256x512xf32>
    %c0_91 = arith.constant 0 : index
    %c0_92 = arith.constant 0 : index
    %297 = vector.load %arg5[%c0_91, %c0_92] : memref<1x512xf32, #tpu.memory_space<vmem>>, vector<1x512xf32>
    %298 = vector.broadcast %297 : vector<1x512xf32> to vector<256x512xf32>
    %299 = arith.addf %296, %298 : vector<256x512xf32>
    %cst_93 = arith.constant 0.000000e+00 : f32
    %300 = vector.broadcast %cst_93 : f32 to vector<256x512xf32>
    %301 = arith.maximumf %299, %300 : vector<256x512xf32>
    %c0_94 = arith.constant 0 : index
    %c0_95 = arith.constant 0 : index
    %302 = vector.load %arg6[%c0_94, %c0_95] : memref<512x128xf32, #tpu.memory_space<vmem>>, vector<512x128xf32>
    %cst_96 = arith.constant dense<0.000000e+00> : vector<256x128xf32>
    %303 = tpu.matmul %301, %302, %cst_96 {dimension_numbers = #tpu.dot_dimension_numbers<[1], [0], [0], [1], [0, 0, 1, 1], [], []>} : vector<256x512xf32>, vector<512x128xf32>, vector<256x128xf32> -> vector<256x128xf32>
    %c0_97 = arith.constant 0 : index
    %c0_98 = arith.constant 0 : index
    %304 = vector.load %arg7[%c0_97, %c0_98] : memref<1x128xf32, #tpu.memory_space<vmem>>, vector<1x128xf32>
    %305 = vector.broadcast %304 : vector<1x128xf32> to vector<256x128xf32>
    %306 = arith.addf %303, %305 : vector<256x128xf32>
    %cst_99 = arith.constant 0.000000e+00 : f32
    %307 = vector.broadcast %cst_99 : f32 to vector<256x128xf32>
    %308 = arith.maximumf %306, %307 : vector<256x128xf32>
    %c0_100 = arith.constant 0 : index
    %c0_101 = arith.constant 0 : index
    %309 = vector.load %arg8[%c0_100, %c0_101] : memref<128x128xf32, #tpu.memory_space<vmem>>, vector<128x128xf32>
    %cst_102 = arith.constant dense<0.000000e+00> : vector<256x128xf32>
    %310 = tpu.matmul %308, %309, %cst_102 {dimension_numbers = #tpu.dot_dimension_numbers<[1], [0], [0], [1], [0, 0, 1, 1], [], []>} : vector<256x128xf32>, vector<128x128xf32>, vector<256x128xf32> -> vector<256x128xf32>
    %c0_103 = arith.constant 0 : index
    %c0_104 = arith.constant 0 : index
    %311 = vector.load %arg9[%c0_103, %c0_104] : memref<1x128xf32, #tpu.memory_space<vmem>>, vector<1x128xf32>
    %312 = vector.broadcast %311 : vector<1x128xf32> to vector<256x128xf32>
    %313 = arith.addf %310, %312 : vector<256x128xf32>
    %c0_105 = arith.constant 0 : index
    %c0_106 = arith.constant 0 : index
    %314 = vector.load %arg10[%c0_105, %c0_106] : memref<256x128xf32, #tpu.memory_space<vmem>>, vector<256x128xf32>
    tpu.vector_store %arg10[%c0_105, %c0_106], %313 {strides = array<i32>} : memref<256x128xf32, #tpu.memory_space<vmem>>, vector<256x128xf32>,
    return
  }
  func.func @transform_0(%arg0: i32) -> (i32, i32) {
    %c0_i32 = arith.constant 0 : i32
    %c0_i32_0 = arith.constant 0 : i32
    %c0_i32_1 = arith.constant 0 : i32
    return %c0_i32, %c0_i32_0 : i32, i32
  }
  func.func @transform_1(%arg0: i32) -> (i32, i32, i32) {
    %c0_i32 = arith.constant 0 : i32
    %c0_i32_0 = arith.constant 0 : i32
    %c0_i32_1 = arith.constant 0 : i32
    %c0_i32_2 = arith.constant 0 : i32
    return %c0_i32, %c0_i32_0, %c0_i32_1 : i32, i32, i32
  }
  func.func @transform_2(%arg0: i32) -> (i32, i32) {
    %c0_i32 = arith.constant 0 : i32
    %c0_i32_0 = arith.constant 0 : i32
    %c0_i32_1 = arith.constant 0 : i32
    return %c0_i32, %c0_i32_0 : i32, i32
  }
  func.func @transform_3(%arg0: i32) -> (i32, i32) {
    %c0_i32 = arith.constant 0 : i32
    %c0_i32_0 = arith.constant 0 : i32
    %c0_i32_1 = arith.constant 0 : i32
    return %c0_i32, %c0_i32_0 : i32, i32
  }
  func.func @transform_4(%arg0: i32) -> (i32, i32) {
    %c0_i32 = arith.constant 0 : i32
    %c0_i32_0 = arith.constant 0 : i32
    %c0_i32_1 = arith.constant 0 : i32
    return %c0_i32, %c0_i32_0 : i32, i32
  }
  func.func @transform_5(%arg0: i32) -> (i32, i32) {
    %c0_i32 = arith.constant 0 : i32
    %c0_i32_0 = arith.constant 0 : i32
    %c0_i32_1 = arith.constant 0 : i32
    return %c0_i32, %c0_i32_0 : i32, i32
  }
  func.func @transform_6(%arg0: i32) -> (i32, i32) {
    %c0_i32 = arith.constant 0 : i32
    %c0_i32_0 = arith.constant 0 : i32
    %c0_i32_1 = arith.constant 0 : i32
    return %c0_i32, %c0_i32_0 : i32, i32
  }
  func.func @transform_7(%arg0: i32) -> (i32, i32) {
    %c0_i32 = arith.constant 0 : i32
    %c0_i32_0 = arith.constant 0 : i32
    %c0_i32_1 = arith.constant 0 : i32
    return %c0_i32, %c0_i32_0 : i32, i32
  }
  func.func @transform_8(%arg0: i32) -> (i32, i32) {
    %c0_i32 = arith.constant 0 : i32
    %c0_i32_0 = arith.constant 0 : i32
    %c0_i32_1 = arith.constant 0 : i32
    return %c0_i32, %c0_i32_0 : i32, i32
  }
  func.func @transform_9(%arg0: i32) -> (i32, i32) {
    %c0_i32 = arith.constant 0 : i32
    %c0_i32_0 = arith.constant 0 : i32
    return %arg0, %c0_i32 : i32, i32
  }
}

</mosaic_0001>

<bundles_post_ra>
// kernel: conv_cnn_forward.1
= control target key start
LH: loop header
LB: loop body
LE: loop exit
PB: predicated region body
PF: predicated region fallthrough
CT: control target
= control target key end

     0   :  { %s4625_s0 = inlined_call_operand.vmem [shape: f32[2,32], index: 0, kind: input, shape index: {}]   ;;  %s4626_s1 = inlined_call_operand.vmem [shape: f32[2,16,128], index: 1, kind: input, shape index: {}]   ;;  %s4627_s2 = inlined_call_operand.hbm [shape: f32[16,128], index: 2, kind: input, shape index: {}]   ;;  %s4628_s3 = inlined_call_operand.hbm [shape: f32[128,512], index: 3, kind: input, shape index: {}]   ;;  %s4629_s4 = inlined_call_operand.hbm [shape: f32[1,512], index: 4, kind: input, shape index: {}]   ;;  %s4630_s5 = inlined_call_operand.hbm [shape: f32[512,128], index: 5, kind: input, shape index: {}]   ;;  %s4631_s6 = inlined_call_operand.hbm [shape: f32[1,128], index: 6, kind: input, shape index: {}]   ;;  %s4632_s7 = inlined_call_operand.hbm [shape: f32[128,128], index: 7, kind: input, shape index: {}]   ;;  %s4633_s8 = inlined_call_operand.hbm [shape: f32[1,128], index: 8, kind: input, shape index: {}]   ;;  %s4634_s9 = inlined_call_operand.vmem [shape: f32[512,128], index: 9, kind: output, shape index: {}]  }
   0x1   :  { %4637 = sst [smem:[#allocation21_spill]] %s4625_s0 }
   0x2   :  { %14 = vsyncpa [#allocation5], 0 }
   0x3   :  { %15 = vsyncpa [#allocation4], 0 }
   0x4   :  { %16 = vsyncpa [#allocation8], 0 }
   0x5   :  { %17 = vsyncpa [#allocation11], 0 }
   0x6   :  { %18 = vsyncpa [#allocation14], 0  ;;  %s3447_s30 = smov 0  }
   0x7 LB: > { %s3383_s10 = smov [#allocation7]   ;;  %s3453_s12 = sadd.s32 4294967295, %s3381_s30   ;;  %s3381_s30 = sphi %s3447_s30, %s24_s30  }
   0x8   : > { %s283_s11 = sshll.u32 %s3383_s10, 4  ;;  %p2550_p0 = scmp.ge.s32.totalorder %s3381_s30, 1  ;;  %s3458_s11 = int_to_ptr.vmem [resolvable:$true] %s283_s11 }
   0x9   : > { %p244_p1 = scmp.lt.s32.totalorder %s3381_s30, 3  ;;  %p4635_p2 = scmp.eq.s32.totalorder %s3453_s12, 0 }
   0xa   : > { %s3384_s15 = smov [#allocation10]   ;;  %s3385_s17 = smov [#allocation13]  }
   0xb   : > { %p3460_p3 = pnand %p2550_p0, %p244_p1  ;;  %s307_s16 = sshll.u32 %s3384_s15, 4  ;;  %s3472_s16 = int_to_ptr.vmem [resolvable:$true] %s307_s16 }
   0xc   : > { %s331_s18 = sshll.u32 %s3385_s17, 4  ;;  %s3144_s21 = scalar_lea.hbm %s4628_s3, 8192  ;;  %s3474_s18 = int_to_ptr.vmem [resolvable:$true] %s331_s18 }
   0xd   : > { %s4638_s13 = scalar_select %p3460_p3, 1, 0 }
   0xe   : > { %p3081_p4 = pneg %p3460_p3  ;;  %p3145_p6 = scmp.ne.s32.totalorder %s4628_s3, %s3144_s21 }
   0xf   : > { %p3151_p10 = scmp.lt.u32.totalorder %s3144_s21, %s4628_s3 }
  0x10   : > { %p3468_p5 = pnand %p4635_p2, %p3081_p4 }
  0x12   : > { %p3484_p7 = pneg %p3468_p5 }
  0x14   : > { %p3147_p8 = pnand %p3484_p7, %p3145_p6 }
  0x16   : > { %p3148_p9 = pneg %p3147_p8 }
  0x18   : > { %p3153_p11 = pnand %p3151_p10, %p3148_p9 }
  0x1a   : > { %3156 = shalt.err (!%p3153_p11)
}
  0x1b   : > { %s3157_s27 = scalar_lea.vmem %s3458_s11, 8192  ;;  %p3165_p1 = scmp.lt.s32.totalorder %s3458_s11, %s3458_s11 }
  0x1c   : > { %p3158_p12 = scmp.ne.s32.totalorder %s3458_s11, %s3157_s27  ;;  %p3166_p4 = scmp.lt.s32.totalorder %s3157_s27, %s3157_s27 }
  0x1e   : > { %p3160_p13 = pnand %p3158_p12, %p3484_p7  ;;  %p3167_p6 = por %p3166_p4, %p3165_p1 }
  0x20   : > { %p3161_p0 = pneg %p3160_p13 }
  0x22   : > { %p3168_p8 = pnand %p3167_p6, %p3161_p0 }
  0x24   : > { %3171 = shalt.err (!%p3168_p8)
}
  0x25   : > { %s3386_s28 = smov 512   ;;  %s3387_s29 = smov 32  }
  0x26   : > { %3090 = dma.hbm_to_vmem [thread:$0]  (!%p3468_p5), %s4628_s3, 8192, %s3458_s11, [#allocation8], %s3386_s28, %s3386_s28, %s3387_s29  }
  0x27   : > { %s3172_s20 = scalar_lea.hbm %s4630_s5, 8192 }
  0x28   : > { %p3173_p9 = scmp.ne.s32.totalorder %s4630_s5, %s3172_s20  ;;  %p3179_p12 = scmp.lt.u32.totalorder %s3172_s20, %s4630_s5 }
  0x2a   : > { %p3175_p10 = pnand %p3173_p9, %p3484_p7 }
  0x2c   : > { %p3176_p11 = pneg %p3175_p10 }
  0x2e   : > { %p3181_p13 = pnand %p3179_p12, %p3176_p11 }
  0x30   : > { %3184 = shalt.err (!%p3181_p13)
}
  0x31   : > { %s3185_s11 = scalar_lea.vmem %s3472_s16, 8192  ;;  %p3193_p6 = scmp.lt.s32.totalorder %s3472_s16, %s3472_s16 }
  0x32   : > { %p3186_p0 = scmp.ne.s32.totalorder %s3472_s16, %s3185_s11  ;;  %p3194_p8 = scmp.lt.s32.totalorder %s3185_s11, %s3185_s11 }
  0x34   : > { %p3188_p1 = pnand %p3186_p0, %p3484_p7  ;;  %p3195_p9 = por %p3194_p8, %p3193_p6 }
  0x36   : > { %p3189_p4 = pneg %p3188_p1 }
  0x38   : > { %p3196_p10 = pnand %p3195_p9, %p3189_p4 }
  0x3a   : > { %3199 = shalt.err (!%p3196_p10)
}
  0x3b   : > { %s3388_s26 = smov 128   ;;  %s3389_s27 = smov 8  }
  0x3c   : > { %3096 = dma.hbm_to_vmem [thread:$0]  (!%p3468_p5), %s4630_s5, 8192, %s3472_s16, [#allocation11], %s3388_s26, %s3388_s26, %s3389_s27  }
  0x3d   : > { %s3200_s17 = scalar_lea.hbm %s4632_s7, 2048 }
  0x3e   : > { %p3201_p11 = scmp.ne.s32.totalorder %s4632_s7, %s3200_s17  ;;  %p3207_p0 = scmp.lt.u32.totalorder %s3200_s17, %s4632_s7 }
  0x40   : > { %p3203_p12 = pnand %p3201_p11, %p3484_p7 }
  0x42   : > { %p3204_p13 = pneg %p3203_p12 }
  0x44   : > { %p3209_p1 = pnand %p3207_p0, %p3204_p13 }
  0x46   : > { %3212 = shalt.err (!%p3209_p1)
}
  0x47   : > { %s3213_s16 = scalar_lea.vmem %s3474_s18, 2048  ;;  %p3221_p9 = scmp.lt.s32.totalorder %s3474_s18, %s3474_s18 }
  0x48   : > { %p3214_p4 = scmp.ne.s32.totalorder %s3474_s18, %s3213_s16  ;;  %p3222_p10 = scmp.lt.s32.totalorder %s3213_s16, %s3213_s16 }
  0x4a   : > { %p3216_p6 = pnand %p3214_p4, %p3484_p7  ;;  %p3223_p11 = por %p3222_p10, %p3221_p9 }
  0x4c   : > { %p3217_p8 = pneg %p3216_p6 }
  0x4e   : > { %p3224_p12 = pnand %p3223_p11, %p3217_p8 }
  0x50   : > { %3227 = shalt.err (!%p3224_p12)
}
  0x51   : > { %3102 = dma.hbm_to_vmem [thread:$0]  (!%p3468_p5), %s4632_s7, 2048, %s3474_s18, [#allocation14], %s3388_s26, %s3388_s26, %s3389_s27  }
  0x52   : > { %s4641_s0 = sld [smem:[#allocation21_spill]] }
  0x58   : > { %s257_s29 = sshll.u32 %s4641_s0, 4  ;;  %s258_s29 = int_to_ptr.vmem [resolvable:$true] %s257_s29 }
  0x59   : > { %s3228_s10 = scalar_lea.vmem %s258_s29, 32  ;;  %p3236_p4 = scmp.lt.s32.totalorder %s258_s29, %s258_s29 }
  0x5a   : > { %p3229_p13 = scmp.ne.s32.totalorder %s258_s29, %s3228_s10  ;;  %p3237_p6 = scmp.lt.s32.totalorder %s3228_s10, %s3228_s10 }
  0x5c   : > { %p3231_p0 = pnand %p3229_p13, %p3484_p7  ;;  %p3238_p8 = por %p3237_p6, %p3236_p4 }
  0x5e   : > { %p3232_p1 = pneg %p3231_p0 }
  0x60   : > { %p3239_p9 = pnand %p3238_p8, %p3232_p1 }
  0x62   : > { %3242 = shalt.err (!%p3239_p9)
}
  0x63   : > { %s3390_s15 = smov [#allocation3]   ;;  %s3391_s18 = smov [#allocation6]  }
  0x64   : > { %3084 = dma.vmem_to_smem (!%p3468_p5), %s258_s29, 32, %s3390_s15, [#allocation5]  }
  0x65   : > { %s270_s17 = sshll.u32 %s3391_s18, 4  ;;  %s3392_s19 = smov [#allocation9]   ;;  %s271_s17 = int_to_ptr.vmem [resolvable:$true] %s270_s17 }
  0x66   : > { %s297_s20 = sshll.u32 %s3392_s19, 4  ;;  %s3243_s16 = scalar_lea.hbm %s4627_s2, 256  ;;  %s298_s20 = int_to_ptr.vmem [resolvable:$true] %s297_s20 }
  0x67   : > { %p3244_p10 = scmp.ne.s32.totalorder %s4627_s2, %s3243_s16  ;;  %p3250_p13 = scmp.lt.u32.totalorder %s3243_s16, %s4627_s2 }
  0x69   : > { %p3246_p11 = pnand %p3244_p10, %p3484_p7 }
  0x6b   : > { %p3247_p12 = pneg %p3246_p11 }
  0x6d   : > { %p3252_p0 = pnand %p3250_p13, %p3247_p12 }
  0x6f   : > { %3255 = shalt.err (!%p3252_p0)
}
  0x70   : > { %s3256_s29 = scalar_lea.vmem %s271_s17, 256  ;;  %p3264_p8 = scmp.lt.s32.totalorder %s271_s17, %s271_s17 }
  0x71   : > { %p3257_p1 = scmp.ne.s32.totalorder %s271_s17, %s3256_s29  ;;  %p3265_p9 = scmp.lt.s32.totalorder %s3256_s29, %s3256_s29 }
  0x73   : > { %p3259_p4 = pnand %p3257_p1, %p3484_p7  ;;  %p3266_p2 = por %p3265_p9, %p3264_p8 }
  0x75   : > { %p3260_p6 = pneg %p3259_p4 }
  0x77   : > { %p3267_p3 = pnand %p3266_p2, %p3260_p6 }
  0x79   : > { %3270 = shalt.err (!%p3267_p3)
}
  0x7a   : > { %3087 = dma.hbm_to_vmem [thread:$0]  (!%p3468_p5), %s4627_s2, 256, %s271_s17, [#allocation4], %s3388_s26, %s3388_s26, %s3389_s27  }
  0x7b   : > { %s3271_s21 = scalar_lea.hbm %s4629_s4, 64 }
  0x7c   : > { %p3272_p2 = scmp.ne.s32.totalorder %s4629_s4, %s3271_s21  ;;  %p3278_p11 = scmp.lt.u32.totalorder %s3271_s21, %s4629_s4 }
  0x7e   : > { %p3274_p3 = pnand %p3272_p2, %p3484_p7 }
  0x80   : > { %p3275_p10 = pneg %p3274_p3 }
  0x82   : > { %p3280_p12 = pnand %p3278_p11, %p3275_p10 }
  0x84   : > { %3283 = shalt.err (!%p3280_p12)
}
  0x85   : > { %s3284_s11 = scalar_lea.vmem %s298_s20, 64  ;;  %p3292_p4 = scmp.lt.s32.totalorder %s298_s20, %s298_s20 }
  0x86   : > { %p3285_p13 = scmp.ne.s32.totalorder %s298_s20, %s3284_s11  ;;  %p3293_p6 = scmp.lt.s32.totalorder %s3284_s11, %s3284_s11 }
  0x88   : > { %p3287_p0 = pnand %p3285_p13, %p3484_p7  ;;  %p3294_p8 = por %p3293_p6, %p3292_p4 }
  0x8a   : > { %p3288_p1 = pneg %p3287_p0 }
  0x8c   : > { %p3295_p9 = pnand %p3294_p8, %p3288_p1 }
  0x8e   : > { %3298 = shalt.err (!%p3295_p9)
}
  0x8f   : > { %3093 = dma.hbm_to_vmem [thread:$0]  (!%p3468_p5), %s4629_s4, 64, %s298_s20, [#allocation8]  }
  0x90   : > { %s3393_s17 = smov [#allocation12]   ;;  %s3394_s29 = smov [#allocation15]  }
  0x91   : > { %s321_s28 = sshll.u32 %s3393_s17, 4  ;;  %s345_s10 = sshll.u32 %s3394_s29, 4  ;;  %s322_s28 = int_to_ptr.vmem [resolvable:$true] %s321_s28  ;;  %s346_s10 = int_to_ptr.vmem [resolvable:$true] %s345_s10 }
  0x92   : > { %s3299_s19 = scalar_lea.hbm %s4631_s6, 16 }
  0x93   : > { %p3300_p2 = scmp.ne.s32.totalorder %s4631_s6, %s3299_s19  ;;  %p3306_p11 = scmp.lt.u32.totalorder %s3299_s19, %s4631_s6 }
  0x95   : > { %p3302_p3 = pnand %p3300_p2, %p3484_p7 }
  0x97   : > { %p3303_p10 = pneg %p3302_p3 }
  0x99   : > { %p3308_p12 = pnand %p3306_p11, %p3303_p10 }
  0x9b   : > { %3311 = shalt.err (!%p3308_p12)
}
  0x9c   : > { %s3312_s20 = scalar_lea.vmem %s322_s28, 16  ;;  %s3319_s25 = scalar_lea.vmem %s322_s28, 32 }
  0x9d   : > { %p3313_p13 = scmp.ne.s32.totalorder %s322_s28, %s3312_s20  ;;  %p3320_p4 = scmp.lt.s32.totalorder %s322_s28, %s322_s28 }
  0x9e   : > { %p3321_p6 = scmp.lt.s32.totalorder %s3319_s25, %s3312_s20 }
  0x9f   : > { %p3315_p0 = pnand %p3313_p13, %p3484_p7 }
  0xa0   : > { %p3322_p8 = por %p3321_p6, %p3320_p4 }
  0xa1   : > { %p3316_p1 = pneg %p3315_p0 }
  0xa3   : > { %p3323_p9 = pnand %p3322_p8, %p3316_p1 }
  0xa5   : > { %3326 = shalt.err (!%p3323_p9)
}
  0xa6   : > { %3099 = dma.hbm_to_vmem [thread:$0]  (!%p3468_p5), %s4631_s6, 16, %s322_s28, [#allocation11]  }
  0xa7   : > { %s3327_s29 = scalar_lea.hbm %s4633_s8, 16 }
  0xa8   : > { %p3328_p2 = scmp.ne.s32.totalorder %s4633_s8, %s3327_s29  ;;  %p3334_p11 = scmp.lt.u32.totalorder %s3327_s29, %s4633_s8 }
  0xaa   : > { %p3330_p3 = pnand %p3328_p2, %p3484_p7 }
  0xac   : > { %p3331_p10 = pneg %p3330_p3 }
  0xae   : > { %p3336_p12 = pnand %p3334_p11, %p3331_p10 }
  0xb0   : > { %3339 = shalt.err (!%p3336_p12)
}
  0xb1   : > { %s3340_s22 = scalar_lea.vmem %s346_s10, 16  ;;  %s3347_s28 = scalar_lea.vmem %s346_s10, 32 }
  0xb2   : > { %p3341_p13 = scmp.ne.s32.totalorder %s346_s10, %s3340_s22  ;;  %p3348_p4 = scmp.lt.s32.totalorder %s346_s10, %s346_s10 }
  0xb3   : > { %p3349_p6 = scmp.lt.s32.totalorder %s3347_s28, %s3340_s22 }
  0xb4   : > { %p3343_p0 = pnand %p3341_p13, %p3484_p7 }
  0xb5   : > { %p3350_p8 = por %p3349_p6, %p3348_p4 }
  0xb6   : > { %p3344_p1 = pneg %p3343_p0 }
  0xb8   : > { %p3351_p9 = pnand %p3350_p8, %p3344_p1 }
  0xba   : > { %3354 = shalt.err (!%p3351_p9)
}
  0xbb   : > { %3105 = dma.hbm_to_vmem [thread:$0]  (!%p3468_p5), %s4633_s8, 16, %s346_s10, [#allocation14]  }
  0xbc   : > { %p4642_p2 = scmp.ne.s32.totalorder %s4638_s13, 0 }
  0xbd   : > { %p4643_p3 = scmp.eq.s32.totalorder (!%p4642_p2), %s3453_s12, 0 }
  0xbe   : > { %358 = sbr.rel (%p4642_p2) target bundleno = 1103 (0x44f), region = 56 }
  0xc5   : > { %3360 = dma.done.wait (%p4643_p3), [#allocation5], 32   ;;  %p4644_p7 = pmov %p4643_p3 }
  0xc6   : > { %p4645_p10 = pmov %p4643_p3 }
  0xc7   : > { %3362 = vsyncadd (%p4644_p7), [#allocation5], 4294967264 }
  0xc8   : > { %3364 = dma.done.wait (%p4645_p10), [#allocation4], 256   ;;  %p4646_p11 = pmov %p4643_p3 }
  0xc9   : > { %p4647_p12 = pmov %p4643_p3 }
  0xca   : > { %3366 = vsyncadd (%p4646_p11), [#allocation4], 4294967040 }
  0xcb   : > { %3368 = dma.done.wait (%p4647_p12), [#allocation8], 8256   ;;  %p4648_p5 = pmov %p4643_p3 }
  0xcc   : > { %p4649_p13 = pmov %p4643_p3 }
  0xcd   : > { %3370 = vsyncadd (%p4648_p5), [#allocation8], 4294959040 }
  0xce   : > { %3372 = dma.done.wait (%p4649_p13), [#allocation11], 8208   ;;  %p4650_p0 = pmov %p4643_p3 }
  0xd0   : > { %3374 = vsyncadd (%p4650_p0), [#allocation11], 4294959088  ;;  %p4651_p1 = pmov %p4650_p0 }
  0xd1   : > { %p4652_p4 = pmov %p4650_p0 }
  0xd2   : > { %3376 = dma.done.wait (%p4651_p1), [#allocation14], 2064  }
  0xd3   : > { %3378 = vsyncadd (%p4652_p4), [#allocation14], 4294965232 }
  0xd4   : > { %392 = sfence }
  0xd5   : > { %v863_v0 = vld [vmem:[#allocation7 + $0x8] sm:$0xff]  ;;  %v862_v2 = vld [vmem:[#allocation7] sm:$0xff]  ;;  %s3662_s13 = sshll.u32 %s3453_s12, 4  ;;  %v865_v5 = vld [vmem:[#allocation7 + $0x18] sm:$0xff]  ;;  %v3395_v7 = vmov 0.0  }
  0xd6   : > { %v867_v1 = vld [vmem:[#allocation7 + $0x28] sm:$0xff]  ;;  %v866_v4 = vld [vmem:[#allocation7 + $0x20] sm:$0xff]  ;;  %v869_v6 = vld [vmem:[#allocation7 + $0x38] sm:$0xff]  ;;  %1012 = vmatprep.mubr.f32.mxu0 %v3395_v7  ;;  %s433_s14 = sshra.s32 %s3662_s13, 7  ;;  %1269 = vmatprep.mubr.f32.mxu1 %v3395_v7  ;;  %s438_s10 = sand.u32 127, %s3662_s13 }
  0xd7   : > { %v2753_v3 = vpack.c.bf16 %v867_v1, %v863_v0  ;;  %v2755_v8 = vpack.c.bf16 %v866_v4, %v862_v2  ;;  %v2785_v9 = vpack.c.bf16 %v869_v6, %v865_v5  ;;  %v864_v10 = vld [vmem:[#allocation7 + $0x10] sm:$0xff]  ;;  %v871_v12 = vld [vmem:[#allocation7 + $0x48] sm:$0xff]  ;;  %s2593_s24 = sshll.u32 %s433_s14, 7  ;;  %v870_v15 = vld [vmem:[#allocation7 + $0x40] sm:$0xff]  ;;  %s3669_s25 = sadd.s32 1, %s3662_s13 }
  0xd8   : > { %v868_v11 = vld [vmem:[#allocation7 + $0x30] sm:$0xff]  ;;  %v875_v14 = vld [vmem:[#allocation7 + $0x68] sm:$0xff]  ;;  %v874_v16 = vld [vmem:[#allocation7 + $0x60] sm:$0xff]  ;;  %s2594_s20 = sadd.s32 128, %s2593_s24  ;;  %s3672_s11 = sld [smem:[#allocation3 + %s3662_s13]] }
  0xd9   : > { %2754 = vmatprep.subr.bf16.mxu0 %v2753_v3  ;;  %v2787_v13 = vpack.c.bf16 %v868_v11, %v864_v10  ;;  %2786 = vmatprep.subr.bf16.mxu1 %v2785_v9  ;;  %v2757_v17 = vpack.c.bf16 %v875_v14, %v871_v12  ;;  %v2759_v18 = vpack.c.bf16 %v874_v16, %v870_v15  ;;  %v873_v19 = vld [vmem:[#allocation7 + $0x58] sm:$0xff]  ;;  %v872_v21 = vld [vmem:[#allocation7 + $0x50] sm:$0xff]  ;;  %s439_s26 = sadd.s32 %s2594_s20, %s438_s10  ;;  %v879_v24 = vld [vmem:[#allocation7 + $0x88] sm:$0xff]  ;;  %s3675_s27 = sld [smem:[#allocation3 + %s3669_s25]] }
  0xda   : > { %2756 = vmatpush1.bf16.msra.mxu0 %v2755_v8  ;;  %v877_v20 = vld [vmem:[#allocation7 + $0x78] sm:$0xff]  ;;  %v876_v23 = vld [vmem:[#allocation7 + $0x70] sm:$0xff]  ;;  %v883_v25 = vld [vmem:[#allocation7 + $0xa8] sm:$0xff]  ;;  %s457_s17 = sshra.s32 %s3669_s25, 7  ;;  %s462_s15 = sand.u32 127, %s3669_s25 }
  0xdb   : > { %2788 = vmatpush1.bf16.msra.mxu1 %v2787_v13  ;;  %v2789_v22 = vpack.c.bf16 %v877_v20, %v873_v19  ;;  %2758 = vmatprep.subr.bf16.mxu0 %v2757_v17  ;;  %v2791_v26 = vpack.c.bf16 %v876_v23, %v872_v21  ;;  %v2761_v27 = vpack.c.bf16 %v883_v25, %v879_v24  ;;  %v878_v28 = vld [vmem:[#allocation7 + $0x80] sm:$0xff]  ;;  %v881_v30 = vld [vmem:[#allocation7 + $0x98] sm:$0xff]  ;;  %s2595_s29 = sshll.u32 %s457_s17, 7  ;;  %v880_v32 = vld [vmem:[#allocation7 + $0x90] sm:$0xff]  ;;  %s3680_s19 = sadd.s32 2, %s3662_s13 }
  0xdc   : > { %v882_v29 = vld [vmem:[#allocation7 + $0xa0] sm:$0xff]  ;;  %v885_v31 = vld [vmem:[#allocation7 + $0xb8] sm:$0xff]  ;;  %v884_v33 = vld [vmem:[#allocation7 + $0xb0] sm:$0xff]  ;;  %s2596_s18 = sadd.s32 128, %s2595_s29  ;;  %s3682_s21 = sld [smem:[#allocation3 + %s439_s26]] }
  0xdd   : > { %2790 = vmatprep.subr.bf16.mxu1 %v2789_v22  ;;  %v2763_v34 = vpack.c.bf16 %v882_v29, %v878_v28  ;;  %v2793_v35 = vpack.c.bf16 %v885_v31, %v881_v30  ;;  %v887_v36 = vld [vmem:[#allocation7 + $0xc8] sm:$0xff]  ;;  %v886_v38 = vld [vmem:[#allocation7 + $0xc0] sm:$0xff]  ;;  %s463_s22 = sadd.s32 %s2596_s18, %s462_s15  ;;  %v2795_v39 = vpack.c.bf16 %v884_v33, %v880_v32  ;;  %v889_v42 = vld [vmem:[#allocation7 + $0xd8] sm:$0xff]  ;;  %s3685_s28 = sld [smem:[#allocation3 + %s3680_s19]] }
  0xde   : > { %2760 = vmatpush1.bf16.msra.mxu0 %v2759_v18  ;;  %v891_v37 = vld [vmem:[#allocation7 + $0xe8] sm:$0xff]  ;;  %v890_v41 = vld [vmem:[#allocation7 + $0xe0] sm:$0xff]  ;;  %v893_v43 = vld [vmem:[#allocation7 + $0xf8] sm:$0xff]  ;;  %s482_s16 = sshra.s32 %s3680_s19, 7  ;;  %s487_s14 = sand.u32 127, %s3680_s19  ;;  %v441_v13 = vstv %s3672_s11 }
  0xdf   : > { %2792 = vmatpush1.bf16.msra.mxu1 %v2791_v26  ;;  %2762 = vmatprep.subr.bf16.mxu0 %v2761_v27  ;;  %v2765_v40 = vpack.c.bf16 %v891_v37, %v887_v36  ;;  %v2797_v44 = vpack.c.bf16 %v893_v43, %v889_v42  ;;  %v888_v45 = vld [vmem:[#allocation7 + $0xd0] sm:$0xff]  ;;  %v895_v47 = vld [vmem:[#allocation7 + $0x108] sm:$0xff]  ;;  %s2597_s23 = sshll.u32 %s482_s16, 7  ;;  %s3690_s10 = sadd.s32 3, %s3662_s13  ;;  %v2767_v49 = vpack.c.bf16 %v890_v41, %v886_v38  ;;  %v897_v50 = vld [vmem:[#allocation7 + $0x118] sm:$0xff]  ;;  %v465_v37 = vstv %s3675_s27 }
  0xe0   : > { %2794 = vmatprep.subr.bf16.mxu1 %v2793_v35  ;;  %v892_v46 = vld [vmem:[#allocation7 + $0xf0] sm:$0xff]  ;;  %v899_v48 = vld [vmem:[#allocation7 + $0x128] sm:$0xff]  ;;  %s2598_s24 = sadd.s32 128, %s2597_s23  ;;  %v901_v51 = vld [vmem:[#allocation7 + $0x138] sm:$0xff]  ;;  %s3692_s20 = sld [smem:[#allocation3 + %s463_s22]] }
  0xe1   : > { %s488_s25 = sadd.s32 %s2598_s24, %s487_s14  ;;  %v2799_v52 = vpack.c.bf16 %v892_v46, %v888_v45  ;;  %v2769_v53 = vpack.c.bf16 %v899_v48, %v895_v47  ;;  %v894_v54 = vld [vmem:[#allocation7 + $0x100] sm:$0xff]  ;;  %v896_v56 = vld [vmem:[#allocation7 + $0x110] sm:$0xff]  ;;  %s3695_s26 = sld [smem:[#allocation3 + %s3690_s10]]  ;;  %v2801_v57 = vpack.c.bf16 %v901_v51, %v897_v50  ;;  %v903_v59 = vld [vmem:[#allocation7 + $0x148] sm:$0xff] }
  0xe2   : > { %2764 = vmatpush1.bf16.msra.mxu0 %v2763_v34  ;;  %v898_v55 = vld [vmem:[#allocation7 + $0x120] sm:$0xff]  ;;  %s507_s17 = sshra.s32 %s3690_s10, 7  ;;  %v900_v58 = vld [vmem:[#allocation7 + $0x130] sm:$0xff]  ;;  %v907_v60 = vld [vmem:[#allocation7 + $0x168] sm:$0xff]  ;;  %s512_s15 = sand.u32 127, %s3690_s10  ;;  %v444_v14 = vstv %s3682_s21 }
  0xe3   : > { %2796 = vmatpush1.bf16.msra.mxu1 %v2795_v39  ;;  %2766 = vmatprep.subr.bf16.mxu0 %v2765_v40  ;;  %s2599_s29 = sshll.u32 %s507_s17, 7  ;;  %v905_v61 = vld [vmem:[#allocation7 + $0x158] sm:$0xff]  ;;  %s3700_s19 = sadd.s32 4, %s3662_s13  ;;  %v2771_v63 = vpack.c.bf16 %v898_v55, %v894_v54  ;;  %v2803_v0 = vpack.c.bf16 %v900_v58, %v896_v56  ;;  %v2773_v1 = vpack.c.bf16 %v907_v60, %v903_v59  ;;  %v902_v2 = vld [vmem:[#allocation7 + $0x140] sm:$0xff]  ;;  %v904_v4 = vld [vmem:[#allocation7 + $0x150] sm:$0xff]  ;;  %v490_v55 = vstv %s3685_s28 }
  0xe4   : > { %2798 = vmatprep.subr.bf16.mxu1 %v2797_v44  ;;  %v909_v62 = vld [vmem:[#allocation7 + $0x178] sm:$0xff]  ;;  %s2600_s18 = sadd.s32 128, %s2599_s29  ;;  %s3702_s22 = sld [smem:[#allocation3 + %s488_s25]]  ;;  %v906_v3 = vld [vmem:[#allocation7 + $0x160] sm:$0xff]  ;;  %v908_v6 = vld [vmem:[#allocation7 + $0x170] sm:$0xff] }
  0xe5   : > { %s513_s16 = sadd.s32 %s2600_s18, %s512_s15  ;;  %s3705_s23 = sld [smem:[#allocation3 + %s3700_s19]]  ;;  %v2805_v5 = vpack.c.bf16 %v909_v62, %v905_v61  ;;  %v911_v8 = vld [vmem:[#allocation7 + $0x188] sm:$0xff]  ;;  %v3709_v10 = vld [vmem:[#allocation7 + $0x180] sm:$0xff]  ;;  %v913_v11 = vld [vmem:[#allocation7 + $0x198] sm:$0xff]  ;;  %v2775_v15 = vpack.c.bf16 %v906_v3, %v902_v2  ;;  %v2807_v19 = vpack.c.bf16 %v908_v6, %v904_v4 }
  0xe6   : > { %2768 = vmatpush1.bf16.msra.mxu0 %v2767_v49  ;;  %s532_s14 = sshra.s32 %s3700_s19, 7  ;;  %v915_v9 = vld [vmem:[#allocation7 + $0x1a8] sm:$0xff]  ;;  %s537_s10 = sand.u32 127, %s3700_s19  ;;  %v917_v12 = vld [vmem:[#allocation7 + $0x1b8] sm:$0xff]  ;;  %v914_v16 = vld [vmem:[#allocation7 + $0x1a0] sm:$0xff]  ;;  %v468_v38 = vstv %s3692_s20 }
  0xe7   : > { %2800 = vmatpush1.bf16.msra.mxu1 %v2799_v52  ;;  %2770 = vmatprep.subr.bf16.mxu0 %v2769_v53  ;;  %s2601_s24 = sshll.u32 %s532_s14, 7  ;;  %s3714_s17 = sadd.s32 5, %s3662_s13  ;;  %v3716_v17 = vld [vmem:[#allocation7 + $0x190] sm:$0xff]  ;;  %v2777_v20 = vpack.c.bf16 %v915_v9, %v911_v8  ;;  %v919_v21 = vld [vmem:[#allocation7 + $0x1c8] sm:$0xff]  ;;  %v3730_v23 = vld [vmem:[%s4626_s1 + $0x10] sm:$0xff]  ;;  %v2809_v24 = vpack.c.bf16 %v917_v12, %v913_v11  ;;  %v2779_v34 = vpack.c.bf16 %v914_v16, %v3709_v10 }
  0xe8   : > { %2802 = vmatprep.subr.bf16.mxu1 %v2801_v57  ;;  %s2602_s25 = sadd.s32 128, %s2601_s24  ;;  %v916_v18 = vld [vmem:[#allocation7 + $0x1b0] sm:$0xff]  ;;  %s3718_s29 = sld [smem:[#allocation3 + %s513_s16]]  ;;  %v923_v25 = vld [vmem:[#allocation7 + $0x1e8] sm:$0xff]  ;;  %v445_v27 = vmul.f32 %v3730_v23, %v444_v14  ;;  %v3741_v28 = vld [vmem:[%s4626_s1 + $0x8] sm:$0xff]  ;;  %v469_v49 = vmul.f32 %v3730_v23, %v468_v38  ;;  %v515_v57 = vstv %s3695_s26 }
  0xe9   : > { %s3720_s15 = sadd.s32 %s2602_s25, %s537_s10  ;;  %v3725_v22 = vld [vmem:[%s4626_s1] sm:$0xff]  ;;  %s3733_s16 = sld [smem:[#allocation3 + %s3714_s17]]  ;;  %v3746_v29 = vld [vmem:[%s4626_s1 + $0x18] sm:$0xff]  ;;  %v921_v30 = vld [vmem:[#allocation7 + $0x1d8] sm:$0xff]  ;;  %v443_v32 = vmul.f32 %v441_v13, %v3741_v28  ;;  %v2811_v39 = vpack.c.bf16 %v916_v18, %v3716_v17  ;;  %v2781_v40 = vpack.c.bf16 %v923_v25, %v919_v21  ;;  %v467_v52 = vmul.f32 %v465_v37, %v3741_v28 }
  0xea   : > { %2772 = vmatpush1.bf16.msra.mxu0 %v2771_v63  ;;  %s557_s14 = sshra.s32 %s3714_s17, 7  ;;  %v442_v26 = vmul.f32 %v441_v13, %v3725_v22  ;;  %s562_s18 = sand.u32 127, %s3714_s17  ;;  %v925_v31 = vld [vmem:[#allocation7 + $0x1f8] sm:$0xff]  ;;  %v446_v33 = vmul.f32 %v3746_v29, %v444_v14  ;;  %v3755_v35 = vld [vmem:[#allocation6] sm:$0xff]  ;;  %v918_v41 = vld [vmem:[#allocation7 + $0x1c0] sm:$0xff]  ;;  %v466_v48 = vmul.f32 %v465_v37, %v3725_v22  ;;  %v470_v53 = vmul.f32 %v3746_v29, %v468_v38 }
  0xeb   : > { %2804 = vmatpush1.bf16.msra.mxu1 %v2803_v0  ;;  %2774 = vmatprep.subr.bf16.mxu0 %v2773_v1  ;;  %s2603_s21 = sshll.u32 %s557_s14, 7  ;;  %s3752_s0 = sadd.s32 6, %s3662_s13  ;;  %v922_v42 = vld [vmem:[#allocation7 + $0x1e0] sm:$0xff]  ;;  %v2813_v43 = vpack.c.bf16 %v925_v31, %v921_v30  ;;  %v920_v44 = vld [vmem:[#allocation7 + $0x1d0] sm:$0xff]  ;;  %v3774_v51 = vld [vmem:[#allocation6 + $0x8] sm:$0xff]  ;;  %v493_v56 = vstv %s3702_s22  ;;  %v491_v63 = vmul.f32 %v490_v55, %v3725_v22  ;;  %v492_v1 = vmul.f32 %v490_v55, %v3741_v28 }
  0xec   : > { %2806 = vmatprep.subr.bf16.mxu1 %v2805_v5  ;;  %s2604_s19 = sadd.s32 128, %s2603_s21  ;;  %v447_v36 = vadd.f32 %v445_v27, %v442_v26  ;;  %s3760_s17 = sld [smem:[#allocation3 + %s3720_s15]]  ;;  %v924_v45 = vld [vmem:[#allocation7 + $0x1f0] sm:$0xff]  ;;  %v448_v47 = vadd.f32 %v446_v33, %v443_v32  ;;  %v2783_v50 = vpack.c.bf16 %v922_v42, %v918_v41  ;;  %v471_v61 = vadd.f32 %v469_v49, %v466_v48  ;;  %v1590_v37 = vld [vmem:[#allocation10] sm:$0xff] }
  0xed   : > { %s563_s14 = sadd.s32 %s2604_s19, %s562_s18  ;;  %s3764_s24 = sld [smem:[#allocation3 + %s3752_s0]]  ;;  %v2815_v54 = vpack.c.bf16 %v924_v45, %v920_v44  ;;  %v472_v62 = vadd.f32 %v470_v53, %v467_v52  ;;  %v494_v0 = vmul.f32 %v3730_v23, %v493_v56  ;;  %v495_v2 = vmul.f32 %v3746_v29, %v493_v56  ;;  %v1591_v38 = vld [vmem:[#allocation10 + $0x8] sm:$0xff]  ;;  %v1592_v52 = vld [vmem:[#allocation10 + $0x10] sm:$0xff]  ;;  %v1593_v53 = vld [vmem:[#allocation10 + $0x18] sm:$0xff] }
  0xee   : > { %2776 = vmatpush1.bf16.msra.mxu0 %v2775_v15  ;;  %s582_s10 = sshra.s32 %s3752_s0, 7  ;;  %s587_s20 = sand.u32 127, %s3752_s0  ;;  %v449_v46 = vadd.f32 %v447_v36, %v3755_v35  ;;  %v518_v58 = vstv %s3718_s29  ;;  %v450_v60 = vadd.f32 %v448_v47, %v3774_v51  ;;  %v516_v3 = vmul.f32 %v515_v57, %v3725_v22 }
  0xef   : > { %2808 = vmatpush1.bf16.msra.mxu1 %v2807_v19  ;;  %2778 = vmatprep.subr.bf16.mxu0 %v2777_v20  ;;  %s2605_s27 = sshll.u32 %s582_s10, 7  ;;  %s3772_s25 = sadd.s32 7, %s3662_s13  ;;  %v519_v4 = vmul.f32 %v3730_v23, %v518_v58  ;;  %v3396_v5 = vmov 0.0|0.0   ;;  %v473_v8 = vadd.f32 %v471_v61, %v3755_v35  ;;  %v3814_v9 = vadd.f32 %v472_v62, %v3774_v51 }
  0xf0   : > { %2810 = vmatprep.subr.bf16.mxu1 %v2809_v24  ;;  %s2606_s15 = sadd.s32 128, %s2605_s27  ;;  %s3778_s0 = sld [smem:[#allocation3 + %s563_s14]]  ;;  %v451_v59 = vmax.f32 %v449_v46, 0.0  ;;  %v452_v6 = vmax.f32 %v450_v60, 0.0  ;;  %v496_v10 = vadd.f32 %v494_v0, %v491_v63  ;;  %v497_v11 = vadd.f32 %v495_v2, %v492_v1 }
  0xf1   : > { %s588_s11 = sadd.s32 %s2606_s15, %s587_s20  ;;  %s3783_s21 = sld [smem:[#allocation3 + %s3772_s25]]  ;;  %v521_v12 = vadd.f32 %v519_v4, %v516_v3  ;;  %v517_v13 = vmul.f32 %v515_v57, %v3741_v28  ;;  %v520_v14 = vmul.f32 %v3746_v29, %v518_v58  ;;  %v475_v15 = vmax.f32 %v473_v8, 0.0  ;;  %v1594_v8 = vld [vmem:[#allocation10 + $0x20] sm:$0xff] }
  0xf2   : > { %2780 = vmatpush1.bf16.msra.mxu0 %v2779_v34  ;;  %s607_s18 = sshra.s32 %s3772_s25, 7  ;;  %s612_s10 = sand.u32 127, %s3772_s25  ;;  %v540_v16 = vstv %s3705_s23  ;;  %v543_v17 = vstv %s3760_s17  ;;  %v476_v18 = vmax.f32 %v3814_v9, 0.0  ;;  %v3831_v19 = vadd.f32 %v496_v10, %v3755_v35  ;;  %v1595_v9 = vld [vmem:[#allocation10 + $0x28] sm:$0xff] }
  0xf3   : > { %2812 = vmatpush1.bf16.msra.mxu1 %v2811_v39  ;;  %2782 = vmatprep.subr.bf16.mxu0 %v2781_v40  ;;  %s2607_s19 = sshll.u32 %s607_s18, 7  ;;  %s3791_s27 = sadd.s32 8, %s3662_s13  ;;  %v3838_v20 = vadd.f32 %v497_v11, %v3774_v51  ;;  %v3841_v21 = vadd.f32 %v521_v12, %v3755_v35  ;;  %v522_v24 = vadd.f32 %v520_v14, %v517_v13  ;;  %v565_v25 = vstv %s3733_s16 }
  0xf4   : > { %2814 = vmatprep.subr.bf16.mxu1 %v2813_v43  ;;  %s2608_s14 = sadd.s32 128, %s2607_s19  ;;  %s3796_s28 = sld [smem:[#allocation3 + %s588_s11]]  ;;  %v541_v26 = vmul.f32 %v540_v16, %v3725_v22  ;;  %v544_v27 = vmul.f32 %v3730_v23, %v543_v17  ;;  %v542_v32 = vmul.f32 %v540_v16, %v3741_v28  ;;  %v545_v33 = vmul.f32 %v3746_v29, %v543_v17 }
  0xf5   : > { %s3798_s26 = sadd.s32 %s2608_s14, %s612_s10  ;;  %s3804_s22 = sld [smem:[#allocation3 + %s3791_s27]]  ;;  %v500_v39 = vmax.f32 %v3831_v19, 0.0  ;;  %v3862_v40 = vmul.f32 %v565_v25, %v3725_v22  ;;  %v3871_v43 = vadd.f32 %v522_v24, %v3774_v51  ;;  %v501_v62 = vmax.f32 %v3838_v20, 0.0 }
  0xf6   : > { %2784 = vmatpush1.bf16.msra.mxu0 %v2783_v50  ;;  %s632_s29 = sshra.s32 %s3791_s27, 7  ;;  %s637_s15 = sand.u32 127, %s3791_s27  ;;  %v546_v47 = vadd.f32 %v544_v27, %v541_v26  ;;  %v2818_v50 = vpack.c.bf16 %v1591_v38, %v1590_v37  ;;  %v568_v58 = vstv %s3778_s0  ;;  %v2821_v1 = vpack.c.bf16 %v1593_v53, %v1592_v52 }
  0xf7   : > { %2816 = vmatpush1.bf16.msra.mxu1 %v2815_v54  ;;  %2817 = vmatprep.subr.bf16.mxu0 %v3396_v5  ;;  %s2609_s20 = sshll.u32 %s632_s29, 7  ;;  %s655_s11 = sadd.s32 9, %s3662_s13  ;;  %v3882_v54 = vmul.f32 %v565_v25, %v3741_v28  ;;  %v3908_v2 = vadd.f32 %v545_v33, %v542_v32  ;;  %v3914_v10 = vmul.f32 %v3730_v23, %v568_v58  ;;  %v525_v17 = vmax.f32 %v3841_v21, 0.0  ;;  %v1596_v21 = vld [vmem:[#allocation10 + $0x30] sm:$0xff] }
  0xf8   : > { %2945 = vmatprep.subr.bf16.mxu1 %v3396_v5  ;;  %s2610_s25 = sadd.s32 128, %s2609_s20  ;;  %s3816_s19 = sld [smem:[#allocation3 + %s655_s11]]  ;;  %v2824_v20 = vpack.c.bf16 %v1595_v9, %v1594_v8  ;;  %v3941_v24 = vadd.f32 %v546_v47, %v3755_v35  ;;  %v590_v25 = vstv %s3764_s24 }
  0xf9   : > { %1013 = vmatmul.mubr.f32.vlgmr.msra.gmra.mrb[0].mxu0 %v451_v59  ;;  %s638_s18 = sadd.s32 %s2610_s25, %s637_s15  ;;  %s657_s14 = sshra.s32 %s655_s11, 7  ;;  %v571_v52 = vadd.f32 %v3914_v10, %v3862_v40 }
  0xfa   : > { %1270 = vmatmul.mubr.f32.vlgmr.msra.gmra.mrb[0].mxu1 %v451_v59  ;;  %1018 = vmatprep.mubr.f32.mxu0 %v3395_v7  ;;  %s3821_s10 = sld [smem:[#allocation3 + %s638_s18]]  ;;  %s2611_s27 = sshll.u32 %s657_s14, 7 }
  0xfb   : > { %1275 = vmatprep.mubr.f32.mxu1 %v3395_v7  ;;  %s662_s29 = sand.u32 127, %s655_s11  ;;  %s2612_s20 = sadd.s32 128, %s2611_s27  ;;  %v640_v30 = vstv %s3804_s22  ;;  %2819 = vmatpush1.bf16.msra.mxu0 %v2818_v50  ;;  %v1599_v50 = vld [vmem:[#allocation10 + $0x48] sm:$0xff] }
  0xfc   : > { %s3826_s15 = sadd.s32 10, %s3662_s13  ;;  %s663_s25 = sadd.s32 %s2612_s20, %s662_s29  ;;  %v641_v34 = vmul.f32 %v640_v30, %v3725_v22  ;;  %v642_v42 = vmul.f32 %v640_v30, %v3741_v28  ;;  %2820 = vmatprep.subr.bf16.mxu0 %v3396_v5  ;;  %v1597_v30 = vld [vmem:[#allocation10 + $0x38] sm:$0xff] }
  0xfd   : > { %1019 = vmatmul.mubr.f32.gmra.mrb[2].mxu0 %v452_v6  ;;  %s3834_s11 = sld [smem:[#allocation3 + %s3826_s15]]  ;;  %s682_s17 = sshra.s32 %s3826_s15, 7 }
  0xfe   : > { %1276 = vmatmul.mubr.f32.gmra.mrb[2].mxu1 %v452_v6  ;;  %1024 = vmatprep.mubr.f32.mxu0 %v3395_v7  ;;  %s3844_s23 = sld [smem:[#allocation3 + %s663_s25]]  ;;  %v665_v31 = vstv %s3816_s19  ;;  %s2613_s18 = sshll.u32 %s682_s17, 7 }
  0xff   : > { %1281 = vmatprep.mubr.f32.mxu1 %v3395_v7  ;;  %s687_s14 = sand.u32 127, %s3826_s15  ;;  %s2614_s16 = sadd.s32 128, %s2613_s18  ;;  %v666_v45 = vmul.f32 %v665_v31, %v3725_v22  ;;  %v667_v46 = vmul.f32 %v665_v31, %v3741_v28  ;;  %2822 = vmatpush1.bf16.msra.mxu0 %v2821_v1 }
 0x100   : > { %v643_v36 = vstv %s3821_s10  ;;  %s3857_s27 = sadd.s32 11, %s3662_s13  ;;  %s688_s22 = sadd.s32 %s2614_s16, %s687_s14  ;;  %2823 = vmatprep.subr.bf16.mxu0 %v3396_v5 }
 0x101   : > { %1025 = vmatmul.mubr.f32.gmra.mrb[4].mxu0 %v475_v15  ;;  %v644_v41 = vmul.f32 %v3730_v23, %v643_v36  ;;  %s3867_s19 = sld [smem:[#allocation3 + %s3857_s27]]  ;;  %v645_v44 = vmul.f32 %v3746_v29, %v643_v36  ;;  %s707_s29 = sshra.s32 %s3857_s27, 7  ;;  %v526_v36 = vmax.f32 %v3871_v43, 0.0 }
 0x102   : > { %1282 = vmatmul.mubr.f32.gmra.mrb[4].mxu1 %v475_v15  ;;  %1030 = vmatprep.mubr.f32.mxu0 %v3395_v7  ;;  %s3876_s10 = sld [smem:[#allocation3 + %s688_s22]]  ;;  %s2615_s20 = sshll.u32 %s707_s29, 7 }
 0x103   : > { %1287 = vmatprep.mubr.f32.mxu1 %v3395_v7  ;;  %v646_v48 = vadd.f32 %v644_v41, %v641_v34  ;;  %v690_v49 = vstv %s3834_s11  ;;  %s712_s15 = sand.u32 127, %s3857_s27  ;;  %v647_v55 = vadd.f32 %v645_v44, %v642_v42  ;;  %s2616_s25 = sadd.s32 128, %s2615_s20  ;;  %v3967_v41 = vmul.f32 %v590_v25, %v3725_v22  ;;  %2825 = vmatpush1.bf16.msra.mxu0 %v2824_v20 }
 0x104   : > { %v668_v56 = vstv %s3844_s23  ;;  %v691_v57 = vmul.f32 %v690_v49, %v3725_v22  ;;  %s3887_s17 = sadd.s32 12, %s3662_s13  ;;  %s713_s11 = sadd.s32 %s2616_s25, %s712_s15  ;;  %v692_v0 = vmul.f32 %v690_v49, %v3741_v28  ;;  %v593_v42 = vstv %s3796_s28  ;;  %2826 = vmatprep.subr.bf16.mxu0 %v3396_v5  ;;  %v1598_v49 = vld [vmem:[#allocation10 + $0x40] sm:$0xff] }
 0x105   : > { %1031 = vmatmul.mubr.f32.gmra.mrb[6].mxu0 %v476_v18  ;;  %v3892_v59 = vadd.f32 %v646_v48, %v3755_v35  ;;  %v669_v60 = vmul.f32 %v3730_v23, %v668_v56  ;;  %v670_v61 = vmul.f32 %v3746_v29, %v668_v56  ;;  %s3897_s23 = sld [smem:[#allocation3 + %s3887_s17]]  ;;  %v3902_v63 = vadd.f32 %v647_v55, %v3774_v51  ;;  %s732_s18 = sshra.s32 %s3887_s17, 7 }
 0x106   : > { %1288 = vmatmul.mubr.f32.gmra.mrb[6].mxu1 %v476_v18  ;;  %1036 = vmatprep.mubr.f32.mxu0 %v3395_v7  ;;  %s3905_s0 = sld [smem:[#allocation3 + %s713_s11]]  ;;  %s2617_s14 = sshll.u32 %s732_s18, 7  ;;  %v570_v18 = vmul.f32 %v3746_v29, %v568_v58  ;;  %v2827_v44 = vpack.c.bf16 %v1597_v30, %v1596_v21  ;;  %v594_v1 = vmul.f32 %v3730_v23, %v593_v42  ;;  %v1603_v21 = vld [vmem:[#allocation10 + $0x68] sm:$0xff] }
 0x107   : > { %1293 = vmatprep.mubr.f32.mxu1 %v3395_v7  ;;  %v671_v3 = vadd.f32 %v669_v60, %v666_v45  ;;  %v672_v4 = vadd.f32 %v670_v61, %v667_v46  ;;  %v715_v6 = vstv %s3867_s19  ;;  %s737_s16 = sand.u32 127, %s3887_s17  ;;  %s2618_s27 = sadd.s32 128, %s2617_s14  ;;  %v3978_v45 = vadd.f32 %v3908_v2, %v3774_v51 }
 0x108   : > { %v693_v11 = vstv %s3876_s10  ;;  %v716_v12 = vmul.f32 %v715_v6, %v3725_v22  ;;  %v717_v13 = vmul.f32 %v715_v6, %v3741_v28  ;;  %s3920_s22 = sadd.s32 13, %s3662_s13  ;;  %s738_s19 = sadd.s32 %s2618_s27, %s737_s16  ;;  %v572_v60 = vadd.f32 %v570_v18, %v3882_v54  ;;  %2828 = vmatpush1.bf16.msra.mxu0 %v2827_v44  ;;  %v1600_v54 = vld [vmem:[#allocation10 + $0x50] sm:$0xff] }
 0x109   : > { %1037 = vmatmul.mubr.f32.gmra.mrb[8].mxu0 %v500_v39  ;;  %v3924_v14 = vadd.f32 %v671_v3, %v3755_v35  ;;  %v3927_v15 = vadd.f32 %v672_v4, %v3774_v51  ;;  %v694_v16 = vmul.f32 %v3730_v23, %v693_v11  ;;  %s3931_s10 = sld [smem:[#allocation3 + %s3920_s22]]  ;;  %v695_v19 = vmul.f32 %v3746_v29, %v693_v11  ;;  %s757_s20 = sshra.s32 %s3920_s22, 7  ;;  %v1601_v4 = vld [vmem:[#allocation10 + $0x58] sm:$0xff] }
 0x10a   : > { %1294 = vmatmul.mubr.f32.gmra.mrb[8].mxu1 %v500_v39  ;;  %1042 = vmatprep.mubr.f32.mxu0 %v3395_v7  ;;  %s3937_s29 = sld [smem:[#allocation3 + %s738_s19]]  ;;  %s2619_s15 = sshll.u32 %s757_s20, 7  ;;  %v2833_v18 = vpack.c.bf16 %v1601_v4, %v1600_v54  ;;  %v595_v44 = vmul.f32 %v3746_v29, %v593_v42 }
 0x10b   : > { %1299 = vmatprep.mubr.f32.mxu1 %v3395_v7  ;;  %v696_v26 = vadd.f32 %v694_v16, %v691_v57  ;;  %v740_v27 = vstv %s3897_s23  ;;  %s762_s25 = sand.u32 127, %s3920_s22  ;;  %v697_v31 = vadd.f32 %v695_v19, %v692_v0  ;;  %s2620_s17 = sadd.s32 128, %s2619_s15  ;;  %v550_v0 = vmax.f32 %v3941_v24, 0.0  ;;  %2829 = vmatprep.subr.bf16.mxu0 %v3396_v5 }
 0x10c   : > { %v718_v32 = vstv %s3905_s0  ;;  %v741_v33 = vmul.f32 %v740_v27, %v3725_v22  ;;  %v742_v34 = vmul.f32 %v740_v27, %v3741_v28  ;;  %s3951_s11 = sadd.s32 14, %s3662_s13  ;;  %s763_s23 = sadd.s32 %s2620_s17, %s762_s25  ;;  %v592_v16 = vmul.f32 %v590_v25, %v3741_v28  ;;  %v1602_v27 = vld [vmem:[#allocation10 + $0x60] sm:$0xff] }
 0x10d   : > { %1043 = vmatmul.mubr.f32.gmra.mrb[10].mxu0 %v501_v62  ;;  %v3956_v37 = vadd.f32 %v696_v26, %v3755_v35  ;;  %v719_v38 = vmul.f32 %v3730_v23, %v718_v32  ;;  %v720_v39 = vmul.f32 %v3746_v29, %v718_v32  ;;  %s3961_s0 = sld [smem:[#allocation3 + %s3951_s11]]  ;;  %v3971_v43 = vadd.f32 %v697_v31, %v3774_v51  ;;  %s782_s14 = sshra.s32 %s3951_s11, 7 }
 0x10e   : > { %1300 = vmatmul.mubr.f32.gmra.mrb[10].mxu1 %v501_v62  ;;  %1048 = vmatprep.mubr.f32.mxu0 %v3395_v7  ;;  %s3973_s18 = sld [smem:[#allocation3 + %s763_s23]]  ;;  %s2621_s16 = sshll.u32 %s782_s14, 7  ;;  %v2830_v62 = vpack.c.bf16 %v1599_v50, %v1598_v49  ;;  %v551_v19 = vmax.f32 %v3978_v45, 0.0  ;;  %v573_v25 = vadd.f32 %v571_v52, %v3755_v35  ;;  %v615_v49 = vstv %s3783_s21  ;;  %v1604_v52 = vld [vmem:[#allocation10 + $0x70] sm:$0xff] }
 0x10f   : > { %1305 = vmatprep.mubr.f32.mxu1 %v3395_v7  ;;  %v721_v46 = vadd.f32 %v719_v38, %v716_v12  ;;  %v722_v47 = vadd.f32 %v720_v39, %v717_v13  ;;  %v765_v48 = vstv %s3931_s10  ;;  %s787_s27 = sand.u32 127, %s3951_s11  ;;  %s2622_s22 = sadd.s32 128, %s2621_s16  ;;  %v1622_v38 = vld [vmem:[#allocation10 + $0x100] sm:$0xff]  ;;  %v1623_v39 = vld [vmem:[#allocation10 + $0x108] sm:$0xff] }
 0x110   : > { %v743_v53 = vstv %s3937_s29  ;;  %v766_v55 = vmul.f32 %v765_v48, %v3725_v22  ;;  %v767_v56 = vmul.f32 %v765_v48, %v3741_v28  ;;  %s3989_s19 = sadd.s32 15, %s3662_s13  ;;  %s788_s10 = sadd.s32 %s2622_s22, %s787_s27  ;;  %2831 = vmatpush1.bf16.msra.mxu0 %v2830_v62  ;;  %v596_v48 = vadd.f32 %v594_v1, %v3967_v41  ;;  %v1625_v62 = vld [vmem:[#allocation10 + $0x118] sm:$0xff] }
 0x111   : > { %1049 = vmatmul.mubr.f32.gmra.mrb[12].mxu0 %v525_v17  ;;  %v3993_v57 = vadd.f32 %v721_v46, %v3755_v35  ;;  %v3996_v40 = vadd.f32 %v722_v47, %v3774_v51  ;;  %v744_v58 = vmul.f32 %v3730_v23, %v743_v53  ;;  %s4000_s29 = sld [smem:[#allocation3 + %s3989_s19]]  ;;  %v745_v61 = vmul.f32 %v3746_v29, %v743_v53  ;;  %s807_s20 = sshra.s32 %s3989_s19, 7  ;;  %v1605_v53 = vld [vmem:[#allocation10 + $0x78] sm:$0xff] }
 0x112   : > { %1306 = vmatmul.mubr.f32.gmra.mrb[12].mxu1 %v525_v17  ;;  %1054 = vmatprep.mubr.f32.mxu0 %v3395_v7  ;;  %s4005_s13 = sld [smem:[#allocation3 + %s788_s10]]  ;;  %s2623_s15 = sshll.u32 %s807_s20, 7  ;;  %v2836_v46 = vpack.c.bf16 %v1603_v21, %v1602_v27  ;;  %v574_v47 = vadd.f32 %v572_v60, %v3774_v51  ;;  %v4061_v42 = vpack.c.bf16 %v1623_v39, %v1622_v38  ;;  %v1609_v21 = vld [vmem:[#allocation10 + $0x98] sm:$0xff]  ;;  %v1628_v38 = vld [vmem:[#allocation10 + $0x130] sm:$0xff] }
 0x113   : > { %1311 = vmatprep.mubr.f32.mxu1 %v3395_v7  ;;  %v746_v2 = vadd.f32 %v744_v58, %v741_v33  ;;  %v790_v3 = vstv %s3961_s0  ;;  %s812_s25 = sand.u32 127, %s3989_s19  ;;  %v747_v6 = vadd.f32 %v745_v61, %v742_v34  ;;  %s2624_s17 = sadd.s32 128, %s2623_s15  ;;  %2832 = vmatprep.subr.bf16.mxu0 %v3396_v5  ;;  %v1624_v61 = vld [vmem:[#allocation10 + $0x110] sm:$0xff]  ;;  %v2839_v54 = vpack.c.bf16 %v1605_v53, %v1604_v52  ;;  %v1629_v39 = vld [vmem:[#allocation10 + $0x138] sm:$0xff] }
 0x114   : > { %v768_v8 = vstv %s3973_s18  ;;  %v791_v9 = vmul.f32 %v790_v3, %v3725_v22  ;;  %v792_v10 = vmul.f32 %v790_v3, %v3741_v28  ;;  %s4020_s11 = sld [smem:[#allocation3 + %s3798_s26]]  ;;  %s813_s23 = sadd.s32 %s2624_s17, %s812_s25  ;;  %2834 = vmatpush1.bf16.msra.mxu0 %v2833_v18  ;;  %2961 = vmatpush1.bf16.msra.mxu1 %v4061_v42  ;;  %v1612_v53 = vld [vmem:[#allocation10 + $0xb0] sm:$0xff] }
 0x115   : > { %1055 = vmatmul.mubr.f32.gmra.mrb[14].mxu0 %v526_v36  ;;  %v4023_v11 = vadd.f32 %v746_v2, %v3755_v35  ;;  %v769_v12 = vmul.f32 %v3730_v23, %v768_v8  ;;  %v770_v13 = vmul.f32 %v3746_v29, %v768_v8  ;;  %v4032_v17 = vadd.f32 %v747_v6, %v3774_v51  ;;  %s4034_s0 = sld [smem:[#allocation3 + %s813_s23]]  ;;  %v1606_v8 = vld [vmem:[#allocation10 + $0x80] sm:$0xff]  ;;  %s2568_s24 = sshll.u32 %s3453_s12, 5 }
 0x116   : > { %1312 = vmatmul.mubr.f32.gmra.mrb[14].mxu1 %v526_v36  ;;  %1060 = vmatprep.mubr.f32.mxu0 %v3395_v7  ;;  %v597_v2 = vadd.f32 %v595_v44, %v592_v16  ;;  %v616_v16 = vmul.f32 %v615_v49, %v3725_v22  ;;  %v1610_v44 = vld [vmem:[#allocation10 + $0xa0] sm:$0xff]  ;;  %p419_p6 = scmp.lt.s32.totalorder %s2568_s24, 63 }
 0x117   : > { %1317 = vmatprep.mubr.f32.mxu1 %v3395_v7  ;;  %v771_v20 = vadd.f32 %v769_v12, %v766_v55  ;;  %v772_v24 = vadd.f32 %v770_v13, %v767_v56  ;;  %v815_v26 = vstv %s4000_s29  ;;  %2835 = vmatprep.subr.bf16.mxu0 %v3396_v5  ;;  %v575_v55 = vmax.f32 %v573_v25, 0.0 }
 0x118   : > { %v793_v30 = vstv %s4005_s13  ;;  %v816_v31 = vmul.f32 %v815_v26, %v3725_v22  ;;  %v817_v32 = vmul.f32 %v815_v26, %v3741_v28  ;;  %2837 = vmatpush1.bf16.msra.mxu0 %v2836_v46  ;;  %v576_v12 = vmax.f32 %v574_v47, 0.0  ;;  %2946 = vmatprep.subr.bf16.mxu1 %v3396_v5  ;;  %s4654_s24 = smov (!%p419_p6, %s2568_s24), 63 }
 0x119   : > { %1061 = vmatmul.mubr.f32.gmra.mrb[16].mxu0 %v550_v0  ;;  %v4045_v33 = vadd.f32 %v771_v20, %v3755_v35  ;;  %v4048_v34 = vadd.f32 %v772_v24, %v3774_v51  ;;  %v794_v36 = vmul.f32 %v3730_v23, %v793_v30  ;;  %v795_v45 = vmul.f32 %v3746_v29, %v793_v30  ;;  %v1627_v20 = vld [vmem:[#allocation10 + $0x128] sm:$0xff]  ;;  %s2569_s21 = sshll.u32 %s4654_s24, 3 }
 0x11a   : > { %1318 = vmatmul.mubr.f32.gmra.mrb[16].mxu1 %v550_v0  ;;  %1066 = vmatprep.mubr.f32.mxu0 %v3395_v7  ;;  %v618_v60 = vstv %s4020_s11  ;;  %v598_v13 = vadd.f32 %v596_v48, %v3755_v35  ;;  %v617_v22 = vmul.f32 %v615_v49, %v3741_v28  ;;  %v4102_v46 = vpack.c.bf16 %v1629_v39, %v1628_v38  ;;  %v1630_v49 = vld [vmem:[#allocation10 + $0x140] sm:$0xff]  ;;  %s4556_s18 = scalar_lea.vmem %s4634_s9, %s2569_s21 }
 0x11b   : > { %1323 = vmatprep.mubr.f32.mxu1 %v3395_v7  ;;  %v796_v50 = vadd.f32 %v794_v36, %v791_v9  ;;  %v797_v56 = vadd.f32 %v795_v45, %v792_v10  ;;  %v818_v58 = vstv %s4034_s0  ;;  %2838 = vmatprep.subr.bf16.mxu0 %v3396_v5  ;;  %v1607_v9 = vld [vmem:[#allocation10 + $0x88] sm:$0xff]  ;;  %v4076_v10 = vpack.c.bf16 %v1625_v62, %v1624_v61  ;;  %v1632_v61 = vld [vmem:[#allocation10 + $0x150] sm:$0xff]  ;;  %v1633_v62 = vld [vmem:[#allocation10 + $0x158] sm:$0xff] }
 0x11c   : > { %v819_v0 = vmul.f32 %v3730_v23, %v818_v58  ;;  %v820_v1 = vmul.f32 %v3746_v29, %v818_v58  ;;  %v619_v18 = vmul.f32 %v3730_v23, %v618_v60  ;;  %2840 = vmatpush1.bf16.msra.mxu0 %v2839_v54  ;;  %v2842_v27 = vpack.c.bf16 %v1607_v9, %v1606_v8  ;;  %v1608_v23 = vld [vmem:[#allocation10 + $0x90] sm:$0xff]  ;;  %v1611_v45 = vld [vmem:[#allocation10 + $0xa8] sm:$0xff] }
 0x11d   : > { %1067 = vmatmul.mubr.f32.gmra.mrb[18].mxu0 %v551_v19  ;;  %v4066_v41 = vadd.f32 %v796_v50, %v3755_v35  ;;  %v4072_v3 = vadd.f32 %v797_v56, %v3774_v51  ;;  %2841 = vmatprep.subr.bf16.mxu0 %v3396_v5  ;;  %v600_v30 = vmax.f32 %v598_v13, 0.0  ;;  %v620_v36 = vmul.f32 %v3746_v29, %v618_v60  ;;  %v1631_v50 = vld [vmem:[#allocation10 + $0x148] sm:$0xff] }
 0x11e   : > { %1324 = vmatmul.mubr.f32.gmra.mrb[18].mxu1 %v551_v19  ;;  %1072 = vmatprep.mubr.f32.mxu0 %v3395_v7  ;;  %v821_v4 = vadd.f32 %v819_v0, %v816_v31  ;;  %v822_v6 = vadd.f32 %v820_v1, %v817_v32  ;;  %v1626_v19 = vld [vmem:[#allocation10 + $0x120] sm:$0xff]  ;;  %v599_v31 = vadd.f32 %v597_v2, %v3774_v51  ;;  %v1615_v1 = vld [vmem:[#allocation10 + $0xc8] sm:$0xff]  ;;  %v650_v8 = vmax.f32 %v3892_v59, 0.0 }
 0x11f   : > { %1329 = vmatprep.mubr.f32.mxu1 %v3395_v7  ;;  %2962 = vmatpush1.bf16.msra.mxu1 %v4076_v10  ;;  %v4093_v25 = vpack.c.bf16 %v1627_v20, %v1626_v19  ;;  %v621_v32 = vadd.f32 %v619_v18, %v616_v16  ;;  %v2845_v28 = vpack.c.bf16 %v1609_v21, %v1608_v23  ;;  %v1614_v0 = vld [vmem:[#allocation10 + $0xc0] sm:$0xff]  ;;  %v1619_v13 = vld [vmem:[#allocation10 + $0xe8] sm:$0xff]  ;;  %v651_v16 = vmax.f32 %v3902_v63, 0.0  ;;  %v1620_v18 = vld [vmem:[#allocation10 + $0xf0] sm:$0xff] }
 0x120   : > { %v4084_v24 = vadd.f32 %v821_v4, %v3755_v35  ;;  %v4087_v26 = vadd.f32 %v822_v6, %v3774_v51  ;;  %2947 = vmatprep.subr.bf16.mxu1 %v3396_v5  ;;  %2843 = vmatpush1.bf16.msra.mxu0 %v2842_v27  ;;  %v601_v29 = vmax.f32 %v599_v31, 0.0  ;;  %v622_v48 = vadd.f32 %v620_v36, %v617_v22  ;;  %v1616_v4 = vld [vmem:[#allocation10 + $0xd0] sm:$0xff]  ;;  %v1617_v6 = vld [vmem:[#allocation10 + $0xd8] sm:$0xff]  ;;  %v1635_v23 = vld [vmem:[#allocation10 + $0x168] sm:$0xff] }
 0x121   : > { %1073 = vmatmul.mubr.f32.gmra.mrb[20].mxu0 %v575_v55  ;;  %2844 = vmatprep.subr.bf16.mxu0 %v3396_v5  ;;  %v623_v47 = vadd.f32 %v621_v32, %v3755_v35  ;;  %v2848_v52 = vpack.c.bf16 %v1611_v45, %v1610_v44  ;;  %v4110_v56 = vpack.c.bf16 %v1631_v50, %v1630_v49  ;;  %v1621_v19 = vld [vmem:[#allocation10 + $0xf8] sm:$0xff]  ;;  %v675_v20 = vmax.f32 %v3924_v14, 0.0  ;;  %v1639_v36 = vld [vmem:[#allocation10 + $0x188] sm:$0xff] }
 0x122   : > { %1330 = vmatmul.mubr.f32.gmra.mrb[20].mxu1 %v575_v55  ;;  %1078 = vmatprep.mubr.f32.mxu0 %v3395_v7  ;;  %v1613_v55 = vld [vmem:[#allocation10 + $0xb8] sm:$0xff]  ;;  %v624_v58 = vadd.f32 %v622_v48, %v3774_v51  ;;  %v4118_v2 = vpack.c.bf16 %v1633_v62, %v1632_v61  ;;  %v2854_v54 = vpack.c.bf16 %v1615_v1, %v1614_v0  ;;  %v676_v27 = vmax.f32 %v3927_v15, 0.0  ;;  %v1634_v15 = vld [vmem:[#allocation10 + $0x160] sm:$0xff] }
 0x123   : > { %1335 = vmatprep.mubr.f32.mxu1 %v3395_v7  ;;  %2963 = vmatpush1.bf16.msra.mxu1 %v4093_v25  ;;  %v625_v35 = vmax.f32 %v623_v47, 0.0  ;;  %v2851_v60 = vpack.c.bf16 %v1613_v55, %v1612_v53  ;;  %v2857_v9 = vpack.c.bf16 %v1617_v6, %v1616_v4  ;;  %v2863_v63 = vpack.c.bf16 %v1621_v19, %v1620_v18  ;;  %v1645_v49 = vld [vmem:[#allocation10 + $0x1b8] sm:$0xff]  ;;  %v1647_v53 = vld [vmem:[#allocation10 + $0x1c8] sm:$0xff] }
 0x124   : > { %2948 = vmatprep.subr.bf16.mxu1 %v3396_v5  ;;  %2846 = vmatpush1.bf16.msra.mxu0 %v2845_v28  ;;  %v626_v51 = vmax.f32 %v624_v58, 0.0  ;;  %v700_v14 = vmax.f32 %v3956_v37, 0.0  ;;  %v701_v22 = vmax.f32 %v3971_v43, 0.0  ;;  %v4148_v21 = vpack.c.bf16 %v1635_v23, %v1634_v15  ;;  %v1636_v43 = vld [vmem:[#allocation10 + $0x170] sm:$0xff]  ;;  %v1641_v28 = vld [vmem:[#allocation10 + $0x198] sm:$0xff] }
 0x125   : > { %1079 = vmatmul.mubr.f32.gmra.mrb[22].mxu0 %v576_v12  ;;  %2847 = vmatprep.subr.bf16.mxu0 %v3396_v5  ;;  %v725_v37 = vmax.f32 %v3993_v57, 0.0  ;;  %v726_v32 = vmax.f32 %v3996_v40, 0.0  ;;  %v1638_v57 = vld [vmem:[#allocation10 + $0x180] sm:$0xff]  ;;  %v750_v39 = vmax.f32 %v4023_v11, 0.0  ;;  %v1640_v40 = vld [vmem:[#allocation10 + $0x190] sm:$0xff]  ;;  %v751_v45 = vmax.f32 %v4032_v17, 0.0 }
 0x126   : > { %1336 = vmatmul.mubr.f32.gmra.mrb[22].mxu1 %v576_v12  ;;  %1084 = vmatprep.mubr.f32.mxu0 %v3395_v7  ;;  %v1618_v12 = vld [vmem:[#allocation10 + $0xe0] sm:$0xff]  ;;  %v4162_v38 = vpack.c.bf16 %v1639_v36, %v1638_v57  ;;  %v4169_v44 = vpack.c.bf16 %v1641_v28, %v1640_v40  ;;  %v775_v48 = vmax.f32 %v4045_v33, 0.0  ;;  %v1644_v17 = vld [vmem:[#allocation10 + $0x1b0] sm:$0xff]  ;;  %v1649_v58 = vld [vmem:[#allocation10 + $0x1d8] sm:$0xff]  ;;  %v801_v62 = vmax.f32 %v4072_v3, 0.0 }
 0x127   : > { %1341 = vmatprep.mubr.f32.mxu1 %v3395_v7  ;;  %2964 = vmatpush1.bf16.msra.mxu1 %v4102_v46  ;;  %v2860_v59 = vpack.c.bf16 %v1619_v13, %v1618_v12  ;;  %v1642_v11 = vld [vmem:[#allocation10 + $0x1a0] sm:$0xff]  ;;  %v4183_v50 = vpack.c.bf16 %v1645_v49, %v1644_v17  ;;  %v825_v1 = vmax.f32 %v4084_v24, 0.0  ;;  %v1652_v3 = vld [vmem:[#allocation10 + $0x1f0] sm:$0xff]  ;;  %v826_v4 = vmax.f32 %v4087_v26, 0.0 }
 0x128   : > { %2949 = vmatprep.subr.bf16.mxu1 %v3396_v5  ;;  %2849 = vmatpush1.bf16.msra.mxu0 %v2848_v52  ;;  %v776_v52 = vmax.f32 %v4048_v34, 0.0  ;;  %v1646_v33 = vld [vmem:[#allocation10 + $0x1c0] sm:$0xff]  ;;  %v1648_v34 = vld [vmem:[#allocation10 + $0x1d0] sm:$0xff]  ;;  %v928_v24 = vlaneseq }
 0x129   : > { %1085 = vmatmul.mubr.f32.gmra.mrb[24].mxu0 %v600_v30  ;;  %2850 = vmatprep.subr.bf16.mxu0 %v3396_v5  ;;  %v4190_v55 = vpack.c.bf16 %v1647_v53, %v1646_v33  ;;  %v4197_v61 = vpack.c.bf16 %v1649_v58, %v1648_v34 }
 0x12a   : > { %1342 = vmatmul.mubr.f32.gmra.mrb[24].mxu1 %v600_v30  ;;  %1090 = vmatprep.mubr.f32.mxu0 %v3395_v7  ;;  %v1637_v30 = vld [vmem:[#allocation10 + $0x178] sm:$0xff]  ;;  %v4217_v6 = vshrl.u32 %v928_v24, 7 }
 0x12b   : > { %1347 = vmatprep.mubr.f32.mxu1 %v3395_v7  ;;  %2965 = vmatpush1.bf16.msra.mxu1 %v4110_v56  ;;  %v4155_v31 = vpack.c.bf16 %v1637_v30, %v1636_v43 }
 0x12c   : > { %2950 = vmatprep.subr.bf16.mxu1 %v3396_v5  ;;  %2852 = vmatpush1.bf16.msra.mxu0 %v2851_v60  ;;  %v1651_v60 = vld [vmem:[#allocation10 + $0x1e8] sm:$0xff]  ;;  %v934_v12 = vsub.s32 1, %v4217_v6 }
 0x12d   : > { %1091 = vmatmul.mubr.f32.gmra.mrb[26].mxu0 %v601_v29  ;;  %2853 = vmatprep.subr.bf16.mxu0 %v3396_v5 }
 0x12e   : > { %1348 = vmatmul.mubr.f32.gmra.mrb[26].mxu1 %v601_v29  ;;  %1096 = vmatprep.mubr.f32.mxu0 %v3395_v7  ;;  %v1643_v29 = vld [vmem:[#allocation10 + $0x1a8] sm:$0xff] }
 0x12f   : > { %1353 = vmatprep.mubr.f32.mxu1 %v3395_v7  ;;  %2966 = vmatpush1.bf16.msra.mxu1 %v4118_v2  ;;  %v4176_v47 = vpack.c.bf16 %v1643_v29, %v1642_v11 }
 0x130   : > { %2951 = vmatprep.subr.bf16.mxu1 %v3396_v5  ;;  %2855 = vmatpush1.bf16.msra.mxu0 %v2854_v54 }
 0x131   : > { %1097 = vmatmul.mubr.f32.gmra.mrb[28].mxu0 %v625_v35  ;;  %2856 = vmatprep.subr.bf16.mxu0 %v3396_v5 }
 0x132   : > { %1354 = vmatmul.mubr.f32.gmra.mrb[28].mxu1 %v625_v35  ;;  %1102 = vmatprep.mubr.f32.mxu0 %v3395_v7  ;;  %v800_v35 = vmax.f32 %v4066_v41, 0.0  ;;  %v1650_v41 = vld [vmem:[#allocation10 + $0x1e0] sm:$0xff] }
 0x133   : > { %1359 = vmatprep.mubr.f32.mxu1 %v3395_v7  ;;  %2967 = vmatpush1.bf16.msra.mxu1 %v4148_v21  ;;  %v4204_v0 = vpack.c.bf16 %v1651_v60, %v1650_v41 }
 0x134   : > { %2858 = vmatpush1.bf16.msra.mxu0 %v2857_v9  ;;  %2952 = vmatprep.subr.bf16.mxu1 %v3396_v5  ;;  %v4220_v9 = vld [vmem:[#allocation9] sm:$0xf] }
 0x135   : > { %1103 = vmatmul.mubr.f32.gmra.mrb[30].mxu0 %v626_v51  ;;  %2859 = vmatprep.subr.bf16.mxu0 %v3396_v5  ;;  %v4227_v13 = vrot.slane %v4220_v9, %v934_v12 }
 0x136   : > { %1360 = vmatmul.mubr.f32.gmra.mrb[30].mxu1 %v626_v51  ;;  %1108 = vmatprep.mubr.f32.mxu0 %v3395_v7  ;;  %v1653_v51 = vld [vmem:[#allocation10 + $0x1f8] sm:$0xff] }
 0x137   : > { %1365 = vmatprep.mubr.f32.mxu1 %v3395_v7  ;;  %2968 = vmatpush1.bf16.msra.mxu1 %v4155_v31  ;;  %v4211_v54 = vpack.c.bf16 %v1653_v51, %v1652_v3 }
 0x138   : > { %2861 = vmatpush1.bf16.msra.mxu0 %v2860_v59  ;;  %2953 = vmatprep.subr.bf16.mxu1 %v3396_v5 }
 0x139   : > { %1109 = vmatmul.mubr.f32.gmra.mrb[32].mxu0 %v650_v8  ;;  %2862 = vmatprep.subr.bf16.mxu0 %v3396_v5 }
 0x13a   : > { %1366 = vmatmul.mubr.f32.gmra.mrb[32].mxu1 %v650_v8  ;;  %1114 = vmatprep.mubr.f32.mxu0 %v3395_v7  ;;  %v930_v8 = vsub.s32 0, %v4217_v6 }
 0x13b   : > { %1371 = vmatprep.mubr.f32.mxu1 %v3395_v7  ;;  %2969 = vmatpush1.bf16.msra.mxu1 %v4162_v38 }
 0x13c   : > { %2864 = vmatpush1.bf16.msra.mxu0 %v2863_v63  ;;  %2954 = vmatprep.subr.bf16.mxu1 %v3396_v5  ;;  %v4224_v26 = vrot.slane %v4220_v9, %v930_v8 }
 0x13d   : > { %1115 = vmatmul.mubr.f32.gmra.mrb[34].mxu0 %v651_v16  ;;  %2865 = vmatprep.subr.bf16.mxu0 %v3396_v5 }
 0x13e   : > { %1372 = vmatmul.mubr.f32.gmra.mrb[34].mxu1 %v651_v16  ;;  %1120 = vmatprep.mubr.f32.mxu0 %v3395_v7 }
 0x13f   : > { %1377 = vmatprep.mubr.f32.mxu1 %v3395_v7  ;;  %2970 = vmatpush1.bf16.msra.mxu1 %v4169_v44 }
 0x140   : > { %2955 = vmatprep.subr.bf16.mxu1 %v3396_v5 }
 0x141   : > { %1121 = vmatmul.mubr.f32.gmra.mrb[36].mxu0 %v675_v20 }
 0x142   : > { %1378 = vmatmul.mubr.f32.gmra.mrb[36].mxu1 %v675_v20  ;;  %1126 = vmatprep.mubr.f32.mxu0 %v3395_v7 }
 0x143   : > { %1383 = vmatprep.mubr.f32.mxu1 %v3395_v7  ;;  %2971 = vmatpush1.bf16.msra.mxu1 %v4176_v47 }
 0x144   : > { %2956 = vmatprep.subr.bf16.mxu1 %v3396_v5 }
 0x145   : > { %1127 = vmatmul.mubr.f32.gmra.mrb[38].mxu0 %v676_v27 }
 0x146   : > { %1384 = vmatmul.mubr.f32.gmra.mrb[38].mxu1 %v676_v27  ;;  %1132 = vmatprep.mubr.f32.mxu0 %v3395_v7 }
 0x147   : > { %1389 = vmatprep.mubr.f32.mxu1 %v3395_v7  ;;  %2972 = vmatpush1.bf16.msra.mxu1 %v4183_v50 }
 0x148   : > { %2957 = vmatprep.subr.bf16.mxu1 %v3396_v5 }
 0x149   : > { %1133 = vmatmul.mubr.f32.gmra.mrb[40].mxu0 %v700_v14 }
 0x14a   : > { %1390 = vmatmul.mubr.f32.gmra.mrb[40].mxu1 %v700_v14  ;;  %1138 = vmatprep.mubr.f32.mxu0 %v3395_v7 }
 0x14b   : > { %1395 = vmatprep.mubr.f32.mxu1 %v3395_v7  ;;  %2973 = vmatpush1.bf16.msra.mxu1 %v4190_v55 }
 0x14c   : > { %2958 = vmatprep.subr.bf16.mxu1 %v3396_v5 }
 0x14d   : > { %1139 = vmatmul.mubr.f32.gmra.mrb[42].mxu0 %v701_v22 }
 0x14e   : > { %1396 = vmatmul.mubr.f32.gmra.mrb[42].mxu1 %v701_v22  ;;  %1144 = vmatprep.mubr.f32.mxu0 %v3395_v7 }
 0x14f   : > { %1401 = vmatprep.mubr.f32.mxu1 %v3395_v7  ;;  %2974 = vmatpush1.bf16.msra.mxu1 %v4197_v61 }
 0x150   : > { %2959 = vmatprep.subr.bf16.mxu1 %v3396_v5 }
 0x151   : > { %1145 = vmatmul.mubr.f32.gmra.mrb[44].mxu0 %v725_v37 }
 0x152   : > { %1402 = vmatmul.mubr.f32.gmra.mrb[44].mxu1 %v725_v37  ;;  %1150 = vmatprep.mubr.f32.mxu0 %v3395_v7 }
 0x153   : > { %1407 = vmatprep.mubr.f32.mxu1 %v3395_v7  ;;  %2975 = vmatpush1.bf16.msra.mxu1 %v4204_v0 }
 0x154   : > { %2960 = vmatprep.subr.bf16.mxu1 %v3396_v5 }
 0x155   : > { %1151 = vmatmul.mubr.f32.gmra.mrb[46].mxu0 %v726_v32 }
 0x156   : > { %1408 = vmatmul.mubr.f32.gmra.mrb[46].mxu1 %v726_v32  ;;  %1156 = vmatprep.mubr.f32.mxu0 %v3395_v7 }
 0x157   : > { %1413 = vmatprep.mubr.f32.mxu1 %v3395_v7  ;;  %2976 = vmatpush1.bf16.msra.mxu1 %v4211_v54 }
 0x159   : > { %1157 = vmatmul.mubr.f32.gmra.mrb[48].mxu0 %v750_v39 }
 0x15a   : > { %1414 = vmatmul.mubr.f32.gmra.mrb[48].mxu1 %v750_v39  ;;  %1162 = vmatprep.mubr.f32.mxu0 %v3395_v7 }
 0x15b   : > { %1419 = vmatprep.mubr.f32.mxu1 %v3395_v7 }
 0x15d   : > { %1163 = vmatmul.mubr.f32.gmra.mrb[50].mxu0 %v751_v45 }
 0x15e   : > { %1420 = vmatmul.mubr.f32.gmra.mrb[50].mxu1 %v751_v45  ;;  %1168 = vmatprep.mubr.f32.mxu0 %v3395_v7 }
 0x15f   : > { %1425 = vmatprep.mubr.f32.mxu1 %v3395_v7 }
 0x161   : > { %1169 = vmatmul.mubr.f32.gmra.mrb[52].mxu0 %v775_v48 }
 0x162   : > { %1426 = vmatmul.mubr.f32.gmra.mrb[52].mxu1 %v775_v48  ;;  %1174 = vmatprep.mubr.f32.mxu0 %v3395_v7 }
 0x163   : > { %1431 = vmatprep.mubr.f32.mxu1 %v3395_v7 }
 0x165   : > { %1175 = vmatmul.mubr.f32.gmra.mrb[54].mxu0 %v776_v52 }
 0x166   : > { %1432 = vmatmul.mubr.f32.gmra.mrb[54].mxu1 %v776_v52  ;;  %1180 = vmatprep.mubr.f32.mxu0 %v3395_v7 }
 0x167   : > { %1437 = vmatprep.mubr.f32.mxu1 %v3395_v7 }
 0x169   : > { %1181 = vmatmul.mubr.f32.gmra.mrb[56].mxu0 %v800_v35 }
 0x16a   : > { %1438 = vmatmul.mubr.f32.gmra.mrb[56].mxu1 %v800_v35  ;;  %1186 = vmatprep.mubr.f32.mxu0 %v3395_v7 }
 0x16b   : > { %1443 = vmatprep.mubr.f32.mxu1 %v3395_v7 }
 0x16d   : > { %1187 = vmatmul.mubr.f32.gmra.mrb[58].mxu0 %v801_v62 }
 0x16e   : > { %1444 = vmatmul.mubr.f32.gmra.mrb[58].mxu1 %v801_v62  ;;  %1192 = vmatprep.mubr.f32.mxu0 %v3395_v7 }
 0x16f   : > { %1449 = vmatprep.mubr.f32.mxu1 %v3395_v7 }
 0x171   : > { %1193 = vmatmul.mubr.f32.gmra.mrb[60].mxu0 %v825_v1 }
 0x172   : > { %1450 = vmatmul.mubr.f32.gmra.mrb[60].mxu1 %v825_v1  ;;  %1198 = vmatprep.mubr.f32.mxu0 %v3395_v7 }
 0x173   : > { %1455 = vmatprep.mubr.f32.mxu1 %v3395_v7 }
 0x175   : > { %1199 = vmatmul.mubr.f32.gmra.mrb[62].mxu0 %v826_v4 }
 0x176   : > { %1456 = vmatmul.mubr.f32.gmra.mrb[62].mxu1 %v826_v4 }
 0x1cc   : > { %v1014_v7 = vpop.f32.mrb[0].mxu0 }
 0x1cd   : > { %v1015_v16 = vadd.f32 %v1014_v7, %v4224_v26  ;;  %v1016_v59 = vpop.f32.mrb[1].mxu0  ;;  %v4230_v18 = vpop.f32.mrb[0].mxu1 }
 0x1ce   : > { %v1017_v19 = vadd.f32 %v1016_v59, %v4227_v13  ;;  %v4233_v20 = vpop.f32.mrb[1].mxu1 }
 0x1cf   : > { %v1462_v14 = vmax.f32 %v1015_v16, 0.0 }
 0x1d0   : > { %v1463_v63 = vmax.f32 %v1017_v19, 0.0  ;;  %v1020_v27 = vpop.f32.mrb[2].mxu0 }
 0x1d1   : > { %v1021_v22 = vadd.f32 %v1020_v27, %v4224_v26  ;;  %v1022_v15 = vpop.f32.mrb[3].mxu0  ;;  %v4236_v23 = vpop.f32.mrb[2].mxu1  ;;  %v938_v27 = vsub.s32 2, %v4217_v6 }
 0x1d2   : > { %v1023_v37 = vadd.f32 %v1022_v15, %v4227_v13  ;;  %1725 = vmatprep.mubr.f32.mxu0 %v1463_v63  ;;  %v4239_v43 = vpop.f32.mrb[3].mxu1  ;;  %v942_v15 = vsub.s32 3, %v4217_v6 }
 0x1d3   : > { %1726 = vmatmul.mubr.f32.vlgmr.msra.gmra.mrb[64].mxu0 %v1462_v14  ;;  %v1466_v57 = vmax.f32 %v1021_v22, 0.0 }
 0x1d4   : > { %v1467_v30 = vmax.f32 %v1023_v37, 0.0  ;;  %2867 = vmatpush1.bf16.msra.mxu0 %v4061_v42  ;;  %v1026_v32 = vpop.f32.mrb[4].mxu0 }
 0x1d5   : > { %v1027_v36 = vadd.f32 %v1026_v32, %v4224_v26  ;;  %v1028_v39 = vpop.f32.mrb[5].mxu0  ;;  %2868 = vmatprep.subr.bf16.mxu0 %v3396_v5  ;;  %v4244_v40 = vpop.f32.mrb[4].mxu1 }
 0x1d6   : > { %v1029_v28 = vadd.f32 %v1028_v39, %v4227_v13  ;;  %1730 = vmatprep.mubr.f32.mxu0 %v1467_v30  ;;  %v4247_v45 = vpop.f32.mrb[5].mxu1  ;;  %v4289_v39 = vrot.slane %v4220_v9, %v938_v27 }
 0x1d7   : > { %1731 = vmatmul.mubr.f32.gmra.mrb[66].mxu0 %v1466_v57  ;;  %v1470_v42 = vmax.f32 %v1027_v36, 0.0 }
 0x1d8   : > { %v1471_v11 = vmax.f32 %v1029_v28, 0.0  ;;  %v1032_v29 = vpop.f32.mrb[6].mxu0  ;;  %2870 = vmatpush1.bf16.msra.mxu0 %v4076_v10 }
 0x1d9   : > { %v1033_v48 = vadd.f32 %v1032_v29, %v4224_v26  ;;  %v1034_v17 = vpop.f32.mrb[7].mxu0  ;;  %2871 = vmatprep.subr.bf16.mxu0 %v3396_v5  ;;  %v4252_v49 = vpop.f32.mrb[6].mxu1 }
 0x1da   : > { %v1035_v52 = vadd.f32 %v1034_v17, %v4227_v13  ;;  %1735 = vmatprep.mubr.f32.mxu0 %v1471_v11  ;;  %v4255_v33 = vpop.f32.mrb[7].mxu1  ;;  %v4295_v11 = vrot.slane %v4220_v9, %v942_v15 }
 0x1db   : > { %1736 = vmatmul.mubr.f32.gmra.mrb[68].mxu0 %v1470_v42  ;;  %v1474_v34 = vmax.f32 %v1033_v48, 0.0 }
 0x1dc   : > { %v1475_v53 = vmax.f32 %v1035_v52, 0.0  ;;  %v1038_v35 = vpop.f32.mrb[8].mxu0  ;;  %2873 = vmatpush1.bf16.msra.mxu0 %v4093_v25 }
 0x1dd   : > { %v1039_v10 = vadd.f32 %v1038_v35, %v4224_v26  ;;  %v1040_v58 = vpop.f32.mrb[9].mxu0  ;;  %v4259_v62 = vpop.f32.mrb[8].mxu1  ;;  %2874 = vmatprep.subr.bf16.mxu0 %v3396_v5 }
 0x1de   : > { %v1041_v41 = vadd.f32 %v1040_v58, %v4227_v13  ;;  %1740 = vmatprep.mubr.f32.mxu0 %v1475_v53  ;;  %v4263_v60 = vpop.f32.mrb[9].mxu1 }
 0x1df   : > { %1741 = vmatmul.mubr.f32.gmra.mrb[70].mxu0 %v1474_v34  ;;  %v1478_v51 = vmax.f32 %v1039_v10, 0.0 }
 0x1e0   : > { %v1479_v1 = vmax.f32 %v1041_v41, 0.0  ;;  %v1044_v3 = vpop.f32.mrb[10].mxu0  ;;  %2876 = vmatpush1.bf16.msra.mxu0 %v4102_v46 }
 0x1e1   : > { %v1045_v25 = vadd.f32 %v1044_v3, %v4224_v26  ;;  %v1046_v4 = vpop.f32.mrb[11].mxu0  ;;  %v4267_v24 = vpop.f32.mrb[10].mxu1  ;;  %2877 = vmatprep.subr.bf16.mxu0 %v3396_v5 }
 0x1e2   : > { %v1047_v8 = vadd.f32 %v1046_v4, %v4227_v13  ;;  %1745 = vmatprep.mubr.f32.mxu0 %v1479_v1  ;;  %v4271_v12 = vpop.f32.mrb[11].mxu1 }
 0x1e3   : > { %1746 = vmatmul.mubr.f32.gmra.mrb[72].mxu0 %v1478_v51  ;;  %v1482_v59 = vmax.f32 %v1045_v25, 0.0 }
 0x1e4   : > { %v1483_v7 = vmax.f32 %v1047_v8, 0.0  ;;  %v1050_v16 = vpop.f32.mrb[12].mxu0  ;;  %2879 = vmatpush1.bf16.msra.mxu0 %v4110_v56 }
 0x1e5   : > { %v1051_v46 = vadd.f32 %v1050_v16, %v4224_v26  ;;  %v1052_v19 = vpop.f32.mrb[13].mxu0  ;;  %v4275_v63 = vpop.f32.mrb[12].mxu1  ;;  %2880 = vmatprep.subr.bf16.mxu0 %v3396_v5 }
 0x1e6   : > { %v1053_v14 = vadd.f32 %v1052_v19, %v4227_v13  ;;  %1750 = vmatprep.mubr.f32.mxu0 %v1483_v7  ;;  %v4280_v22 = vpop.f32.mrb[13].mxu1 }
 0x1e7   : > { %1751 = vmatmul.mubr.f32.gmra.mrb[74].mxu0 %v1482_v59  ;;  %v1486_v30 = vmax.f32 %v1051_v46, 0.0 }
 0x1e8   : > { %v1487_v37 = vmax.f32 %v1053_v14, 0.0  ;;  %v1056_v56 = vpop.f32.mrb[14].mxu0  ;;  %2882 = vmatpush1.bf16.msra.mxu0 %v4118_v2 }
 0x1e9   : > { %v1057_v32 = vadd.f32 %v1056_v56, %v4224_v26  ;;  %v1058_v57 = vpop.f32.mrb[15].mxu0  ;;  %v4285_v36 = vpop.f32.mrb[14].mxu1  ;;  %2883 = vmatprep.subr.bf16.mxu0 %v3396_v5 }
 0x1ea   : > { %v1059_v28 = vadd.f32 %v1058_v57, %v4227_v13  ;;  %1755 = vmatprep.mubr.f32.mxu0 %v1487_v37  ;;  %v4292_v6 = vpop.f32.mrb[15].mxu1 }
 0x1eb   : > { %1756 = vmatmul.mubr.f32.gmra.mrb[76].mxu0 %v1486_v30  ;;  %v1490_v42 = vmax.f32 %v1057_v32, 0.0 }
 0x1ec   : > { %v1491_v2 = vmax.f32 %v1059_v28, 0.0  ;;  %v1062_v29 = vpop.f32.mrb[16].mxu0  ;;  %2885 = vmatpush1.bf16.msra.mxu0 %v4148_v21 }
 0x1ed   : > { %v1063_v48 = vadd.f32 %v1062_v29, %v4224_v26  ;;  %v1064_v17 = vpop.f32.mrb[17].mxu0  ;;  %v1319_v52 = vpop.f32.mrb[16].mxu1  ;;  %2886 = vmatprep.subr.bf16.mxu0 %v3396_v5 }
 0x1ee   : > { %v1065_v53 = vadd.f32 %v1064_v17, %v4227_v13  ;;  %v1320_v35 = vadd.f32 %v1319_v52, %v4289_v39  ;;  %1760 = vmatprep.mubr.f32.mxu0 %v1491_v2  ;;  %v1321_v34 = vpop.f32.mrb[17].mxu1 }
 0x1ef   : > { %v1322_v9 = vadd.f32 %v1321_v34, %v4295_v11  ;;  %1761 = vmatmul.mubr.f32.gmra.mrb[78].mxu0 %v1490_v42  ;;  %v1494_v21 = vmax.f32 %v1063_v48, 0.0 }
 0x1f0   : > { %v1495_v10 = vmax.f32 %v1065_v53, 0.0  ;;  %v1496_v58 = vmax.f32 %v1320_v35, 0.0  ;;  %v1068_v41 = vpop.f32.mrb[18].mxu0  ;;  %2888 = vmatpush1.bf16.msra.mxu0 %v4155_v31 }
 0x1f1   : > { %v1497_v1 = vmax.f32 %v1322_v9, 0.0  ;;  %v1069_v3 = vadd.f32 %v1068_v41, %v4224_v26  ;;  %v1070_v51 = vpop.f32.mrb[19].mxu0  ;;  %v1325_v25 = vpop.f32.mrb[18].mxu1  ;;  %2889 = vmatprep.subr.bf16.mxu0 %v3396_v5 }
 0x1f2   : > { %v1071_v4 = vadd.f32 %v1070_v51, %v4227_v13  ;;  %v1326_v8 = vadd.f32 %v1325_v25, %v4289_v39  ;;  %1765 = vmatprep.mubr.f32.mxu0 %v1495_v10  ;;  %v1327_v7 = vpop.f32.mrb[19].mxu1 }
 0x1f3   : > { %v1328_v16 = vadd.f32 %v1327_v7, %v4295_v11  ;;  %1766 = vmatmul.mubr.f32.gmra.mrb[80].mxu0 %v1494_v21  ;;  %1990 = vmatprep.mubr.f32.mxu1 %v1497_v1  ;;  %v1498_v19 = vmax.f32 %v1069_v3, 0.0 }
 0x1f4   : > { %v1499_v59 = vmax.f32 %v1071_v4, 0.0  ;;  %v1500_v31 = vmax.f32 %v1326_v8, 0.0  ;;  %v1074_v46 = vpop.f32.mrb[20].mxu0  ;;  %1991 = vmatmul.mubr.f32.vlgmr.msra.gmra.mrb[64].mxu1 %v1496_v58  ;;  %2891 = vmatpush1.bf16.msra.mxu0 %v4162_v38 }
 0x1f5   : > { %v1501_v27 = vmax.f32 %v1328_v16, 0.0  ;;  %v1075_v14 = vadd.f32 %v1074_v46, %v4224_v26  ;;  %v1076_v15 = vpop.f32.mrb[21].mxu0  ;;  %v1331_v37 = vpop.f32.mrb[20].mxu1  ;;  %2892 = vmatprep.subr.bf16.mxu0 %v3396_v5 }
 0x1f6   : > { %v1077_v56 = vadd.f32 %v1076_v15, %v4227_v13  ;;  %v1332_v30 = vadd.f32 %v1331_v37, %v4289_v39  ;;  %1770 = vmatprep.mubr.f32.mxu0 %v1499_v59  ;;  %v1333_v32 = vpop.f32.mrb[21].mxu1 }
 0x1f7   : > { %v1334_v57 = vadd.f32 %v1333_v32, %v4295_v11  ;;  %1771 = vmatmul.mubr.f32.gmra.mrb[82].mxu0 %v1498_v19  ;;  %1995 = vmatprep.mubr.f32.mxu1 %v1501_v27  ;;  %v1502_v29 = vmax.f32 %v1075_v14, 0.0 }
 0x1f8   : > { %v1503_v28 = vmax.f32 %v1077_v56, 0.0  ;;  %v1504_v38 = vmax.f32 %v1332_v30, 0.0  ;;  %v1080_v2 = vpop.f32.mrb[22].mxu0  ;;  %1996 = vmatmul.mubr.f32.gmra.mrb[66].mxu1 %v1500_v31  ;;  %2894 = vmatpush1.bf16.msra.mxu0 %v4169_v44 }
 0x1f9   : > { %v1505_v42 = vmax.f32 %v1334_v57, 0.0  ;;  %v1081_v48 = vadd.f32 %v1080_v2, %v4224_v26  ;;  %v1082_v17 = vpop.f32.mrb[23].mxu0  ;;  %v1337_v52 = vpop.f32.mrb[22].mxu1  ;;  %2895 = vmatprep.subr.bf16.mxu0 %v3396_v5 }
 0x1fa   : > { %v1083_v53 = vadd.f32 %v1082_v17, %v4227_v13  ;;  %v1338_v35 = vadd.f32 %v1337_v52, %v4289_v39  ;;  %1775 = vmatprep.mubr.f32.mxu0 %v1503_v28  ;;  %v1339_v34 = vpop.f32.mrb[23].mxu1 }
 0x1fb   : > { %v1340_v9 = vadd.f32 %v1339_v34, %v4295_v11  ;;  %1776 = vmatmul.mubr.f32.gmra.mrb[84].mxu0 %v1502_v29  ;;  %2000 = vmatprep.mubr.f32.mxu1 %v1505_v42  ;;  %v1506_v41 = vmax.f32 %v1081_v48, 0.0 }
 0x1fc   : > { %v1507_v10 = vmax.f32 %v1083_v53, 0.0  ;;  %v1508_v44 = vmax.f32 %v1338_v35, 0.0  ;;  %v1086_v58 = vpop.f32.mrb[24].mxu0  ;;  %2001 = vmatmul.mubr.f32.gmra.mrb[68].mxu1 %v1504_v38  ;;  %2897 = vmatpush1.bf16.msra.mxu0 %v4176_v47 }
 0x1fd   : > { %v1509_v21 = vmax.f32 %v1340_v9, 0.0  ;;  %v1087_v1 = vadd.f32 %v1086_v58, %v4224_v26  ;;  %v1088_v3 = vpop.f32.mrb[25].mxu0  ;;  %v1343_v51 = vpop.f32.mrb[24].mxu1  ;;  %2898 = vmatprep.subr.bf16.mxu0 %v3396_v5 }
 0x1fe   : > { %v1089_v25 = vadd.f32 %v1088_v3, %v4227_v13  ;;  %v1344_v4 = vadd.f32 %v1343_v51, %v4289_v39  ;;  %1780 = vmatprep.mubr.f32.mxu0 %v1507_v10  ;;  %v1345_v8 = vpop.f32.mrb[25].mxu1 }
 0x1ff   : > { %v1346_v7 = vadd.f32 %v1345_v8, %v4295_v11  ;;  %1781 = vmatmul.mubr.f32.gmra.mrb[86].mxu0 %v1506_v41  ;;  %2005 = vmatprep.mubr.f32.mxu1 %v1509_v21  ;;  %v1510_v31 = vmax.f32 %v1087_v1, 0.0 }
 0x200   : > { %v1511_v16 = vmax.f32 %v1089_v25, 0.0  ;;  %v1512_v47 = vmax.f32 %v1344_v4, 0.0  ;;  %v1092_v59 = vpop.f32.mrb[26].mxu0  ;;  %2006 = vmatmul.mubr.f32.gmra.mrb[70].mxu1 %v1508_v44  ;;  %2900 = vmatpush1.bf16.msra.mxu0 %v4183_v50 }
 0x201   : > { %v1513_v46 = vmax.f32 %v1346_v7, 0.0  ;;  %v1093_v19 = vadd.f32 %v1092_v59, %v4224_v26  ;;  %v1094_v27 = vpop.f32.mrb[27].mxu0  ;;  %v1349_v14 = vpop.f32.mrb[26].mxu1  ;;  %2901 = vmatprep.subr.bf16.mxu0 %v3396_v5 }
 0x202   : > { %v1095_v15 = vadd.f32 %v1094_v27, %v4227_v13  ;;  %v1350_v37 = vadd.f32 %v1349_v14, %v4289_v39  ;;  %1785 = vmatprep.mubr.f32.mxu0 %v1511_v16  ;;  %v1351_v56 = vpop.f32.mrb[27].mxu1 }
 0x203   : > { %v1352_v30 = vadd.f32 %v1351_v56, %v4295_v11  ;;  %1786 = vmatmul.mubr.f32.gmra.mrb[88].mxu0 %v1510_v31  ;;  %2010 = vmatprep.mubr.f32.mxu1 %v1513_v46  ;;  %v1514_v28 = vmax.f32 %v1093_v19, 0.0 }
 0x204   : > { %v1515_v32 = vmax.f32 %v1095_v15, 0.0  ;;  %v1516_v50 = vmax.f32 %v1350_v37, 0.0  ;;  %v1098_v57 = vpop.f32.mrb[28].mxu0  ;;  %2011 = vmatmul.mubr.f32.gmra.mrb[72].mxu1 %v1512_v47  ;;  %2903 = vmatpush1.bf16.msra.mxu0 %v4190_v55 }
 0x205   : > { %v1517_v38 = vmax.f32 %v1352_v30, 0.0  ;;  %v1099_v2 = vadd.f32 %v1098_v57, %v4224_v26  ;;  %v1100_v29 = vpop.f32.mrb[29].mxu0  ;;  %v1355_v42 = vpop.f32.mrb[28].mxu1  ;;  %2904 = vmatprep.subr.bf16.mxu0 %v3396_v5 }
 0x206   : > { %v1101_v48 = vadd.f32 %v1100_v29, %v4227_v13  ;;  %v1356_v17 = vadd.f32 %v1355_v42, %v4289_v39  ;;  %1790 = vmatprep.mubr.f32.mxu0 %v1515_v32  ;;  %v1357_v52 = vpop.f32.mrb[29].mxu1 }
 0x207   : > { %v1358_v53 = vadd.f32 %v1357_v52, %v4295_v11  ;;  %1791 = vmatmul.mubr.f32.gmra.mrb[90].mxu0 %v1514_v28  ;;  %2015 = vmatprep.mubr.f32.mxu1 %v1517_v38  ;;  %v1518_v9 = vmax.f32 %v1099_v2, 0.0 }
 0x208   : > { %v1519_v35 = vmax.f32 %v1101_v48, 0.0  ;;  %v1520_v55 = vmax.f32 %v1356_v17, 0.0  ;;  %v1104_v34 = vpop.f32.mrb[30].mxu0  ;;  %2016 = vmatmul.mubr.f32.gmra.mrb[74].mxu1 %v1516_v50  ;;  %2906 = vmatpush1.bf16.msra.mxu0 %v4197_v61 }
 0x209   : > { %v1521_v10 = vmax.f32 %v1358_v53, 0.0  ;;  %v1105_v44 = vadd.f32 %v1104_v34, %v4224_v26  ;;  %v1106_v58 = vpop.f32.mrb[31].mxu0  ;;  %v1361_v41 = vpop.f32.mrb[30].mxu1  ;;  %2907 = vmatprep.subr.bf16.mxu0 %v3396_v5 }
 0x20a   : > { %v1107_v21 = vadd.f32 %v1106_v58, %v4227_v13  ;;  %v1362_v1 = vadd.f32 %v1361_v41, %v4289_v39  ;;  %1795 = vmatprep.mubr.f32.mxu0 %v1519_v35  ;;  %v1363_v3 = vpop.f32.mrb[31].mxu1 }
 0x20b   : > { %v1364_v51 = vadd.f32 %v1363_v3, %v4295_v11  ;;  %1796 = vmatmul.mubr.f32.gmra.mrb[92].mxu0 %v1518_v9  ;;  %2020 = vmatprep.mubr.f32.mxu1 %v1521_v10  ;;  %v1522_v8 = vmax.f32 %v1105_v44, 0.0 }
 0x20c   : > { %v1523_v25 = vmax.f32 %v1107_v21, 0.0  ;;  %v1524_v61 = vmax.f32 %v1362_v1, 0.0  ;;  %v1110_v4 = vpop.f32.mrb[32].mxu0  ;;  %2021 = vmatmul.mubr.f32.gmra.mrb[76].mxu1 %v1520_v55  ;;  %2909 = vmatpush1.bf16.msra.mxu0 %v4204_v0 }
 0x20d   : > { %v1525_v7 = vmax.f32 %v1364_v51, 0.0  ;;  %v1111_v16 = vadd.f32 %v1110_v4, %v4224_v26  ;;  %v1112_v47 = vpop.f32.mrb[33].mxu0  ;;  %v1367_v59 = vpop.f32.mrb[32].mxu1  ;;  %2910 = vmatprep.subr.bf16.mxu0 %v3396_v5 }
 0x20e   : > { %v1113_v31 = vadd.f32 %v1112_v47, %v4227_v13  ;;  %v1368_v46 = vadd.f32 %v1367_v59, %v4289_v39  ;;  %1800 = vmatprep.mubr.f32.mxu0 %v1523_v25  ;;  %v1369_v19 = vpop.f32.mrb[33].mxu1 }
 0x20f   : > { %v1370_v27 = vadd.f32 %v1369_v19, %v4295_v11  ;;  %1801 = vmatmul.mubr.f32.gmra.mrb[94].mxu0 %v1522_v8  ;;  %2025 = vmatprep.mubr.f32.mxu1 %v1525_v7  ;;  %v1526_v37 = vmax.f32 %v1111_v16, 0.0 }
 0x210   : > { %v1527_v14 = vmax.f32 %v1113_v31, 0.0  ;;  %v1528_v0 = vmax.f32 %v1368_v46, 0.0  ;;  %v1116_v15 = vpop.f32.mrb[34].mxu0  ;;  %2026 = vmatmul.mubr.f32.gmra.mrb[78].mxu1 %v1524_v61  ;;  %2912 = vmatpush1.bf16.msra.mxu0 %v4211_v54 }
 0x211   : > { %v1529_v56 = vmax.f32 %v1370_v27, 0.0  ;;  %v1117_v5 = vadd.f32 %v1116_v15, %v4224_v26  ;;  %v1118_v30 = vpop.f32.mrb[35].mxu0  ;;  %v1373_v32 = vpop.f32.mrb[34].mxu1 }
 0x212   : > { %v1119_v50 = vadd.f32 %v1118_v30, %v4227_v13  ;;  %v1374_v57 = vadd.f32 %v1373_v32, %v4289_v39  ;;  %1805 = vmatprep.mubr.f32.mxu0 %v1527_v14  ;;  %v1375_v28 = vpop.f32.mrb[35].mxu1 }
 0x213   : > { %v1376_v38 = vadd.f32 %v1375_v28, %v4295_v11  ;;  %1806 = vmatmul.mubr.f32.gmra.mrb[96].mxu0 %v1526_v37  ;;  %2030 = vmatprep.mubr.f32.mxu1 %v1529_v56  ;;  %v1530_v54 = vmax.f32 %v1117_v5, 0.0 }
 0x214   : > { %v1531_v2 = vmax.f32 %v1119_v50, 0.0  ;;  %v1532_v29 = vmax.f32 %v1374_v57, 0.0  ;;  %v1122_v42 = vpop.f32.mrb[36].mxu0  ;;  %2031 = vmatmul.mubr.f32.gmra.mrb[80].mxu1 %v1528_v0 }
 0x215   : > { %v1533_v48 = vmax.f32 %v1376_v38, 0.0  ;;  %v1123_v17 = vadd.f32 %v1122_v42, %v4224_v26  ;;  %v1124_v52 = vpop.f32.mrb[37].mxu0  ;;  %v1379_v53 = vpop.f32.mrb[36].mxu1 }
 0x216   : > { %v1125_v35 = vadd.f32 %v1124_v52, %v4227_v13  ;;  %v1380_v55 = vadd.f32 %v1379_v53, %v4289_v39  ;;  %1810 = vmatprep.mubr.f32.mxu0 %v1531_v2  ;;  %v1381_v34 = vpop.f32.mrb[37].mxu1 }
 0x217   : > { %v1382_v9 = vadd.f32 %v1381_v34, %v4295_v11  ;;  %1811 = vmatmul.mubr.f32.gmra.mrb[98].mxu0 %v1530_v54  ;;  %2035 = vmatprep.mubr.f32.mxu1 %v1533_v48  ;;  %v1534_v41 = vmax.f32 %v1123_v17, 0.0 }
 0x218   : > { %v1535_v10 = vmax.f32 %v1125_v35, 0.0  ;;  %v1536_v44 = vmax.f32 %v1380_v55, 0.0  ;;  %v1128_v58 = vpop.f32.mrb[38].mxu0  ;;  %2036 = vmatmul.mubr.f32.gmra.mrb[82].mxu1 %v1532_v29 }
 0x219   : > { %v1537_v21 = vmax.f32 %v1382_v9, 0.0  ;;  %v1129_v1 = vadd.f32 %v1128_v58, %v4224_v26  ;;  %v1130_v3 = vpop.f32.mrb[39].mxu0  ;;  %v1385_v51 = vpop.f32.mrb[38].mxu1 }
 0x21a   : > { %v1131_v25 = vadd.f32 %v1130_v3, %v4227_v13  ;;  %v1386_v61 = vadd.f32 %v1385_v51, %v4289_v39  ;;  %1815 = vmatprep.mubr.f32.mxu0 %v1535_v10  ;;  %v1387_v4 = vpop.f32.mrb[39].mxu1 }
 0x21b   : > { %v1388_v8 = vadd.f32 %v1387_v4, %v4295_v11  ;;  %1816 = vmatmul.mubr.f32.gmra.mrb[100].mxu0 %v1534_v41  ;;  %2040 = vmatprep.mubr.f32.mxu1 %v1537_v21  ;;  %v1538_v59 = vmax.f32 %v1129_v1, 0.0 }
 0x21c   : > { %v1539_v7 = vmax.f32 %v1131_v25, 0.0  ;;  %v1540_v16 = vmax.f32 %v1386_v61, 0.0  ;;  %v1134_v47 = vpop.f32.mrb[40].mxu0  ;;  %2041 = vmatmul.mubr.f32.gmra.mrb[84].mxu1 %v1536_v44 }
 0x21d   : > { %v1541_v31 = vmax.f32 %v1388_v8, 0.0  ;;  %v1135_v46 = vadd.f32 %v1134_v47, %v4224_v26  ;;  %v1136_v19 = vpop.f32.mrb[41].mxu0  ;;  %v1391_v27 = vpop.f32.mrb[40].mxu1 }
 0x21e   : > { %v1137_v14 = vadd.f32 %v1136_v19, %v4227_v13  ;;  %v1392_v0 = vadd.f32 %v1391_v27, %v4289_v39  ;;  %1820 = vmatprep.mubr.f32.mxu0 %v1539_v7  ;;  %v1393_v15 = vpop.f32.mrb[41].mxu1 }
 0x21f   : > { %v1394_v37 = vadd.f32 %v1393_v15, %v4295_v11  ;;  %1821 = vmatmul.mubr.f32.gmra.mrb[102].mxu0 %v1538_v59  ;;  %2045 = vmatprep.mubr.f32.mxu1 %v1541_v31  ;;  %v1542_v32 = vmax.f32 %v1135_v46, 0.0 }
 0x220   : > { %v1543_v56 = vmax.f32 %v1137_v14, 0.0  ;;  %v1544_v5 = vmax.f32 %v1392_v0, 0.0  ;;  %v1140_v30 = vpop.f32.mrb[42].mxu0  ;;  %2046 = vmatmul.mubr.f32.gmra.mrb[86].mxu1 %v1540_v16 }
 0x221   : > { %v1545_v50 = vmax.f32 %v1394_v37, 0.0  ;;  %v1141_v57 = vadd.f32 %v1140_v30, %v4224_v26  ;;  %v1142_v28 = vpop.f32.mrb[43].mxu0  ;;  %v1397_v38 = vpop.f32.mrb[42].mxu1 }
 0x222   : > { %v1143_v2 = vadd.f32 %v1142_v28, %v4227_v13  ;;  %v1398_v29 = vadd.f32 %v1397_v38, %v4289_v39  ;;  %1825 = vmatprep.mubr.f32.mxu0 %v1543_v56  ;;  %v1399_v42 = vpop.f32.mrb[43].mxu1 }
 0x223   : > { %v1400_v54 = vadd.f32 %v1399_v42, %v4295_v11  ;;  %1826 = vmatmul.mubr.f32.gmra.mrb[104].mxu0 %v1542_v32  ;;  %2050 = vmatprep.mubr.f32.mxu1 %v1545_v50  ;;  %v1546_v53 = vmax.f32 %v1141_v57, 0.0 }
 0x224   : > { %v1547_v48 = vmax.f32 %v1143_v2, 0.0  ;;  %v1548_v17 = vmax.f32 %v1398_v29, 0.0  ;;  %v1146_v52 = vpop.f32.mrb[44].mxu0  ;;  %2051 = vmatmul.mubr.f32.gmra.mrb[88].mxu1 %v1544_v5 }
 0x225   : > { %v1549_v35 = vmax.f32 %v1400_v54, 0.0  ;;  %v1147_v55 = vadd.f32 %v1146_v52, %v4224_v26  ;;  %v1148_v34 = vpop.f32.mrb[45].mxu0  ;;  %v1403_v9 = vpop.f32.mrb[44].mxu1 }
 0x226   : > { %v1149_v10 = vadd.f32 %v1148_v34, %v4227_v13  ;;  %v1404_v44 = vadd.f32 %v1403_v9, %v4289_v39  ;;  %1830 = vmatprep.mubr.f32.mxu0 %v1547_v48  ;;  %v1405_v58 = vpop.f32.mrb[45].mxu1 }
 0x227   : > { %v1406_v41 = vadd.f32 %v1405_v58, %v4295_v11  ;;  %1831 = vmatmul.mubr.f32.gmra.mrb[106].mxu0 %v1546_v53  ;;  %2055 = vmatprep.mubr.f32.mxu1 %v1549_v35  ;;  %v1550_v51 = vmax.f32 %v1147_v55, 0.0 }
 0x228   : > { %v1551_v21 = vmax.f32 %v1149_v10, 0.0  ;;  %v1552_v1 = vmax.f32 %v1404_v44, 0.0  ;;  %v1152_v3 = vpop.f32.mrb[46].mxu0  ;;  %2056 = vmatmul.mubr.f32.gmra.mrb[90].mxu1 %v1548_v17 }
 0x229   : > { %v1553_v25 = vmax.f32 %v1406_v41, 0.0  ;;  %v1153_v61 = vadd.f32 %v1152_v3, %v4224_v26  ;;  %v1154_v4 = vpop.f32.mrb[47].mxu0  ;;  %v1409_v8 = vpop.f32.mrb[46].mxu1 }
 0x22a   : > { %v1155_v7 = vadd.f32 %v1154_v4, %v4227_v13  ;;  %v1410_v16 = vadd.f32 %v1409_v8, %v4289_v39  ;;  %1835 = vmatprep.mubr.f32.mxu0 %v1551_v21  ;;  %v1411_v47 = vpop.f32.mrb[47].mxu1 }
 0x22b   : > { %v1412_v59 = vadd.f32 %v1411_v47, %v4295_v11  ;;  %1836 = vmatmul.mubr.f32.gmra.mrb[108].mxu0 %v1550_v51  ;;  %2060 = vmatprep.mubr.f32.mxu1 %v1553_v25  ;;  %v1554_v27 = vmax.f32 %v1153_v61, 0.0 }
 0x22c   : > { %v1555_v31 = vmax.f32 %v1155_v7, 0.0  ;;  %v1556_v46 = vmax.f32 %v1410_v16, 0.0  ;;  %v1158_v19 = vpop.f32.mrb[48].mxu0  ;;  %2061 = vmatmul.mubr.f32.gmra.mrb[92].mxu1 %v1552_v1 }
 0x22d   : > { %v1557_v14 = vmax.f32 %v1412_v59, 0.0  ;;  %v1159_v0 = vadd.f32 %v1158_v19, %v4224_v26  ;;  %v1160_v15 = vpop.f32.mrb[49].mxu0  ;;  %v1415_v37 = vpop.f32.mrb[48].mxu1 }
 0x22e   : > { %v1161_v56 = vadd.f32 %v1160_v15, %v4227_v13  ;;  %v1416_v5 = vadd.f32 %v1415_v37, %v4289_v39  ;;  %1840 = vmatprep.mubr.f32.mxu0 %v1555_v31  ;;  %v1417_v30 = vpop.f32.mrb[49].mxu1 }
 0x22f   : > { %v1418_v32 = vadd.f32 %v1417_v30, %v4295_v11  ;;  %1841 = vmatmul.mubr.f32.gmra.mrb[110].mxu0 %v1554_v27  ;;  %2065 = vmatprep.mubr.f32.mxu1 %v1557_v14  ;;  %v1558_v38 = vmax.f32 %v1159_v0, 0.0 }
 0x230   : > { %v1559_v50 = vmax.f32 %v1161_v56, 0.0  ;;  %v1560_v57 = vmax.f32 %v1416_v5, 0.0  ;;  %v1164_v28 = vpop.f32.mrb[50].mxu0  ;;  %2066 = vmatmul.mubr.f32.gmra.mrb[94].mxu1 %v1556_v46 }
 0x231   : > { %v1561_v2 = vmax.f32 %v1418_v32, 0.0  ;;  %v1165_v29 = vadd.f32 %v1164_v28, %v4224_v26  ;;  %v1166_v42 = vpop.f32.mrb[51].mxu0  ;;  %v1421_v54 = vpop.f32.mrb[50].mxu1 }
 0x232   : > { %v1167_v48 = vadd.f32 %v1166_v42, %v4227_v13  ;;  %v1422_v17 = vadd.f32 %v1421_v54, %v4289_v39  ;;  %1845 = vmatprep.mubr.f32.mxu0 %v1559_v50  ;;  %v1423_v52 = vpop.f32.mrb[51].mxu1 }
 0x233   : > { %v1424_v53 = vadd.f32 %v1423_v52, %v4295_v11  ;;  %1846 = vmatmul.mubr.f32.gmra.mrb[112].mxu0 %v1558_v38  ;;  %2070 = vmatprep.mubr.f32.mxu1 %v1561_v2  ;;  %v1562_v9 = vmax.f32 %v1165_v29, 0.0 }
 0x234   : > { %v1563_v35 = vmax.f32 %v1167_v48, 0.0  ;;  %v1564_v55 = vmax.f32 %v1422_v17, 0.0  ;;  %v1170_v34 = vpop.f32.mrb[52].mxu0  ;;  %2071 = vmatmul.mubr.f32.gmra.mrb[96].mxu1 %v1560_v57 }
 0x235   : > { %v1565_v10 = vmax.f32 %v1424_v53, 0.0  ;;  %v1171_v44 = vadd.f32 %v1170_v34, %v4224_v26  ;;  %v1172_v58 = vpop.f32.mrb[53].mxu0  ;;  %v1427_v41 = vpop.f32.mrb[52].mxu1 }
 0x236   : > { %v1173_v21 = vadd.f32 %v1172_v58, %v4227_v13  ;;  %v1428_v1 = vadd.f32 %v1427_v41, %v4289_v39  ;;  %1850 = vmatprep.mubr.f32.mxu0 %v1563_v35  ;;  %v1429_v3 = vpop.f32.mrb[53].mxu1 }
 0x237   : > { %v1430_v51 = vadd.f32 %v1429_v3, %v4295_v11  ;;  %1851 = vmatmul.mubr.f32.gmra.mrb[114].mxu0 %v1562_v9  ;;  %2075 = vmatprep.mubr.f32.mxu1 %v1565_v10  ;;  %v1566_v8 = vmax.f32 %v1171_v44, 0.0 }
 0x238   : > { %v1567_v25 = vmax.f32 %v1173_v21, 0.0  ;;  %v1568_v61 = vmax.f32 %v1428_v1, 0.0  ;;  %v1176_v4 = vpop.f32.mrb[54].mxu0  ;;  %2076 = vmatmul.mubr.f32.gmra.mrb[98].mxu1 %v1564_v55 }
 0x239   : > { %v1569_v7 = vmax.f32 %v1430_v51, 0.0  ;;  %v1177_v16 = vadd.f32 %v1176_v4, %v4224_v26  ;;  %v1178_v47 = vpop.f32.mrb[55].mxu0  ;;  %v1433_v59 = vpop.f32.mrb[54].mxu1 }
 0x23a   : > { %v1179_v31 = vadd.f32 %v1178_v47, %v4227_v13  ;;  %v1434_v46 = vadd.f32 %v1433_v59, %v4289_v39  ;;  %1855 = vmatprep.mubr.f32.mxu0 %v1567_v25  ;;  %v1435_v19 = vpop.f32.mrb[55].mxu1 }
 0x23b   : > { %v1436_v27 = vadd.f32 %v1435_v19, %v4295_v11  ;;  %1856 = vmatmul.mubr.f32.gmra.mrb[116].mxu0 %v1566_v8  ;;  %2080 = vmatprep.mubr.f32.mxu1 %v1569_v7  ;;  %v1570_v37 = vmax.f32 %v1177_v16, 0.0 }
 0x23c   : > { %v1571_v14 = vmax.f32 %v1179_v31, 0.0  ;;  %v1572_v0 = vmax.f32 %v1434_v46, 0.0  ;;  %v1182_v15 = vpop.f32.mrb[56].mxu0  ;;  %2081 = vmatmul.mubr.f32.gmra.mrb[100].mxu1 %v1568_v61 }
 0x23d   : > { %v1573_v56 = vmax.f32 %v1436_v27, 0.0  ;;  %v1183_v5 = vadd.f32 %v1182_v15, %v4224_v26  ;;  %v1184_v30 = vpop.f32.mrb[57].mxu0  ;;  %v1439_v32 = vpop.f32.mrb[56].mxu1 }
 0x23e   : > { %v1185_v50 = vadd.f32 %v1184_v30, %v4227_v13  ;;  %v1440_v57 = vadd.f32 %v1439_v32, %v4289_v39  ;;  %1860 = vmatprep.mubr.f32.mxu0 %v1571_v14  ;;  %v1441_v28 = vpop.f32.mrb[57].mxu1  ;;  %v1274_v14 = vadd.f32 %v4233_v20, %v4295_v11 }
 0x23f   : > { %v1442_v38 = vadd.f32 %v1441_v28, %v4295_v11  ;;  %1861 = vmatmul.mubr.f32.gmra.mrb[118].mxu0 %v1570_v37  ;;  %2085 = vmatprep.mubr.f32.mxu1 %v1573_v56  ;;  %v1574_v54 = vmax.f32 %v1183_v5, 0.0  ;;  %v1278_v28 = vadd.f32 %v4236_v23, %v4289_v39  ;;  %v1290_v23 = vadd.f32 %v4252_v49, %v4289_v39 }
 0x240   : > { %v1575_v2 = vmax.f32 %v1185_v50, 0.0  ;;  %v1576_v29 = vmax.f32 %v1440_v57, 0.0  ;;  %v1188_v42 = vpop.f32.mrb[58].mxu0  ;;  %2086 = vmatmul.mubr.f32.gmra.mrb[102].mxu1 %v1572_v0  ;;  %v1465_v57 = vmax.f32 %v1274_v14, 0.0  ;;  %v4444_v14 = vld [vmem:[#allocation12] ss:$0 sm:$0xff] }
 0x241   : > { %v1577_v48 = vmax.f32 %v1442_v38, 0.0  ;;  %v1189_v17 = vadd.f32 %v1188_v42, %v4224_v26  ;;  %v1190_v52 = vpop.f32.mrb[59].mxu0  ;;  %v1445_v53 = vpop.f32.mrb[58].mxu1  ;;  %v1292_v42 = vadd.f32 %v4255_v33, %v4295_v11 }
 0x242   : > { %v1191_v35 = vadd.f32 %v1190_v52, %v4227_v13  ;;  %v1446_v55 = vadd.f32 %v1445_v53, %v4289_v39  ;;  %1865 = vmatprep.mubr.f32.mxu0 %v1575_v2  ;;  %v1447_v34 = vpop.f32.mrb[59].mxu1  ;;  %v1286_v2 = vadd.f32 %v4247_v45, %v4295_v11  ;;  %v1298_v45 = vadd.f32 %v4263_v60, %v4295_v11  ;;  %v2144_v52 = vld [vmem:[#allocation13 + $0x8] sm:$0xff] }
 0x243   : > { %v1448_v9 = vadd.f32 %v1447_v34, %v4295_v11  ;;  %1866 = vmatmul.mubr.f32.gmra.mrb[120].mxu0 %v1574_v54  ;;  %2090 = vmatprep.mubr.f32.mxu1 %v1577_v48  ;;  %v1578_v41 = vmax.f32 %v1189_v17, 0.0  ;;  %v1477_v48 = vmax.f32 %v1292_v42, 0.0  ;;  %v2143_v17 = vld [vmem:[#allocation13] sm:$0xff]  ;;  %v1302_v60 = vadd.f32 %v4267_v24, %v4289_v39 }
 0x244   : > { %v1579_v10 = vmax.f32 %v1191_v35, 0.0  ;;  %v1580_v44 = vmax.f32 %v1446_v55, 0.0  ;;  %v1194_v58 = vpop.f32.mrb[60].mxu0  ;;  %2091 = vmatmul.mubr.f32.gmra.mrb[104].mxu1 %v1576_v29  ;;  %v1284_v29 = vadd.f32 %v4244_v40, %v4289_v39  ;;  %v2913_v53 = vpack.c.bf16 %v2144_v52, %v2143_v17 }
 0x245   : > { %v1581_v21 = vmax.f32 %v1448_v9, 0.0  ;;  %v1195_v1 = vadd.f32 %v1194_v58, %v4224_v26  ;;  %v1196_v3 = vpop.f32.mrb[61].mxu0  ;;  %v1451_v51 = vpop.f32.mrb[60].mxu1  ;;  %v1476_v40 = vmax.f32 %v1290_v23, 0.0  ;;  %v1296_v35 = vadd.f32 %v4259_v62, %v4289_v39  ;;  %v2145_v58 = vld [vmem:[#allocation13 + $0x10] sm:$0xff] }
 0x246   : > { %v1197_v25 = vadd.f32 %v1196_v3, %v4227_v13  ;;  %v1452_v61 = vadd.f32 %v1451_v51, %v4289_v39  ;;  %1870 = vmatprep.mubr.f32.mxu0 %v1579_v10  ;;  %v1453_v4 = vpop.f32.mrb[61].mxu1  ;;  %v1472_v54 = vmax.f32 %v1284_v29, 0.0  ;;  %v1481_v33 = vmax.f32 %v1298_v45, 0.0  ;;  %2914 = vmatprep.subr.bf16.mxu1 %v2913_v53  ;;  %v2148_v51 = vld [vmem:[#allocation13 + $0x28] sm:$0xff] }
 0x247   : > { %v1454_v8 = vadd.f32 %v1453_v4, %v4295_v11  ;;  %1871 = vmatmul.mubr.f32.gmra.mrb[122].mxu0 %v1578_v41  ;;  %2095 = vmatprep.mubr.f32.mxu1 %v1581_v21  ;;  %v1582_v59 = vmax.f32 %v1195_v1, 0.0  ;;  %v1304_v55 = vadd.f32 %v4271_v12, %v4295_v11  ;;  %v1480_v49 = vmax.f32 %v1296_v35, 0.0  ;;  %v2146_v41 = vld [vmem:[#allocation13 + $0x18] sm:$0xff]  ;;  %v2151_v4 = vld [vmem:[#allocation13 + $0x40] sm:$0xff] }
 0x248   : > { %v1583_v7 = vmax.f32 %v1197_v25, 0.0  ;;  %v1584_v16 = vmax.f32 %v1452_v61, 0.0  ;;  %v1200_v47 = vpop.f32.mrb[62].mxu0  ;;  %2096 = vmatmul.mubr.f32.gmra.mrb[106].mxu1 %v1580_v44  ;;  %v1310_v9 = vadd.f32 %v4280_v22, %v4295_v11  ;;  %v1484_v10 = vmax.f32 %v1302_v60, 0.0 }
 0x249   : > { %v1585_v31 = vmax.f32 %v1454_v8, 0.0  ;;  %v1201_v46 = vadd.f32 %v1200_v47, %v4224_v26  ;;  %v1202_v19 = vpop.f32.mrb[63].mxu0  ;;  %v1457_v27 = vpop.f32.mrb[62].mxu1  ;;  %v1272_v26 = vadd.f32 %v4230_v18, %v4289_v39  ;;  %v1468_v18 = vmax.f32 %v1278_v28, 0.0  ;;  %2916 = vmatpush3.bf16.msra.mxu1 %v2913_v53  ;;  %v2152_v8 = vld [vmem:[#allocation13 + $0x48] sm:$0xff]  ;;  %v2155_v47 = vld [vmem:[#allocation13 + $0x60] sm:$0xff] }
 0x24a   : > { %v1203_v0 = vadd.f32 %v1202_v19, %v4227_v13  ;;  %v1458_v15 = vadd.f32 %v1457_v27, %v4289_v39  ;;  %1875 = vmatprep.mubr.f32.mxu0 %v1583_v7  ;;  %v1459_v37 = vpop.f32.mrb[63].mxu1  ;;  %v1280_v13 = vadd.f32 %v4239_v43, %v4295_v11  ;;  %v1473_v43 = vmax.f32 %v1286_v2, 0.0  ;;  %v2154_v7 = vld [vmem:[#allocation13 + $0x58] sm:$0xff] }
 0x24b   : > { %v1460_v56 = vadd.f32 %v1459_v37, %v4295_v11  ;;  %1876 = vmatmul.mubr.f32.gmra.mrb[124].mxu0 %v1582_v59  ;;  %2100 = vmatprep.mubr.f32.mxu1 %v1585_v31  ;;  %v1586_v32 = vmax.f32 %v1201_v46, 0.0  ;;  %v1464_v20 = vmax.f32 %v1272_v26, 0.0  ;;  %v1485_v34 = vmax.f32 %v1304_v55, 0.0  ;;  %v2156_v59 = vld [vmem:[#allocation13 + $0x68] sm:$0xff]  ;;  %v2157_v46 = vld [vmem:[#allocation13 + $0x70] sm:$0xff]  ;;  %v2158_v19 = vld [vmem:[#allocation13 + $0x78] sm:$0xff] }
 0x24c   : > { %v1587_v5 = vmax.f32 %v1203_v0, 0.0  ;;  %v1588_v30 = vmax.f32 %v1458_v15, 0.0  ;;  %2101 = vmatmul.mubr.f32.gmra.mrb[108].mxu1 %v1584_v16  ;;  %v1469_v38 = vmax.f32 %v1280_v13, 0.0  ;;  %v1308_v62 = vadd.f32 %v4275_v63, %v4289_v39  ;;  %v2147_v63 = vld [vmem:[#allocation13 + $0x20] sm:$0xff] }
 0x24d   : > { %v1589_v50 = vmax.f32 %v1460_v56, 0.0  ;;  %v1489_v44 = vmax.f32 %v1310_v9, 0.0  ;;  %v1316_v12 = vadd.f32 %v4292_v6, %v4295_v11  ;;  %v2917_v21 = vpack.c.bf16 %v2146_v41, %v2145_v58  ;;  %v2149_v6 = vld [vmem:[#allocation13 + $0x30] sm:$0xff]  ;;  %v2150_v11 = vld [vmem:[#allocation13 + $0x38] sm:$0xff] }
 0x24e   : > { %1880 = vmatprep.mubr.f32.mxu0 %v1587_v5  ;;  %v1488_v24 = vmax.f32 %v1308_v62, 0.0  ;;  %v1314_v1 = vadd.f32 %v4285_v36, %v4289_v39  ;;  %v2921_v25 = vpack.c.bf16 %v2148_v51, %v2147_v63  ;;  %v2925_v61 = vpack.c.bf16 %v2150_v11, %v2149_v6  ;;  %v2153_v39 = vld [vmem:[#allocation13 + $0x50] sm:$0xff] }
 0x24f   : > { %1881 = vmatmul.mubr.f32.gmra.mrb[126].mxu0 %v1586_v32  ;;  %2105 = vmatprep.mubr.f32.mxu1 %v1589_v50  ;;  %v1493_v22 = vmax.f32 %v1316_v12, 0.0  ;;  %v2929_v36 = vpack.c.bf16 %v2152_v8, %v2151_v4  ;;  %v2933_v16 = vpack.c.bf16 %v2154_v7, %v2153_v39  ;;  %v2937_v31 = vpack.c.bf16 %v2156_v59, %v2155_v47 }
 0x250   : > { %1950 = vmatprep.mubr.f32.mxu0 %v1465_v57  ;;  %2106 = vmatmul.mubr.f32.gmra.mrb[110].mxu1 %v1588_v30  ;;  %v1492_v3 = vmax.f32 %v1314_v1, 0.0  ;;  %v2941_v27 = vpack.c.bf16 %v2158_v19, %v2157_v46 }
 0x251   : > { %2918 = vmatprep.subr.bf16.mxu1 %v2917_v21 }
 0x252   : > { %2920 = vmatpush3.bf16.msra.mxu1 %v2917_v21 }
 0x253   : > { %1951 = vmatmul.mubr.f32.vlgmr.msra.gmra.mrb[64].mxu0 %v1464_v20  ;;  %2922 = vmatprep.subr.bf16.mxu1 %v2921_v25 }
 0x254   : > { %1955 = vmatprep.mubr.f32.mxu0 %v1469_v38 }
 0x256   : > { %2924 = vmatpush3.bf16.msra.mxu1 %v2921_v25 }
 0x257   : > { %1956 = vmatmul.mubr.f32.gmra.mrb[66].mxu0 %v1468_v18  ;;  %2926 = vmatprep.subr.bf16.mxu1 %v2925_v61 }
 0x258   : > { %1960 = vmatprep.mubr.f32.mxu0 %v1473_v43 }
 0x25a   : > { %2928 = vmatpush3.bf16.msra.mxu1 %v2925_v61 }
 0x25b   : > { %1961 = vmatmul.mubr.f32.gmra.mrb[68].mxu0 %v1472_v54  ;;  %2930 = vmatprep.subr.bf16.mxu1 %v2929_v36 }
 0x25c   : > { %1965 = vmatprep.mubr.f32.mxu0 %v1477_v48 }
 0x25e   : > { %2932 = vmatpush3.bf16.msra.mxu1 %v2929_v36 }
 0x25f   : > { %1966 = vmatmul.mubr.f32.gmra.mrb[70].mxu0 %v1476_v40  ;;  %2934 = vmatprep.subr.bf16.mxu1 %v2933_v16 }
 0x260   : > { %1970 = vmatprep.mubr.f32.mxu0 %v1481_v33 }
 0x262   : > { %2936 = vmatpush3.bf16.msra.mxu1 %v2933_v16 }
 0x263   : > { %1971 = vmatmul.mubr.f32.gmra.mrb[72].mxu0 %v1480_v49  ;;  %2938 = vmatprep.subr.bf16.mxu1 %v2937_v31 }
 0x264   : > { %1975 = vmatprep.mubr.f32.mxu0 %v1485_v34 }
 0x266   : > { %2940 = vmatpush3.bf16.msra.mxu1 %v2937_v31 }
 0x267   : > { %1976 = vmatmul.mubr.f32.gmra.mrb[74].mxu0 %v1484_v10  ;;  %2942 = vmatprep.subr.bf16.mxu1 %v2941_v27 }
 0x268   : > { %1980 = vmatprep.mubr.f32.mxu0 %v1489_v44 }
 0x26a   : > { %2944 = vmatpush3.bf16.msra.mxu1 %v2941_v27 }
 0x26b   : > { %1981 = vmatmul.mubr.f32.gmra.mrb[76].mxu0 %v1488_v24 }
 0x26c   : > { %1985 = vmatprep.mubr.f32.mxu0 %v1493_v22 }
 0x26f   : > { %1986 = vmatmul.mubr.f32.gmra.mrb[78].mxu0 %v1492_v3 }
 0x2c6   : > { %v1767_v0 = vpop.f32.mrb[80].mxu0 }
 0x2c7   : > { %v1768_v15 = vadd.f32 %v4444_v14, %v1767_v0  ;;  %v1769_v37 = vpop.f32.mrb[81].mxu0  ;;  %v1992_v56 = vpop.f32.mrb[64].mxu1 }
 0x2c8   : > { %v1994_v5 = vpop.f32.mrb[65].mxu1 }
 0x2c9   : > { %v4447_v30 = vadd.f32 %v1992_v56, %v1768_v15 }
 0x2ca   : > { %v1772_v26 = vpop.f32.mrb[82].mxu0 }
 0x2cb   : > { %v1773_v32 = vadd.f32 %v4444_v14, %v1772_v26  ;;  %v1774_v50 = vpop.f32.mrb[83].mxu0  ;;  %v1997_v57 = vpop.f32.mrb[66].mxu1 }
 0x2cc   : > { %v1999_v13 = vpop.f32.mrb[67].mxu1 }
 0x2cd   : > { %v4450_v20 = vadd.f32 %v1997_v57, %v1773_v32 }
 0x2ce   : > { %v1777_v28 = vpop.f32.mrb[84].mxu0 }
 0x2cf   : > { %v1778_v38 = vadd.f32 %v4444_v14, %v1777_v28  ;;  %v1779_v2 = vpop.f32.mrb[85].mxu0  ;;  %v2002_v18 = vpop.f32.mrb[68].mxu1 }
 0x2d0   : > { %v2004_v29 = vpop.f32.mrb[69].mxu1 }
 0x2d1   : > { %v4453_v43 = vadd.f32 %v2002_v18, %v1778_v38 }
 0x2d2   : > { %v1782_v42 = vpop.f32.mrb[86].mxu0 }
 0x2d3   : > { %v1783_v54 = vadd.f32 %v4444_v14, %v1782_v42  ;;  %v1784_v23 = vpop.f32.mrb[87].mxu0  ;;  %v2007_v48 = vpop.f32.mrb[70].mxu1 }
 0x2d4   : > { %v2009_v45 = vpop.f32.mrb[71].mxu1 }
 0x2d5   : > { %v4456_v17 = vadd.f32 %v2007_v48, %v1783_v54 }
 0x2d6   : > { %v1787_v52 = vpop.f32.mrb[88].mxu0 }
 0x2d7   : > { %v1788_v53 = vadd.f32 %v4444_v14, %v1787_v52  ;;  %v1789_v40 = vpop.f32.mrb[89].mxu0  ;;  %v2012_v35 = vpop.f32.mrb[72].mxu1 }
 0x2d8   : > { %v2014_v33 = vpop.f32.mrb[73].mxu1 }
 0x2d9   : > { %v4459_v55 = vadd.f32 %v2012_v35, %v1788_v53 }
 0x2da   : > { %v1792_v49 = vpop.f32.mrb[90].mxu0 }
 0x2db   : > { %v1793_v60 = vadd.f32 %v4444_v14, %v1792_v49  ;;  %v1794_v34 = vpop.f32.mrb[91].mxu0  ;;  %v2017_v9 = vpop.f32.mrb[74].mxu1 }
 0x2dc   : > { %v2019_v10 = vpop.f32.mrb[75].mxu1 }
 0x2dd   : > { %v4462_v62 = vadd.f32 %v2017_v9, %v1793_v60 }
 0x2de   : > { %v1797_v44 = vpop.f32.mrb[92].mxu0 }
 0x2df   : > { %v1798_v12 = vadd.f32 %v4444_v14, %v1797_v44  ;;  %v1799_v58 = vpop.f32.mrb[93].mxu0  ;;  %v2022_v41 = vpop.f32.mrb[76].mxu1 }
 0x2e0   : > { %v2024_v21 = vpop.f32.mrb[77].mxu1 }
 0x2e1   : > { %v4465_v24 = vadd.f32 %v2022_v41, %v1798_v12 }
 0x2e2   : > { %v1802_v1 = vpop.f32.mrb[94].mxu0 }
 0x2e3   : > { %v1803_v22 = vadd.f32 %v4444_v14, %v1802_v1  ;;  %v1804_v3 = vpop.f32.mrb[95].mxu0  ;;  %v2027_v63 = vpop.f32.mrb[78].mxu1 }
 0x2e4   : > { %v2029_v51 = vpop.f32.mrb[79].mxu1 }
 0x2e5   : > { %v4468_v25 = vadd.f32 %v2027_v63, %v1803_v22 }
 0x2e6   : > { %v1807_v6 = vpop.f32.mrb[96].mxu0 }
 0x2e7   : > { %v1808_v11 = vadd.f32 %v4444_v14, %v1807_v6  ;;  %v1809_v61 = vpop.f32.mrb[97].mxu0  ;;  %v2032_v4 = vpop.f32.mrb[80].mxu1 }
 0x2e8   : > { %v2034_v8 = vpop.f32.mrb[81].mxu1 }
 0x2e9   : > { %v4471_v36 = vadd.f32 %v2032_v4, %v1808_v11 }
 0x2ea   : > { %v1812_v39 = vpop.f32.mrb[98].mxu0 }
 0x2eb   : > { %v1813_v7 = vadd.f32 %v4444_v14, %v1812_v39  ;;  %v1814_v16 = vpop.f32.mrb[99].mxu0  ;;  %v2037_v47 = vpop.f32.mrb[82].mxu1 }
 0x2ec   : > { %v2039_v59 = vpop.f32.mrb[83].mxu1 }
 0x2ed   : > { %v4474_v31 = vadd.f32 %v2037_v47, %v1813_v7 }
 0x2ee   : > { %v1817_v46 = vpop.f32.mrb[100].mxu0 }
 0x2ef   : > { %v1818_v19 = vadd.f32 %v4444_v14, %v1817_v46  ;;  %v1819_v27 = vpop.f32.mrb[101].mxu0  ;;  %v2042_v0 = vpop.f32.mrb[84].mxu1 }
 0x2f0   : > { %v2044_v15 = vpop.f32.mrb[85].mxu1 }
 0x2f1   : > { %v4477_v37 = vadd.f32 %v2042_v0, %v1818_v19 }
 0x2f2   : > { %v1822_v56 = vpop.f32.mrb[102].mxu0 }
 0x2f3   : > { %v1823_v5 = vadd.f32 %v4444_v14, %v1822_v56  ;;  %v1824_v26 = vpop.f32.mrb[103].mxu0  ;;  %v2047_v32 = vpop.f32.mrb[86].mxu1 }
 0x2f4   : > { %v2049_v50 = vpop.f32.mrb[87].mxu1 }
 0x2f5   : > { %v4480_v57 = vadd.f32 %v2047_v32, %v1823_v5 }
 0x2f6   : > { %v1827_v13 = vpop.f32.mrb[104].mxu0 }
 0x2f7   : > { %v1828_v28 = vadd.f32 %v4444_v14, %v1827_v13  ;;  %v1829_v38 = vpop.f32.mrb[105].mxu0  ;;  %v2052_v2 = vpop.f32.mrb[88].mxu1 }
 0x2f8   : > { %v2054_v18 = vpop.f32.mrb[89].mxu1 }
 0x2f9   : > { %v4483_v29 = vadd.f32 %v2052_v2, %v1828_v28 }
 0x2fa   : > { %v1832_v42 = vpop.f32.mrb[106].mxu0 }
 0x2fb   : > { %v1833_v54 = vadd.f32 %v4444_v14, %v1832_v42  ;;  %v1834_v23 = vpop.f32.mrb[107].mxu0  ;;  %v2057_v48 = vpop.f32.mrb[90].mxu1 }
 0x2fc   : > { %v2059_v45 = vpop.f32.mrb[91].mxu1 }
 0x2fd   : > { %v4486_v52 = vadd.f32 %v2057_v48, %v1833_v54 }
 0x2fe   : > { %v1837_v53 = vpop.f32.mrb[108].mxu0 }
 0x2ff   : > { %v1838_v40 = vadd.f32 %v4444_v14, %v1837_v53  ;;  %v1839_v35 = vpop.f32.mrb[109].mxu0  ;;  %v2062_v33 = vpop.f32.mrb[92].mxu1 }
 0x300   : > { %v2064_v49 = vpop.f32.mrb[93].mxu1 }
 0x301   : > { %v4489_v60 = vadd.f32 %v2062_v33, %v1838_v40 }
 0x302   : > { %v1842_v34 = vpop.f32.mrb[110].mxu0 }
 0x303   : > { %v1843_v9 = vadd.f32 %v4444_v14, %v1842_v34  ;;  %v1844_v10 = vpop.f32.mrb[111].mxu0  ;;  %v2067_v44 = vpop.f32.mrb[94].mxu1 }
 0x304   : > { %v2069_v12 = vpop.f32.mrb[95].mxu1 }
 0x305   : > { %v4492_v58 = vadd.f32 %v2067_v44, %v1843_v9 }
 0x306   : > { %v1847_v41 = vpop.f32.mrb[112].mxu0 }
 0x307   : > { %v1848_v21 = vadd.f32 %v4444_v14, %v1847_v41  ;;  %v1849_v1 = vpop.f32.mrb[113].mxu0  ;;  %v2072_v22 = vpop.f32.mrb[96].mxu1 }
 0x308   : > { %v2074_v3 = vpop.f32.mrb[97].mxu1 }
 0x309   : > { %v4495_v63 = vadd.f32 %v2072_v22, %v1848_v21 }
 0x30a   : > { %v1852_v51 = vpop.f32.mrb[114].mxu0 }
 0x30b   : > { %v1853_v6 = vadd.f32 %v4444_v14, %v1852_v51  ;;  %v1854_v11 = vpop.f32.mrb[115].mxu0  ;;  %v2077_v61 = vpop.f32.mrb[98].mxu1 }
 0x30c   : > { %v2079_v4 = vpop.f32.mrb[99].mxu1 }
 0x30d   : > { %v4498_v8 = vadd.f32 %v2077_v61, %v1853_v6 }
 0x30e   : > { %v1857_v39 = vpop.f32.mrb[116].mxu0 }
 0x30f   : > { %v1858_v7 = vadd.f32 %v4444_v14, %v1857_v39  ;;  %v1859_v16 = vpop.f32.mrb[117].mxu0  ;;  %v2082_v47 = vpop.f32.mrb[100].mxu1 }
 0x310   : > { %v2084_v59 = vpop.f32.mrb[101].mxu1 }
 0x311   : > { %v4501_v46 = vadd.f32 %v2082_v47, %v1858_v7 }
 0x312   : > { %v1862_v19 = vpop.f32.mrb[118].mxu0 }
 0x313   : > { %v1863_v27 = vadd.f32 %v4444_v14, %v1862_v19  ;;  %v1864_v0 = vpop.f32.mrb[119].mxu0  ;;  %v2087_v15 = vpop.f32.mrb[102].mxu1 }
 0x314   : > { %v2089_v56 = vpop.f32.mrb[103].mxu1 }
 0x315   : > { %v4504_v5 = vadd.f32 %v2087_v15, %v1863_v27 }
 0x316   : > { %v1867_v26 = vpop.f32.mrb[120].mxu0 }
 0x317   : > { %v1868_v32 = vadd.f32 %v4444_v14, %v1867_v26  ;;  %v1869_v50 = vpop.f32.mrb[121].mxu0  ;;  %v2092_v13 = vpop.f32.mrb[104].mxu1 }
 0x318   : > { %v2094_v28 = vpop.f32.mrb[105].mxu1 }
 0x319   : > { %v4507_v38 = vadd.f32 %v2092_v13, %v1868_v32 }
 0x31a   : > { %v1872_v2 = vpop.f32.mrb[122].mxu0 }
 0x31b   : > { %v1873_v18 = vadd.f32 %v4444_v14, %v1872_v2  ;;  %v1874_v42 = vpop.f32.mrb[123].mxu0  ;;  %v2097_v54 = vpop.f32.mrb[106].mxu1 }
 0x31c   : > { %v2099_v23 = vpop.f32.mrb[107].mxu1 }
 0x31d   : > { %v4510_v48 = vadd.f32 %v2097_v54, %v1873_v18 }
 0x31e   : > { %v1877_v45 = vpop.f32.mrb[124].mxu0 }
 0x31f   : > { %v1878_v53 = vadd.f32 %v4444_v14, %v1877_v45  ;;  %v1879_v40 = vpop.f32.mrb[125].mxu0  ;;  %v2102_v35 = vpop.f32.mrb[108].mxu1 }
 0x320   : > { %v2104_v33 = vpop.f32.mrb[109].mxu1 }
 0x321   : > { %v4513_v49 = vadd.f32 %v2102_v35, %v1878_v53  ;;  %v2119_v35 = vmax.f32 %v4447_v30, 0.0  ;;  %v2120_v33 = vmax.f32 %v4450_v20, 0.0  ;;  %v2126_v30 = vmax.f32 %v4468_v25, 0.0 }
 0x322   : > { %v1882_v34 = vpop.f32.mrb[126].mxu0  ;;  %v2127_v20 = vmax.f32 %v4471_v36, 0.0  ;;  %v2133_v25 = vmax.f32 %v4489_v60, 0.0  ;;  %v2134_v36 = vmax.f32 %v4492_v58, 0.0  ;;  %v2140_v60 = vmax.f32 %v4510_v48, 0.0 }
 0x323   : > { %v1883_v9 = vadd.f32 %v4444_v14, %v1882_v34  ;;  %v1884_v10 = vpop.f32.mrb[127].mxu0  ;;  %v2107_v44 = vpop.f32.mrb[110].mxu1  ;;  %v2121_v34 = vmax.f32 %v4453_v43, 0.0  ;;  %v2128_v43 = vmax.f32 %v4474_v31, 0.0  ;;  %v2135_v31 = vmax.f32 %v4495_v63, 0.0 }
 0x324   : > { %v2109_v12 = vpop.f32.mrb[111].mxu1  ;;  %v2123_v10 = vmax.f32 %v4459_v55, 0.0  ;;  %v2130_v55 = vmax.f32 %v4480_v57, 0.0  ;;  %v2137_v57 = vmax.f32 %v4501_v46, 0.0  ;;  %v2141_v58 = vmax.f32 %v4513_v49, 0.0 }
 0x325   : > { %v4516_v41 = vadd.f32 %v2107_v44, %v1883_v9  ;;  %v2122_v9 = vmax.f32 %v4456_v17, 0.0  ;;  %v2125_v44 = vmax.f32 %v4465_v24, 0.0  ;;  %v2129_v17 = vmax.f32 %v4477_v37, 0.0 }
 0x326   : > { %v1952_v21 = vpop.f32.mrb[64].mxu0  ;;  %v2132_v24 = vmax.f32 %v4486_v52, 0.0  ;;  %v2136_v37 = vmax.f32 %v4498_v8, 0.0  ;;  %v2139_v52 = vmax.f32 %v4507_v38, 0.0  ;;  %v4551_v8 = vld [vmem:[#allocation15] ss:$0 sm:$0xff] }
 0x327   : > { %v2977_v1 = vadd.f32 %v4444_v14, %v1952_v21  ;;  %v1954_v22 = vpop.f32.mrb[65].mxu0  ;;  %v2142_v63 = vmax.f32 %v4516_v41, 0.0 }
 0x329   : > { %v2111_v3 = vmax.f32 %v2977_v1, 0.0 }
 0x32a   : > { %v1957_v51 = vpop.f32.mrb[66].mxu0 }
 0x32b   : > { %v2978_v6 = vadd.f32 %v4444_v14, %v1957_v51  ;;  %v1959_v11 = vpop.f32.mrb[67].mxu0  ;;  %2705 = vmatprep.mubr.f32.mxu1 %v2111_v3 }
 0x32d   : > { %v2112_v61 = vmax.f32 %v2978_v6, 0.0 }
 0x32e   : > { %v1962_v4 = vpop.f32.mrb[68].mxu0 }
 0x32f   : > { %v2979_v39 = vadd.f32 %v4444_v14, %v1962_v4  ;;  %v1964_v7 = vpop.f32.mrb[69].mxu0  ;;  %2706 = vmatmul.mubr.f32.vlgmr.msra.gmra.mrb[112].mxu1 %v2112_v61 }
 0x331   : > { %v2113_v16 = vmax.f32 %v2979_v39, 0.0 }
 0x332   : > { %v1967_v47 = vpop.f32.mrb[70].mxu0 }
 0x333   : > { %v2980_v59 = vadd.f32 %v4444_v14, %v1967_v47  ;;  %v1969_v19 = vpop.f32.mrb[71].mxu0  ;;  %2708 = vmatprep.mubr.f32.mxu1 %v2113_v16 }
 0x335   : > { %v2114_v27 = vmax.f32 %v2980_v59, 0.0 }
 0x336   : > { %v1972_v0 = vpop.f32.mrb[72].mxu0 }
 0x337   : > { %v2981_v15 = vadd.f32 %v4444_v14, %v1972_v0  ;;  %v1974_v56 = vpop.f32.mrb[73].mxu0  ;;  %2709 = vmatmul.mubr.f32.gmra.mrb[114].mxu1 %v2114_v27 }
 0x339   : > { %v2115_v26 = vmax.f32 %v2981_v15, 0.0 }
 0x33a   : > { %v1977_v32 = vpop.f32.mrb[74].mxu0 }
 0x33b   : > { %v2982_v50 = vadd.f32 %v4444_v14, %v1977_v32  ;;  %v1979_v13 = vpop.f32.mrb[75].mxu0  ;;  %2711 = vmatprep.mubr.f32.mxu1 %v2115_v26 }
 0x33d   : > { %v2116_v28 = vmax.f32 %v2982_v50, 0.0 }
 0x33e   : > { %v1982_v2 = vpop.f32.mrb[76].mxu0 }
 0x33f   : > { %v2983_v18 = vadd.f32 %v4444_v14, %v1982_v2  ;;  %v1984_v42 = vpop.f32.mrb[77].mxu0  ;;  %2712 = vmatmul.mubr.f32.gmra.mrb[116].mxu1 %v2116_v28 }
 0x341   : > { %v2117_v54 = vmax.f32 %v2983_v18, 0.0 }
 0x342   : > { %v1987_v23 = vpop.f32.mrb[78].mxu0 }
 0x343   : > { %v2984_v45 = vadd.f32 %v4444_v14, %v1987_v23  ;;  %v1989_v53 = vpop.f32.mrb[79].mxu0  ;;  %2714 = vmatprep.mubr.f32.mxu1 %v2117_v54  ;;  %v2124_v14 = vmax.f32 %v4462_v62, 0.0  ;;  %v2131_v62 = vmax.f32 %v4483_v29, 0.0  ;;  %v2138_v29 = vmax.f32 %v4504_v5, 0.0 }
 0x345   : > { %v2118_v40 = vmax.f32 %v2984_v45, 0.0 }
 0x347   : > { %2715 = vmatmul.mubr.f32.gmra.mrb[118].mxu1 %v2118_v40 }
 0x348   : > { %2717 = vmatprep.mubr.f32.mxu1 %v2119_v35 }
 0x34b   : > { %2718 = vmatmul.mubr.f32.gmra.mrb[120].mxu1 %v2120_v33 }
 0x34c   : > { %2720 = vmatprep.mubr.f32.mxu1 %v2121_v34 }
 0x34f   : > { %2721 = vmatmul.mubr.f32.gmra.mrb[122].mxu1 %v2122_v9 }
 0x350   : > { %2723 = vmatprep.mubr.f32.mxu1 %v2123_v10 }
 0x353   : > { %2724 = vmatmul.mubr.f32.gmra.mrb[124].mxu1 %v2124_v14 }
 0x354   : > { %2726 = vmatprep.mubr.f32.mxu1 %v2125_v44 }
 0x357   : > { %2727 = vmatmul.mubr.f32.gmra.mrb[126].mxu1 %v2126_v30 }
 0x358   : > { %2729 = vmatprep.mubr.f32.mxu1 %v2127_v20 }
 0x35b   : > { %2730 = vmatmul.mubr.f32.gmra.mrb[128].mxu1 %v2128_v43 }
 0x35c   : > { %2732 = vmatprep.mubr.f32.mxu1 %v2129_v17 }
 0x35f   : > { %2733 = vmatmul.mubr.f32.gmra.mrb[130].mxu1 %v2130_v55 }
 0x360   : > { %2735 = vmatprep.mubr.f32.mxu1 %v2131_v62 }
 0x363   : > { %2736 = vmatmul.mubr.f32.gmra.mrb[132].mxu1 %v2132_v24 }
 0x364   : > { %2738 = vmatprep.mubr.f32.mxu1 %v2133_v25 }
 0x367   : > { %2739 = vmatmul.mubr.f32.gmra.mrb[134].mxu1 %v2134_v36 }
 0x368   : > { %2741 = vmatprep.mubr.f32.mxu1 %v2135_v31 }
 0x36b   : > { %2742 = vmatmul.mubr.f32.gmra.mrb[136].mxu1 %v2136_v37 }
 0x36c   : > { %2744 = vmatprep.mubr.f32.mxu1 %v2137_v57 }
 0x36f   : > { %2745 = vmatmul.mubr.f32.gmra.mrb[138].mxu1 %v2138_v29 }
 0x370   : > { %2747 = vmatprep.mubr.f32.mxu1 %v2139_v52 }
 0x373   : > { %2748 = vmatmul.mubr.f32.gmra.mrb[140].mxu1 %v2140_v60 }
 0x374   : > { %2750 = vmatprep.mubr.f32.mxu1 %v2141_v58 }
 0x377   : > { %2751 = vmatmul.mubr.f32.gmra.mrb[142].mxu1 %v2142_v63 }
 0x402   : > { %v2707_v46 = vpop.f32.mrb[112].mxu1 }
 0x403   : > { %v2238_v5 = vadd.f32 %v2707_v46, %v4551_v8  ;;  %v2232_v38 = vpop.f32.mrb[113].mxu1 }
 0x404   : > { %v2233_v48 = vadd.f32 %v4551_v8, %v2232_v38 }
 0x405   : > { %2392 = vst [vmem:[%s4556_s18 + $0x8] sm:$0xff] %v2238_v5 }
 0x406   : > { %2391 = vst [vmem:[%s4556_s18] sm:$0xff] %v2233_v48 }
 0x40a   : > { %v2710_v49 = vpop.f32.mrb[114].mxu1 }
 0x40b   : > { %v2248_v12 = vadd.f32 %v2710_v49, %v4551_v8  ;;  %v2242_v41 = vpop.f32.mrb[115].mxu1 }
 0x40c   : > { %v2243_v21 = vadd.f32 %v4551_v8, %v2242_v41 }
 0x40d   : > { %2394 = vst [vmem:[%s4556_s18 + $0x18] sm:$0xff] %v2248_v12 }
 0x40e   : > { %2393 = vst [vmem:[%s4556_s18 + $0x10] sm:$0xff] %v2243_v21 }
 0x412   : > { %v2713_v1 = vpop.f32.mrb[116].mxu1 }
 0x413   : > { %v2258_v22 = vadd.f32 %v2713_v1, %v4551_v8  ;;  %v2252_v3 = vpop.f32.mrb[117].mxu1 }
 0x414   : > { %v2253_v51 = vadd.f32 %v4551_v8, %v2252_v3 }
 0x415   : > { %2396 = vst [vmem:[%s4556_s18 + $0x28] sm:$0xff] %v2258_v22 }
 0x416   : > { %2395 = vst [vmem:[%s4556_s18 + $0x20] sm:$0xff] %v2253_v51 }
 0x41a   : > { %v2716_v6 = vpop.f32.mrb[118].mxu1 }
 0x41b   : > { %v2268_v11 = vadd.f32 %v2716_v6, %v4551_v8  ;;  %v2262_v61 = vpop.f32.mrb[119].mxu1 }
 0x41c   : > { %v2263_v4 = vadd.f32 %v4551_v8, %v2262_v61 }
 0x41d   : > { %2398 = vst [vmem:[%s4556_s18 + $0x38] sm:$0xff] %v2268_v11 }
 0x41e   : > { %2397 = vst [vmem:[%s4556_s18 + $0x30] sm:$0xff] %v2263_v4  ;;  %v2719_v39 = vpop.f32.mrb[120].mxu1 }
 0x41f   : > { %v2278_v7 = vadd.f32 %v2719_v39, %v4551_v8  ;;  %v2272_v16 = vpop.f32.mrb[121].mxu1 }
 0x420   : > { %v2273_v47 = vadd.f32 %v4551_v8, %v2272_v16 }
 0x421   : > { %2400 = vst [vmem:[%s4556_s18 + $0x48] sm:$0xff] %v2278_v7 }
 0x422   : > { %2399 = vst [vmem:[%s4556_s18 + $0x40] sm:$0xff] %v2273_v47  ;;  %v2722_v59 = vpop.f32.mrb[122].mxu1 }
 0x423   : > { %v2288_v19 = vadd.f32 %v2722_v59, %v4551_v8  ;;  %v2282_v27 = vpop.f32.mrb[123].mxu1 }
 0x424   : > { %v2283_v0 = vadd.f32 %v4551_v8, %v2282_v27 }
 0x425   : > { %2402 = vst [vmem:[%s4556_s18 + $0x58] sm:$0xff] %v2288_v19 }
 0x426   : > { %2401 = vst [vmem:[%s4556_s18 + $0x50] sm:$0xff] %v2283_v0  ;;  %v2725_v15 = vpop.f32.mrb[124].mxu1 }
 0x427   : > { %v2298_v56 = vadd.f32 %v2725_v15, %v4551_v8  ;;  %v2292_v26 = vpop.f32.mrb[125].mxu1 }
 0x428   : > { %v2293_v32 = vadd.f32 %v4551_v8, %v2292_v26 }
 0x429   : > { %2404 = vst [vmem:[%s4556_s18 + $0x68] sm:$0xff] %v2298_v56 }
 0x42a   : > { %2403 = vst [vmem:[%s4556_s18 + $0x60] sm:$0xff] %v2293_v32  ;;  %v2728_v50 = vpop.f32.mrb[126].mxu1 }
 0x42b   : > { %v2308_v13 = vadd.f32 %v2728_v50, %v4551_v8  ;;  %v2302_v28 = vpop.f32.mrb[127].mxu1 }
 0x42c   : > { %v2303_v2 = vadd.f32 %v4551_v8, %v2302_v28 }
 0x42d   : > { %2406 = vst [vmem:[%s4556_s18 + $0x78] sm:$0xff] %v2308_v13 }
 0x42e   : > { %2405 = vst [vmem:[%s4556_s18 + $0x70] sm:$0xff] %v2303_v2  ;;  %v2731_v18 = vpop.f32.mrb[128].mxu1 }
 0x42f   : > { %v2318_v42 = vadd.f32 %v2731_v18, %v4551_v8  ;;  %v2312_v54 = vpop.f32.mrb[129].mxu1 }
 0x430   : > { %v2313_v23 = vadd.f32 %v4551_v8, %v2312_v54 }
 0x431   : > { %2408 = vst [vmem:[%s4556_s18 + $0x88] sm:$0xff] %v2318_v42 }
 0x432   : > { %2407 = vst [vmem:[%s4556_s18 + $0x80] sm:$0xff] %v2313_v23  ;;  %v2734_v45 = vpop.f32.mrb[130].mxu1 }
 0x433   : > { %v2328_v53 = vadd.f32 %v2734_v45, %v4551_v8  ;;  %v2322_v40 = vpop.f32.mrb[131].mxu1 }
 0x434   : > { %v2323_v35 = vadd.f32 %v4551_v8, %v2322_v40 }
 0x435   : > { %2410 = vst [vmem:[%s4556_s18 + $0x98] sm:$0xff] %v2328_v53 }
 0x436   : > { %2409 = vst [vmem:[%s4556_s18 + $0x90] sm:$0xff] %v2323_v35  ;;  %v2737_v33 = vpop.f32.mrb[132].mxu1 }
 0x437   : > { %v2338_v34 = vadd.f32 %v2737_v33, %v4551_v8  ;;  %v2332_v9 = vpop.f32.mrb[133].mxu1 }
 0x438   : > { %v2333_v10 = vadd.f32 %v4551_v8, %v2332_v9 }
 0x439   : > { %2412 = vst [vmem:[%s4556_s18 + $0xa8] sm:$0xff] %v2338_v34 }
 0x43a   : > { %2411 = vst [vmem:[%s4556_s18 + $0xa0] sm:$0xff] %v2333_v10  ;;  %v2740_v14 = vpop.f32.mrb[134].mxu1 }
 0x43b   : > { %v2348_v44 = vadd.f32 %v2740_v14, %v4551_v8  ;;  %v2342_v30 = vpop.f32.mrb[135].mxu1 }
 0x43c   : > { %v2343_v20 = vadd.f32 %v4551_v8, %v2342_v30 }
 0x43d   : > { %2414 = vst [vmem:[%s4556_s18 + $0xb8] sm:$0xff] %v2348_v44 }
 0x43e   : > { %2413 = vst [vmem:[%s4556_s18 + $0xb0] sm:$0xff] %v2343_v20  ;;  %v2743_v43 = vpop.f32.mrb[136].mxu1 }
 0x43f   : > { %v2358_v17 = vadd.f32 %v2743_v43, %v4551_v8  ;;  %v2352_v55 = vpop.f32.mrb[137].mxu1 }
 0x440   : > { %v2353_v62 = vadd.f32 %v4551_v8, %v2352_v55 }
 0x441   : > { %2416 = vst [vmem:[%s4556_s18 + $0xc8] sm:$0xff] %v2358_v17 }
 0x442   : > { %2415 = vst [vmem:[%s4556_s18 + $0xc0] sm:$0xff] %v2353_v62  ;;  %v2746_v24 = vpop.f32.mrb[138].mxu1 }
 0x443   : > { %v2368_v25 = vadd.f32 %v2746_v24, %v4551_v8  ;;  %v2362_v36 = vpop.f32.mrb[139].mxu1 }
 0x444   : > { %v2363_v31 = vadd.f32 %v4551_v8, %v2362_v36 }
 0x445   : > { %2418 = vst [vmem:[%s4556_s18 + $0xd8] sm:$0xff] %v2368_v25 }
 0x446   : > { %2417 = vst [vmem:[%s4556_s18 + $0xd0] sm:$0xff] %v2363_v31  ;;  %v2749_v37 = vpop.f32.mrb[140].mxu1 }
 0x447   : > { %v2378_v57 = vadd.f32 %v2749_v37, %v4551_v8  ;;  %v2372_v29 = vpop.f32.mrb[141].mxu1 }
 0x448   : > { %v2373_v52 = vadd.f32 %v4551_v8, %v2372_v29 }
 0x449   : > { %2420 = vst [vmem:[%s4556_s18 + $0xe8] sm:$0xff] %v2378_v57 }
 0x44a   : > { %2419 = vst [vmem:[%s4556_s18 + $0xe0] sm:$0xff] %v2373_v52  ;;  %v2752_v60 = vpop.f32.mrb[142].mxu1 }
 0x44b   : > { %v2388_v58 = vadd.f32 %v2752_v60, %v4551_v8  ;;  %v2382_v63 = vpop.f32.mrb[143].mxu1 }
 0x44c   : > { %v2383_v46 = vadd.f32 %v4551_v8, %v2382_v63 }
 0x44d   : > { %2422 = vst [vmem:[%s4556_s18 + $0xf8] sm:$0xff] %v2388_v58 }
 0x44e   : > { %2421 = vst [vmem:[%s4556_s18 + $0xf0] sm:$0xff] %v2383_v46 }
 0x44f PF: > { %s24_s30 = sadd.s32 1, %s3381_s30  }
 0x450   : > { %p21_p8 = scmp.ge.s32.totalorder %s24_s30, 4  }
 0x452   :  { %23 = sbr.rel (!%p21_p8) target bundleno = 7 (0x7), region = 133 }
 0x459   :  { %2445 = vsyncpa [#allocation4], 1 }
 0x45a   :  { %2447 = vsyncpa [#allocation4 + $0x1], 1 }
 0x45b   :  { %2448 = vsyncpa [#allocation8], 1 }
 0x45c   :  { %2449 = vsyncpa [#allocation11], 1 }
 0x45d   :  { %2450 = vsyncpa [#allocation14], 1 }
 0x45e   :  { %2451 = vsyncpa [#allocation5], 1 }
 0x45f   :  { %2453 = vsyncpa [#allocation5 + $0x1], 1 }

</bundles_post_ra>
